<compile_context>
chip_gen: v6e
topology: v6e:2x2x1
jax: 0.10.0
libtpu: 0.0.40
codegen_flags: <defaults>
</compile_context>

<pallas_src>
import functools
import numpy as np
import jax
import jax.numpy as jnp
from jax import lax
from jax.experimental import pallas as pl
from jax.experimental.pallas import tpu as pltpu


def round_up(x, m):
    return (x + m - 1) // m * m


# ---------------------------------------------------------------------------
# Fused kernel: stacked LSTM (all layers) + fused per-step vocab projection.
# ---------------------------------------------------------------------------
def fused_lstm_decoder_kernel(x_ref, w_ih_ref, w_hh_ref, b_ref,
                              w_out_ref, b_out_ref, logits_ref,
                              x_scr, gx_scr, h_scr, c_scr, *, hidden_size):
    """Shapes (padded, time-major, batch flattened into rows):

    x_ref:      (T*B_pad, E_pad)      f32   layer-0 input sequence
    w_ih_ref:   (L, DW,    G_pad)     bf16  input->gate weights, gates packed at stride H
    w_hh_ref:   (L, HP,    G_pad)     bf16  hidden->gate weights, gates packed at stride H
    b_ref:      (L, 1,     G_pad)     f32   b_ih + b_hh (packed)
    w_out_ref:  (HP, V_pad)           bf16  vocab projection
    b_out_ref:  (1, V_pad)            f32
    logits_ref: (T*B_pad, V_pad)      f32   output
    x_scr:      (T*B_pad, HP)         f32   inter-layer activations (h of previous layer)
    gx_scr:     (T*B_pad, G_pad)      f32   hoisted input projection of the whole sequence
    h_scr,c_scr:(B_pad, HP)           f32   recurrent state (valid lanes [0, H))
    PyTorch gate order: i, f, g, o packed tightly (offsets 0, H, 2H, 3H).
    """
    N, E_pad = x_ref.shape                 # N = T * B_pad
    B_pad, HP = h_scr.shape
    G_pad = gx_scr.shape[1]
    L, DW, _ = w_ih_ref.shape
    T = N // B_pad
    H = hidden_size
    f32, bf16 = jnp.float32, jnp.bfloat16

    # Loop-invariant lane constants (hoisted: JAX does not CSE broadcast_in_dim).
    glane = lax.broadcasted_iota(jnp.int32, (B_pad, G_pad), 1)
    is_g = (glane >= 2 * H) & (glane < 3 * H)                  # tanh-gate lanes
    gate_scale = jnp.where(is_g, 1.0, 0.5).astype(f32)         # sigmoid(x)=0.5*tanh(0.5x)+0.5
    gate_off = jnp.where(is_g, 0.0, 0.5).astype(f32)
    if H != HP:
        hlane = lax.broadcasted_iota(jnp.int32, (B_pad, HP), 1)
        hmaskf = (hlane < H).astype(f32)                       # valid hidden lanes

    for l in range(L):                     # static layer loop, weights stacked on dim 0
        # Hoisted input projection (+bias) for ALL time steps: one MXU matmul per layer.
        if l == 0:
            xin = x_ref[...]
            w_in = w_ih_ref[l] if DW == E_pad else w_ih_ref[l][0:E_pad, :]
        else:
            xin = x_scr[...]
            w_in = w_ih_ref[l] if DW == HP else w_ih_ref[l][0:HP, :]
        gx_scr[...] = (jnp.dot(xin.astype(bf16), w_in, preferred_element_type=f32)
                       + b_ref[l])

        h_scr[...] = jnp.zeros_like(h_scr)
        c_scr[...] = jnp.zeros_like(c_scr)

        def step(t, carry, l=l):
            row = pl.multiple_of(t * B_pad, B_pad)
            # Only the small packed recurrent matmul is on the serial critical path.
            gates = gx_scr[pl.ds(row, B_pad)] + jnp.dot(
                h_scr[...].astype(bf16), w_hh_ref[l],
                preferred_element_type=f32)                      # (B_pad, G_pad) packed i,f,g,o
            # One EUP tanh pass for all four gates.
            th = jnp.tanh(gates * gate_scale)
            act = th * gate_scale + gate_off                     # sigmoid(i,f,o) / tanh(g)
            # Re-align f/g/o blocks onto lanes [0, H) with XLU rotations (free-ish slot).
            act_i = act
            act_f = pltpu.roll(act, G_pad - H, 1)
            act_g = pltpu.roll(act, G_pad - 2 * H, 1)
            act_o = pltpu.roll(act, G_pad - 3 * H, 1)
            if G_pad != HP:
                act_i = act_i[:, 0:HP]
                act_f = act_f[:, 0:HP]
                act_g = act_g[:, 0:HP]
                act_o = act_o[:, 0:HP]
            c_new = act_f * c_scr[...] + act_i * act_g
            if H != HP:
                c_new = c_new * hmaskf       # kill pad-lane garbage; h pad lanes then tanh(0)=0
            h_new = act_o * jnp.tanh(c_new)
            c_scr[...] = c_new
            h_scr[...] = h_new
            if l == L - 1:
                # Fused vocab projection: overlap with the recurrence and spread the
                # logits writeback instead of a trailing serial projection phase.
                logits_ref[pl.ds(row, B_pad), :] = (
                    jnp.dot(h_new.astype(bf16), w_out_ref[...],
                            preferred_element_type=f32) + b_out_ref[...])
            else:
                x_scr[pl.ds(row, B_pad), :] = h_new
            return carry

        lax.fori_loop(0, T, step, 0, unroll=True)


def run_fused_decoder(x_flat, w_ih, w_hh, b, w_out, b_out, B_pad, hidden_size):
    N, E_pad = x_flat.shape
    L, DW, G_pad = w_ih.shape
    HP = w_hh.shape[1]
    V_pad = w_out.shape[1]
    kernel = functools.partial(fused_lstm_decoder_kernel, hidden_size=hidden_size)
    return pl.pallas_call(
        kernel,
        out_shape=jax.ShapeDtypeStruct((N, V_pad), jnp.float32),
        grid=(1,),
        in_specs=[
            pl.BlockSpec((N, E_pad), lambda i: (0, 0)),
            pl.BlockSpec((L, DW, G_pad), lambda i: (0, 0, 0)),
            pl.BlockSpec((L, HP, G_pad), lambda i: (0, 0, 0)),
            pl.BlockSpec((L, 1, G_pad), lambda i: (0, 0, 0)),
            pl.BlockSpec((HP, V_pad), lambda i: (0, 0)),
            pl.BlockSpec((1, V_pad), lambda i: (0, 0)),
        ],
        out_specs=pl.BlockSpec((N, V_pad), lambda i: (0, 0)),
        scratch_shapes=[
            pltpu.VMEM((N, HP), jnp.float32),      # x_scr (inter-layer activations)
            pltpu.VMEM((N, G_pad), jnp.float32),   # gx_scr (hoisted input projection)
            pltpu.VMEM((B_pad, HP), jnp.float32),  # h
            pltpu.VMEM((B_pad, HP), jnp.float32),  # c
        ],
        compiler_params=pltpu.CompilerParams(
            dimension_semantics=("arbitrary",),
            vmem_limit_bytes=32 * 1024 * 1024,
        ),
    )(x_flat, w_ih, w_hh, b, w_out, b_out)


# ---------------------------------------------------------------------------
# Parameters (raw PyTorch layout for the reference + packed bf16 kernel layout)
# ---------------------------------------------------------------------------
def init_params(key, embedding_size, hidden_size, vocab_size, num_layers):
    keys = jax.random.split(key, 3 + 4 * num_layers)
    scale = 1.0 / np.sqrt(hidden_size)
    params = {
        "embedding": jax.random.normal(keys[0], (vocab_size, embedding_size), jnp.float32),
        "lstm": [],
    }
    for l in range(num_layers):
        din = embedding_size if l == 0 else hidden_size
        k1, k2, k3, k4 = keys[3 + 4 * l: 3 + 4 * (l + 1)]
        params["lstm"].append({
            "w_ih": jax.random.uniform(k1, (4 * hidden_size, din), jnp.float32, -scale, scale),
            "w_hh": jax.random.uniform(k2, (4 * hidden_size, hidden_size), jnp.float32, -scale, scale),
            "b_ih": jax.random.uniform(k3, (4 * hidden_size,), jnp.float32, -scale, scale),
            "b_hh": jax.random.uniform(k4, (4 * hidden_size,), jnp.float32, -scale, scale),
        })
    params["linear_w"] = jax.random.uniform(keys[1], (vocab_size, hidden_size), jnp.float32, -scale, scale)
    params["linear_b"] = jax.random.uniform(keys[2], (vocab_size,), jnp.float32, -scale, scale)
    return params


def prepare_kernel_params(params, embedding_size, hidden_size, vocab_size):
    E, H, V = embedding_size, hidden_size, vocab_size
    HP = round_up(H, 128)            # lane-padded hidden width (h/c, w_hh rows, w_out rows)
    E_pad = round_up(E, 128)         # lane-padded layer-0 input width
    G_pad = round_up(4 * H, 128)     # packed gate slab width (i,f,g,o at stride H)
    DW = max(E_pad, HP)              # shared row dim for the stacked w_ih
    V_pad = round_up(V, 128)
    L = len(params["lstm"])

    w_ih = np.zeros((L, DW, G_pad), np.float32)
    w_hh = np.zeros((L, HP, G_pad), np.float32)
    b = np.zeros((L, 1, G_pad), np.float32)
    for l, layer in enumerate(params["lstm"]):
        w_ih_t = np.asarray(layer["w_ih"]).T            # (Din, 4H), gate order i,f,g,o
        w_hh_t = np.asarray(layer["w_hh"]).T            # (H, 4H)
        bias = np.asarray(layer["b_ih"]) + np.asarray(layer["b_hh"])
        din = w_ih_t.shape[0]
        w_ih[l, :din, :4 * H] = w_ih_t                  # gates packed tightly
        w_hh[l, :H, :4 * H] = w_hh_t
        b[l, 0, :4 * H] = bias

    w_out = np.zeros((HP, V_pad), np.float32)
    w_out[:H, :V] = np.asarray(params["linear_w"]).T
    b_out = np.zeros((1, V_pad), np.float32)
    b_out[0, :V] = np.asarray(params["linear_b"])

    return {
        "w_ih": jnp.asarray(w_ih, jnp.bfloat16),
        "w_hh": jnp.asarray(w_hh, jnp.bfloat16),
        "b": jnp.asarray(b, jnp.float32),
        "w_out": jnp.asarray(w_out, jnp.bfloat16),
        "b_out": jnp.asarray(b_out, jnp.float32),
        "dims": {"E": E, "H": H, "V": V, "HP": HP, "E_pad": E_pad,
                 "G_pad": G_pad, "V_pad": V_pad},
    }


# ---------------------------------------------------------------------------
# Packed-sequence bookkeeping (PyTorch pack_padded_sequence, batch_first=True)
# ---------------------------------------------------------------------------
def packed_indices(lengths, max_len, batch):
    b_idx, t_idx = [], []
    for t in range(max_len):
        for bb in range(batch):
            if lengths[bb] > t:
                b_idx.append(bb)
                t_idx.append(t)
    return np.array(b_idx, np.int32), np.array(t_idx, np.int32)


# ---------------------------------------------------------------------------
# Forward (matches LSTMModel.forward semantics)
# ---------------------------------------------------------------------------
def lstm_model_forward(params, kparams, input_features, captions, lengths):
    lengths = np.asarray(lengths)
    assert np.all(lengths[:-1] >= lengths[1:]), "pack_padded_sequence requires descending lengths"

    # Embedding lookup + feature prepend (plain-JAX glue).
    embeddings = params["embedding"][captions]                           # (B, Tcap, E)
    seq = jnp.concatenate([input_features[:, None, :], embeddings], 1)   # (B, T, E)
    B, T, E = seq.shape
    assert int(lengths.max()) <= T

    d = kparams["dims"]
    B_pad = round_up(B, 8)

    # TODO(synk): the reference forward calls self.linear_layer(lstm_input) on a PackedSequence
    # (a typo that errors in PyTorch); we implement the intended self.lstm_layer(...) path.
    x_tm = jnp.transpose(seq, (1, 0, 2))                                 # (T, B, E) time-major
    x_tm = jnp.pad(x_tm, ((0, 0), (0, B_pad - B), (0, d["E_pad"] - E)))  # sublane/lane pad
    x_flat = x_tm.reshape(T * B_pad, d["E_pad"])

    logits = run_fused_decoder(x_flat, kparams["w_ih"], kparams["w_hh"], kparams["b"],
                               kparams["w_out"], kparams["b_out"], B_pad, d["H"])
    logits = logits.reshape(T, B_pad, d["V_pad"])

    # Packed-sequence gather done on the logits (projection ran on aligned full rows in-kernel).
    b_idx, t_idx = packed_indices(lengths, T, B)
    return logits[jnp.asarray(t_idx), jnp.asarray(b_idx), :d["V"]]       # (sum(lengths), V)


# ---------------------------------------------------------------------------
# Pure-JAX f32 reference (PyTorch semantics) for correctness checking.
# ---------------------------------------------------------------------------
def ref_forward(params, input_features, captions, lengths):
    emb = params["embedding"][captions]
    seq = jnp.concatenate([input_features[:, None, :], emb], axis=1)
    B, T, _ = seq.shape
    x = seq
    for layer in params["lstm"]:
        H = layer["w_hh"].shape[1]
        w_ih_t = layer["w_ih"].T
        w_hh_t = layer["w_hh"].T
        bias = (layer["b_ih"] + layer["b_hh"])[None, :]
        h = jnp.zeros((B, H), jnp.float32)
        c = jnp.zeros((B, H), jnp.float32)
        outs = []
        for t in range(T):
            gates = x[:, t, :] @ w_ih_t + h @ w_hh_t + bias
            i = jax.nn.sigmoid(gates[:, :H])
            f = jax.nn.sigmoid(gates[:, H:2 * H])
            g = jnp.tanh(gates[:, 2 * H:3 * H])
            o = jax.nn.sigmoid(gates[:, 3 * H:])
            c = f * c + i * g
            h = o * jnp.tanh(c)
            outs.append(h)
        x = jnp.stack(outs, axis=1)
    b_idx, t_idx = packed_indices(np.asarray(lengths), T, B)
    packed_h = x[jnp.asarray(b_idx), jnp.asarray(t_idx)]
    return packed_h @ params["linear_w"].T + params["linear_b"][None, :]


# TODO(synk): LSTMModel.sample (greedy decoding loop) is not implemented; only forward() is.

if __name__ == "__main__":
    embedding_size = 32
    hidden_layer_size = 32
    vocabulary_size = 64
    num_layers = 2
    batch = 4
    cap_len = 7                      # LSTM sees cap_len + 1 = 8 time steps

    key = jax.random.PRNGKey(0)
    k_params, k_feat, k_cap = jax.random.split(key, 3)

    params = init_params(k_params, embedding_size, hidden_layer_size,
                         vocabulary_size, num_layers)
    kparams = prepare_kernel_params(params, embedding_size, hidden_layer_size,
                                    vocabulary_size)

    input_features = jax.random.normal(k_feat, (batch, embedding_size), jnp.float32)
    captions = jax.random.randint(k_cap, (batch, cap_len), 0, vocabulary_size,
                                  dtype=jnp.int32)
    lengths = np.array([8, 7, 5, 3], np.int32)   # sorted descending (pack requirement)

    out = lstm_model_forward(params, kparams, input_features, captions, lengths)
    out = jax.block_until_ready(out)

    ref = jax.block_until_ready(ref_forward(params, input_features, captions, lengths))
    # Tolerance loosened vs. pure-f32 reference because the kernel uses bf16 MXU operands
    # (f32 accumulate); observed error is ~1e-2 at these scales.
    np.testing.assert_allclose(np.asarray(out), np.asarray(ref), rtol=2e-2, atol=2e-2)
    assert out.shape == (int(lengths.sum()), vocabulary_size)

    print("KERNEL_OK")
</pallas_src>

<mosaic_0001>
module attributes {stable_mosaic.version = 11 : i64} {
  func.func @fused_lstm_decoder_kernel(%arg0: i32, %arg1: memref<64x128xf32, #tpu.memory_space<vmem>>, %arg2: memref<2x128x128xbf16, #tpu.memory_space<vmem>>, %arg3: memref<2x128x128xbf16, #tpu.memory_space<vmem>>, %arg4: memref<2x1x128xf32, #tpu.memory_space<vmem>>, %arg5: memref<128x128xbf16, #tpu.memory_space<vmem>>, %arg6: memref<1x128xf32, #tpu.memory_space<vmem>>, %arg7: memref<64x128xf32, #tpu.memory_space<vmem>>, %arg8: memref<64x128xf32, #tpu.memory_space<vmem>>, %arg9: memref<64x128xf32, #tpu.memory_space<vmem>>, %arg10: memref<8x128xf32, #tpu.memory_space<vmem>>, %arg11: memref<8x128xf32, #tpu.memory_space<vmem>>) attributes {dimension_semantics = [#tpu.dimension_semantics<arbitrary>], iteration_bounds = array<i64: 1>, scalar_prefetch = 0 : i64, scratch_operands = 4 : i64, tpu.core_type = #tpu.core_type<tc>, window_params = [{pipeline_mode = #tpu.pipeline_mode<synchronous>, transform_indices = @transform_0, window_bounds = array<i64: 64, 128>}, {pipeline_mode = #tpu.pipeline_mode<synchronous>, transform_indices = @transform_1, window_bounds = array<i64: 2, 128, 128>}, {pipeline_mode = #tpu.pipeline_mode<synchronous>, transform_indices = @transform_2, window_bounds = array<i64: 2, 128, 128>}, {pipeline_mode = #tpu.pipeline_mode<synchronous>, transform_indices = @transform_3, window_bounds = array<i64: 2, 1, 128>}, {pipeline_mode = #tpu.pipeline_mode<synchronous>, transform_indices = @transform_4, window_bounds = array<i64: 128, 128>}, {pipeline_mode = #tpu.pipeline_mode<synchronous>, transform_indices = @transform_5, window_bounds = array<i64: 1, 128>}, {pipeline_mode = #tpu.pipeline_mode<synchronous>, transform_indices = @transform_6, window_bounds = array<i64: 64, 128>}]} {
    %0 = tpu.iota {dimensions = array<i32: 1>} : vector<8x128xi32>
    %c64_i32 = arith.constant 64 : i32
    %1 = vector.broadcast %c64_i32 : i32 to vector<8x128xi32>
    %2 = arith.cmpi sge, %0, %1 : vector<8x128xi32>
    %c96_i32 = arith.constant 96 : i32
    %3 = vector.broadcast %c96_i32 : i32 to vector<8x128xi32>
    %4 = arith.cmpi slt, %0, %3 : vector<8x128xi32>
    %5 = arith.andi %2, %4 : vector<8x128xi1>
    %cst = arith.constant 1.000000e+00 : f32
    %cst_0 = arith.constant 5.000000e-01 : f32
    %6 = vector.broadcast %cst : f32 to vector<8x128xf32>
    %7 = vector.broadcast %cst_0 : f32 to vector<8x128xf32>
    %8 = arith.select %5, %6, %7 : vector<8x128xi1>, vector<8x128xf32>
    %cst_1 = arith.constant 0.000000e+00 : f32
    %cst_2 = arith.constant 5.000000e-01 : f32
    %9 = vector.broadcast %cst_1 : f32 to vector<8x128xf32>
    %10 = vector.broadcast %cst_2 : f32 to vector<8x128xf32>
    %11 = arith.select %5, %9, %10 : vector<8x128xi1>, vector<8x128xf32>
    %12 = tpu.iota {dimensions = array<i32: 1>} : vector<8x128xi32>
    %c32_i32 = arith.constant 32 : i32
    %13 = vector.broadcast %c32_i32 : i32 to vector<8x128xi32>
    %14 = arith.cmpi slt, %12, %13 : vector<8x128xi32>
    %15 = arith.extui %14 : vector<8x128xi1> to vector<8x128xi32>
    %16 = arith.sitofp %15 : vector<8x128xi32> to vector<8x128xf32>
    %c0 = arith.constant 0 : index
    %c0_3 = arith.constant 0 : index
    %17 = vector.load %arg1[%c0, %c0_3] : memref<64x128xf32, #tpu.memory_space<vmem>>, vector<64x128xf32>
    %c0_4 = arith.constant 0 : index
    %c0_5 = arith.constant 0 : index
    %c0_6 = arith.constant 0 : index
    %18 = vector.load %arg2[%c0_4, %c0_5, %c0_6] : memref<2x128x128xbf16, #tpu.memory_space<vmem>>, vector<1x128x128xbf16>
    %19 = vector.shape_cast %18 : vector<1x128x128xbf16> to vector<128x128xbf16>
    %20 = arith.truncf %17 : vector<64x128xf32> to vector<64x128xbf16>
    %cst_7 = arith.constant dense<0.000000e+00> : vector<64x128xf32>
    %21 = tpu.matmul %20, %19, %cst_7 {dimension_numbers = #tpu.dot_dimension_numbers<[1], [0], [0], [1], [0, 0, 1, 1], [], []>} : vector<64x128xbf16>, vector<128x128xbf16>, vector<64x128xf32> -> vector<64x128xf32>
    %c0_8 = arith.constant 0 : index
    %c0_9 = arith.constant 0 : index
    %c0_10 = arith.constant 0 : index
    %22 = vector.load %arg4[%c0_8, %c0_9, %c0_10] : memref<2x1x128xf32, #tpu.memory_space<vmem>>, vector<1x1x128xf32>
    %23 = vector.shape_cast %22 : vector<1x1x128xf32> to vector<1x128xf32>
    %24 = vector.broadcast %23 : vector<1x128xf32> to vector<64x128xf32>
    %25 = arith.addf %21, %24 : vector<64x128xf32>
    %c0_11 = arith.constant 0 : index
    %c0_12 = arith.constant 0 : index
    %26 = vector.load %arg9[%c0_11, %c0_12] : memref<64x128xf32, #tpu.memory_space<vmem>>, vector<64x128xf32>
    tpu.vector_store %arg9[%c0_11, %c0_12], %25 {strides = array<i32>} : memref<64x128xf32, #tpu.memory_space<vmem>>, vector<64x128xf32>,
    %cst_13 = arith.constant 0.000000e+00 : f32
    %27 = vector.broadcast %cst_13 : f32 to vector<8x128xf32>
    %c0_14 = arith.constant 0 : index
    %c0_15 = arith.constant 0 : index
    %28 = vector.load %arg10[%c0_14, %c0_15] : memref<8x128xf32, #tpu.memory_space<vmem>>, vector<8x128xf32>
    tpu.vector_store %arg10[%c0_14, %c0_15], %27 {strides = array<i32>} : memref<8x128xf32, #tpu.memory_space<vmem>>, vector<8x128xf32>,
    %cst_16 = arith.constant 0.000000e+00 : f32
    %29 = vector.broadcast %cst_16 : f32 to vector<8x128xf32>
    %c0_17 = arith.constant 0 : index
    %c0_18 = arith.constant 0 : index
    %30 = vector.load %arg11[%c0_17, %c0_18] : memref<8x128xf32, #tpu.memory_space<vmem>>, vector<8x128xf32>
    tpu.vector_store %arg11[%c0_17, %c0_18], %29 {strides = array<i32>} : memref<8x128xf32, #tpu.memory_space<vmem>>, vector<8x128xf32>,
    %c0_i32 = arith.constant 0 : i32
    %c8_i32 = arith.constant 8 : i32
    %31 = arith.muli %c0_i32, %c8_i32 : i32
    %32 = tpu.assume_multiple %31, 8 : i32
    %33 = arith.index_cast %32 : i32 to index
    %c0_19 = arith.constant 0 : index
    %34 = vector.load %arg9[%33, %c0_19] : memref<64x128xf32, #tpu.memory_space<vmem>>, vector<8x128xf32>
    %c0_20 = arith.constant 0 : index
    %c0_21 = arith.constant 0 : index
    %35 = vector.load %arg10[%c0_20, %c0_21] : memref<8x128xf32, #tpu.memory_space<vmem>>, vector<8x128xf32>
    %36 = arith.truncf %35 : vector<8x128xf32> to vector<8x128xbf16>
    %c0_22 = arith.constant 0 : index
    %c0_23 = arith.constant 0 : index
    %c0_24 = arith.constant 0 : index
    %37 = vector.load %arg3[%c0_22, %c0_23, %c0_24] : memref<2x128x128xbf16, #tpu.memory_space<vmem>>, vector<1x128x128xbf16>
    %38 = vector.shape_cast %37 : vector<1x128x128xbf16> to vector<128x128xbf16>
    %cst_25 = arith.constant dense<0.000000e+00> : vector<8x128xf32>
    %39 = tpu.matmul %36, %38, %cst_25 {dimension_numbers = #tpu.dot_dimension_numbers<[1], [0], [0], [1], [0, 0, 1, 1], [], []>} : vector<8x128xbf16>, vector<128x128xbf16>, vector<8x128xf32> -> vector<8x128xf32>
    %40 = arith.addf %34, %39 : vector<8x128xf32>
    %41 = arith.mulf %40, %8 : vector<8x128xf32>
    %42 = math.tanh %41 : vector<8x128xf32>
    %43 = arith.mulf %42, %8 : vector<8x128xf32>
    %44 = arith.addf %43, %11 : vector<8x128xf32>
    %c96_i32_26 = arith.constant 96 : i32
    %45 = tpu.dynamic_rotate %44 by %c96_i32_26 dim 1 : vector<8x128xf32>, i32 -> vector<8x128xf32>
    %c64_i32_27 = arith.constant 64 : i32
    %46 = tpu.dynamic_rotate %44 by %c64_i32_27 dim 1 : vector<8x128xf32>, i32 -> vector<8x128xf32>
    %c32_i32_28 = arith.constant 32 : i32
    %47 = tpu.dynamic_rotate %44 by %c32_i32_28 dim 1 : vector<8x128xf32>, i32 -> vector<8x128xf32>
    %c0_29 = arith.constant 0 : index
    %c0_30 = arith.constant 0 : index
    %48 = vector.load %arg11[%c0_29, %c0_30] : memref<8x128xf32, #tpu.memory_space<vmem>>, vector<8x128xf32>
    %49 = arith.mulf %45, %48 : vector<8x128xf32>
    %50 = arith.mulf %44, %46 : vector<8x128xf32>
    %51 = arith.addf %49, %50 : vector<8x128xf32>
    %52 = arith.mulf %51, %16 : vector<8x128xf32>
    %53 = math.tanh %52 : vector<8x128xf32>
    %54 = arith.mulf %47, %53 : vector<8x128xf32>
    %c0_31 = arith.constant 0 : index
    %c0_32 = arith.constant 0 : index
    %55 = vector.load %arg11[%c0_31, %c0_32] : memref<8x128xf32, #tpu.memory_space<vmem>>, vector<8x128xf32>
    tpu.vector_store %arg11[%c0_31, %c0_32], %52 {strides = array<i32>} : memref<8x128xf32, #tpu.memory_space<vmem>>, vector<8x128xf32>,
    %c0_33 = arith.constant 0 : index
    %c0_34 = arith.constant 0 : index
    %56 = vector.load %arg10[%c0_33, %c0_34] : memref<8x128xf32, #tpu.memory_space<vmem>>, vector<8x128xf32>
    tpu.vector_store %arg10[%c0_33, %c0_34], %54 {strides = array<i32>} : memref<8x128xf32, #tpu.memory_space<vmem>>, vector<8x128xf32>,
    %57 = arith.index_cast %32 : i32 to index
    %c0_35 = arith.constant 0 : index
    %58 = vector.load %arg8[%57, %c0_35] : memref<64x128xf32, #tpu.memory_space<vmem>>, vector<8x128xf32>
    tpu.vector_store %arg8[%57, %c0_35], %54 {strides = array<i32>} : memref<64x128xf32, #tpu.memory_space<vmem>>, vector<8x128xf32>,
    %c1_i32 = arith.constant 1 : i32
    %c8_i32_36 = arith.constant 8 : i32
    %59 = arith.muli %c1_i32, %c8_i32_36 : i32
    %60 = tpu.assume_multiple %59, 8 : i32
    %61 = arith.index_cast %60 : i32 to index
    %c0_37 = arith.constant 0 : index
    %62 = vector.load %arg9[%61, %c0_37] : memref<64x128xf32, #tpu.memory_space<vmem>>, vector<8x128xf32>
    %c0_38 = arith.constant 0 : index
    %c0_39 = arith.constant 0 : index
    %63 = vector.load %arg10[%c0_38, %c0_39] : memref<8x128xf32, #tpu.memory_space<vmem>>, vector<8x128xf32>
    %64 = arith.truncf %63 : vector<8x128xf32> to vector<8x128xbf16>
    %c0_40 = arith.constant 0 : index
    %c0_41 = arith.constant 0 : index
    %c0_42 = arith.constant 0 : index
    %65 = vector.load %arg3[%c0_40, %c0_41, %c0_42] : memref<2x128x128xbf16, #tpu.memory_space<vmem>>, vector<1x128x128xbf16>
    %66 = vector.shape_cast %65 : vector<1x128x128xbf16> to vector<128x128xbf16>
    %cst_43 = arith.constant dense<0.000000e+00> : vector<8x128xf32>
    %67 = tpu.matmul %64, %66, %cst_43 {dimension_numbers = #tpu.dot_dimension_numbers<[1], [0], [0], [1], [0, 0, 1, 1], [], []>} : vector<8x128xbf16>, vector<128x128xbf16>, vector<8x128xf32> -> vector<8x128xf32>
    %68 = arith.addf %62, %67 : vector<8x128xf32>
    %69 = arith.mulf %68, %8 : vector<8x128xf32>
    %70 = math.tanh %69 : vector<8x128xf32>
    %71 = arith.mulf %70, %8 : vector<8x128xf32>
    %72 = arith.addf %71, %11 : vector<8x128xf32>
    %c96_i32_44 = arith.constant 96 : i32
    %73 = tpu.dynamic_rotate %72 by %c96_i32_44 dim 1 : vector<8x128xf32>, i32 -> vector<8x128xf32>
    %c64_i32_45 = arith.constant 64 : i32
    %74 = tpu.dynamic_rotate %72 by %c64_i32_45 dim 1 : vector<8x128xf32>, i32 -> vector<8x128xf32>
    %c32_i32_46 = arith.constant 32 : i32
    %75 = tpu.dynamic_rotate %72 by %c32_i32_46 dim 1 : vector<8x128xf32>, i32 -> vector<8x128xf32>
    %c0_47 = arith.constant 0 : index
    %c0_48 = arith.constant 0 : index
    %76 = vector.load %arg11[%c0_47, %c0_48] : memref<8x128xf32, #tpu.memory_space<vmem>>, vector<8x128xf32>
    %77 = arith.mulf %73, %76 : vector<8x128xf32>
    %78 = arith.mulf %72, %74 : vector<8x128xf32>
    %79 = arith.addf %77, %78 : vector<8x128xf32>
    %80 = arith.mulf %79, %16 : vector<8x128xf32>
    %81 = math.tanh %80 : vector<8x128xf32>
    %82 = arith.mulf %75, %81 : vector<8x128xf32>
    %c0_49 = arith.constant 0 : index
    %c0_50 = arith.constant 0 : index
    %83 = vector.load %arg11[%c0_49, %c0_50] : memref<8x128xf32, #tpu.memory_space<vmem>>, vector<8x128xf32>
    tpu.vector_store %arg11[%c0_49, %c0_50], %80 {strides = array<i32>} : memref<8x128xf32, #tpu.memory_space<vmem>>, vector<8x128xf32>,
    %c0_51 = arith.constant 0 : index
    %c0_52 = arith.constant 0 : index
    %84 = vector.load %arg10[%c0_51, %c0_52] : memref<8x128xf32, #tpu.memory_space<vmem>>, vector<8x128xf32>
    tpu.vector_store %arg10[%c0_51, %c0_52], %82 {strides = array<i32>} : memref<8x128xf32, #tpu.memory_space<vmem>>, vector<8x128xf32>,
    %85 = arith.index_cast %60 : i32 to index
    %c0_53 = arith.constant 0 : index
    %86 = vector.load %arg8[%85, %c0_53] : memref<64x128xf32, #tpu.memory_space<vmem>>, vector<8x128xf32>
    tpu.vector_store %arg8[%85, %c0_53], %82 {strides = array<i32>} : memref<64x128xf32, #tpu.memory_space<vmem>>, vector<8x128xf32>,
    %c2_i32 = arith.constant 2 : i32
    %c8_i32_54 = arith.constant 8 : i32
    %87 = arith.muli %c2_i32, %c8_i32_54 : i32
    %88 = tpu.assume_multiple %87, 8 : i32
    %89 = arith.index_cast %88 : i32 to index
    %c0_55 = arith.constant 0 : index
    %90 = vector.load %arg9[%89, %c0_55] : memref<64x128xf32, #tpu.memory_space<vmem>>, vector<8x128xf32>
    %c0_56 = arith.constant 0 : index
    %c0_57 = arith.constant 0 : index
    %91 = vector.load %arg10[%c0_56, %c0_57] : memref<8x128xf32, #tpu.memory_space<vmem>>, vector<8x128xf32>
    %92 = arith.truncf %91 : vector<8x128xf32> to vector<8x128xbf16>
    %c0_58 = arith.constant 0 : index
    %c0_59 = arith.constant 0 : index
    %c0_60 = arith.constant 0 : index
    %93 = vector.load %arg3[%c0_58, %c0_59, %c0_60] : memref<2x128x128xbf16, #tpu.memory_space<vmem>>, vector<1x128x128xbf16>
    %94 = vector.shape_cast %93 : vector<1x128x128xbf16> to vector<128x128xbf16>
    %cst_61 = arith.constant dense<0.000000e+00> : vector<8x128xf32>
    %95 = tpu.matmul %92, %94, %cst_61 {dimension_numbers = #tpu.dot_dimension_numbers<[1], [0], [0], [1], [0, 0, 1, 1], [], []>} : vector<8x128xbf16>, vector<128x128xbf16>, vector<8x128xf32> -> vector<8x128xf32>
    %96 = arith.addf %90, %95 : vector<8x128xf32>
    %97 = arith.mulf %96, %8 : vector<8x128xf32>
    %98 = math.tanh %97 : vector<8x128xf32>
    %99 = arith.mulf %98, %8 : vector<8x128xf32>
    %100 = arith.addf %99, %11 : vector<8x128xf32>
    %c96_i32_62 = arith.constant 96 : i32
    %101 = tpu.dynamic_rotate %100 by %c96_i32_62 dim 1 : vector<8x128xf32>, i32 -> vector<8x128xf32>
    %c64_i32_63 = arith.constant 64 : i32
    %102 = tpu.dynamic_rotate %100 by %c64_i32_63 dim 1 : vector<8x128xf32>, i32 -> vector<8x128xf32>
    %c32_i32_64 = arith.constant 32 : i32
    %103 = tpu.dynamic_rotate %100 by %c32_i32_64 dim 1 : vector<8x128xf32>, i32 -> vector<8x128xf32>
    %c0_65 = arith.constant 0 : index
    %c0_66 = arith.constant 0 : index
    %104 = vector.load %arg11[%c0_65, %c0_66] : memref<8x128xf32, #tpu.memory_space<vmem>>, vector<8x128xf32>
    %105 = arith.mulf %101, %104 : vector<8x128xf32>
    %106 = arith.mulf %100, %102 : vector<8x128xf32>
    %107 = arith.addf %105, %106 : vector<8x128xf32>
    %108 = arith.mulf %107, %16 : vector<8x128xf32>
    %109 = math.tanh %108 : vector<8x128xf32>
    %110 = arith.mulf %103, %109 : vector<8x128xf32>
    %c0_67 = arith.constant 0 : index
    %c0_68 = arith.constant 0 : index
    %111 = vector.load %arg11[%c0_67, %c0_68] : memref<8x128xf32, #tpu.memory_space<vmem>>, vector<8x128xf32>
    tpu.vector_store %arg11[%c0_67, %c0_68], %108 {strides = array<i32>} : memref<8x128xf32, #tpu.memory_space<vmem>>, vector<8x128xf32>,
    %c0_69 = arith.constant 0 : index
    %c0_70 = arith.constant 0 : index
    %112 = vector.load %arg10[%c0_69, %c0_70] : memref<8x128xf32, #tpu.memory_space<vmem>>, vector<8x128xf32>
    tpu.vector_store %arg10[%c0_69, %c0_70], %110 {strides = array<i32>} : memref<8x128xf32, #tpu.memory_space<vmem>>, vector<8x128xf32>,
    %113 = arith.index_cast %88 : i32 to index
    %c0_71 = arith.constant 0 : index
    %114 = vector.load %arg8[%113, %c0_71] : memref<64x128xf32, #tpu.memory_space<vmem>>, vector<8x128xf32>
    tpu.vector_store %arg8[%113, %c0_71], %110 {strides = array<i32>} : memref<64x128xf32, #tpu.memory_space<vmem>>, vector<8x128xf32>,
    %c3_i32 = arith.constant 3 : i32
    %c8_i32_72 = arith.constant 8 : i32
    %115 = arith.muli %c3_i32, %c8_i32_72 : i32
    %116 = tpu.assume_multiple %115, 8 : i32
    %117 = arith.index_cast %116 : i32 to index
    %c0_73 = arith.constant 0 : index
    %118 = vector.load %arg9[%117, %c0_73] : memref<64x128xf32, #tpu.memory_space<vmem>>, vector<8x128xf32>
    %c0_74 = arith.constant 0 : index
    %c0_75 = arith.constant 0 : index
    %119 = vector.load %arg10[%c0_74, %c0_75] : memref<8x128xf32, #tpu.memory_space<vmem>>, vector<8x128xf32>
    %120 = arith.truncf %119 : vector<8x128xf32> to vector<8x128xbf16>
    %c0_76 = arith.constant 0 : index
    %c0_77 = arith.constant 0 : index
    %c0_78 = arith.constant 0 : index
    %121 = vector.load %arg3[%c0_76, %c0_77, %c0_78] : memref<2x128x128xbf16, #tpu.memory_space<vmem>>, vector<1x128x128xbf16>
    %122 = vector.shape_cast %121 : vector<1x128x128xbf16> to vector<128x128xbf16>
    %cst_79 = arith.constant dense<0.000000e+00> : vector<8x128xf32>
    %123 = tpu.matmul %120, %122, %cst_79 {dimension_numbers = #tpu.dot_dimension_numbers<[1], [0], [0], [1], [0, 0, 1, 1], [], []>} : vector<8x128xbf16>, vector<128x128xbf16>, vector<8x128xf32> -> vector<8x128xf32>
    %124 = arith.addf %118, %123 : vector<8x128xf32>
    %125 = arith.mulf %124, %8 : vector<8x128xf32>
    %126 = math.tanh %125 : vector<8x128xf32>
    %127 = arith.mulf %126, %8 : vector<8x128xf32>
    %128 = arith.addf %127, %11 : vector<8x128xf32>
    %c96_i32_80 = arith.constant 96 : i32
    %129 = tpu.dynamic_rotate %128 by %c96_i32_80 dim 1 : vector<8x128xf32>, i32 -> vector<8x128xf32>
    %c64_i32_81 = arith.constant 64 : i32
    %130 = tpu.dynamic_rotate %128 by %c64_i32_81 dim 1 : vector<8x128xf32>, i32 -> vector<8x128xf32>
    %c32_i32_82 = arith.constant 32 : i32
    %131 = tpu.dynamic_rotate %128 by %c32_i32_82 dim 1 : vector<8x128xf32>, i32 -> vector<8x128xf32>
    %c0_83 = arith.constant 0 : index
    %c0_84 = arith.constant 0 : index
    %132 = vector.load %arg11[%c0_83, %c0_84] : memref<8x128xf32, #tpu.memory_space<vmem>>, vector<8x128xf32>
    %133 = arith.mulf %129, %132 : vector<8x128xf32>
    %134 = arith.mulf %128, %130 : vector<8x128xf32>
    %135 = arith.addf %133, %134 : vector<8x128xf32>
    %136 = arith.mulf %135, %16 : vector<8x128xf32>
    %137 = math.tanh %136 : vector<8x128xf32>
    %138 = arith.mulf %131, %137 : vector<8x128xf32>
    %c0_85 = arith.constant 0 : index
    %c0_86 = arith.constant 0 : index
    %139 = vector.load %arg11[%c0_85, %c0_86] : memref<8x128xf32, #tpu.memory_space<vmem>>, vector<8x128xf32>
    tpu.vector_store %arg11[%c0_85, %c0_86], %136 {strides = array<i32>} : memref<8x128xf32, #tpu.memory_space<vmem>>, vector<8x128xf32>,
    %c0_87 = arith.constant 0 : index
    %c0_88 = arith.constant 0 : index
    %140 = vector.load %arg10[%c0_87, %c0_88] : memref<8x128xf32, #tpu.memory_space<vmem>>, vector<8x128xf32>
    tpu.vector_store %arg10[%c0_87, %c0_88], %138 {strides = array<i32>} : memref<8x128xf32, #tpu.memory_space<vmem>>, vector<8x128xf32>,
    %141 = arith.index_cast %116 : i32 to index
    %c0_89 = arith.constant 0 : index
    %142 = vector.load %arg8[%141, %c0_89] : memref<64x128xf32, #tpu.memory_space<vmem>>, vector<8x128xf32>
    tpu.vector_store %arg8[%141, %c0_89], %138 {strides = array<i32>} : memref<64x128xf32, #tpu.memory_space<vmem>>, vector<8x128xf32>,
    %c4_i32 = arith.constant 4 : i32
    %c8_i32_90 = arith.constant 8 : i32
    %143 = arith.muli %c4_i32, %c8_i32_90 : i32
    %144 = tpu.assume_multiple %143, 8 : i32
    %145 = arith.index_cast %144 : i32 to index
    %c0_91 = arith.constant 0 : index
    %146 = vector.load %arg9[%145, %c0_91] : memref<64x128xf32, #tpu.memory_space<vmem>>, vector<8x128xf32>
    %c0_92 = arith.constant 0 : index
    %c0_93 = arith.constant 0 : index
    %147 = vector.load %arg10[%c0_92, %c0_93] : memref<8x128xf32, #tpu.memory_space<vmem>>, vector<8x128xf32>
    %148 = arith.truncf %147 : vector<8x128xf32> to vector<8x128xbf16>
    %c0_94 = arith.constant 0 : index
    %c0_95 = arith.constant 0 : index
    %c0_96 = arith.constant 0 : index
    %149 = vector.load %arg3[%c0_94, %c0_95, %c0_96] : memref<2x128x128xbf16, #tpu.memory_space<vmem>>, vector<1x128x128xbf16>
    %150 = vector.shape_cast %149 : vector<1x128x128xbf16> to vector<128x128xbf16>
    %cst_97 = arith.constant dense<0.000000e+00> : vector<8x128xf32>
    %151 = tpu.matmul %148, %150, %cst_97 {dimension_numbers = #tpu.dot_dimension_numbers<[1], [0], [0], [1], [0, 0, 1, 1], [], []>} : vector<8x128xbf16>, vector<128x128xbf16>, vector<8x128xf32> -> vector<8x128xf32>
    %152 = arith.addf %146, %151 : vector<8x128xf32>
    %153 = arith.mulf %152, %8 : vector<8x128xf32>
    %154 = math.tanh %153 : vector<8x128xf32>
    %155 = arith.mulf %154, %8 : vector<8x128xf32>
    %156 = arith.addf %155, %11 : vector<8x128xf32>
    %c96_i32_98 = arith.constant 96 : i32
    %157 = tpu.dynamic_rotate %156 by %c96_i32_98 dim 1 : vector<8x128xf32>, i32 -> vector<8x128xf32>
    %c64_i32_99 = arith.constant 64 : i32
    %158 = tpu.dynamic_rotate %156 by %c64_i32_99 dim 1 : vector<8x128xf32>, i32 -> vector<8x128xf32>
    %c32_i32_100 = arith.constant 32 : i32
    %159 = tpu.dynamic_rotate %156 by %c32_i32_100 dim 1 : vector<8x128xf32>, i32 -> vector<8x128xf32>
    %c0_101 = arith.constant 0 : index
    %c0_102 = arith.constant 0 : index
    %160 = vector.load %arg11[%c0_101, %c0_102] : memref<8x128xf32, #tpu.memory_space<vmem>>, vector<8x128xf32>
    %161 = arith.mulf %157, %160 : vector<8x128xf32>
    %162 = arith.mulf %156, %158 : vector<8x128xf32>
    %163 = arith.addf %161, %162 : vector<8x128xf32>
    %164 = arith.mulf %163, %16 : vector<8x128xf32>
    %165 = math.tanh %164 : vector<8x128xf32>
    %166 = arith.mulf %159, %165 : vector<8x128xf32>
    %c0_103 = arith.constant 0 : index
    %c0_104 = arith.constant 0 : index
    %167 = vector.load %arg11[%c0_103, %c0_104] : memref<8x128xf32, #tpu.memory_space<vmem>>, vector<8x128xf32>
    tpu.vector_store %arg11[%c0_103, %c0_104], %164 {strides = array<i32>} : memref<8x128xf32, #tpu.memory_space<vmem>>, vector<8x128xf32>,
    %c0_105 = arith.constant 0 : index
    %c0_106 = arith.constant 0 : index
    %168 = vector.load %arg10[%c0_105, %c0_106] : memref<8x128xf32, #tpu.memory_space<vmem>>, vector<8x128xf32>
    tpu.vector_store %arg10[%c0_105, %c0_106], %166 {strides = array<i32>} : memref<8x128xf32, #tpu.memory_space<vmem>>, vector<8x128xf32>,
    %169 = arith.index_cast %144 : i32 to index
    %c0_107 = arith.constant 0 : index
    %170 = vector.load %arg8[%169, %c0_107] : memref<64x128xf32, #tpu.memory_space<vmem>>, vector<8x128xf32>
    tpu.vector_store %arg8[%169, %c0_107], %166 {strides = array<i32>} : memref<64x128xf32, #tpu.memory_space<vmem>>, vector<8x128xf32>,
    %c5_i32 = arith.constant 5 : i32
    %c8_i32_108 = arith.constant 8 : i32
    %171 = arith.muli %c5_i32, %c8_i32_108 : i32
    %172 = tpu.assume_multiple %171, 8 : i32
    %173 = arith.index_cast %172 : i32 to index
    %c0_109 = arith.constant 0 : index
    %174 = vector.load %arg9[%173, %c0_109] : memref<64x128xf32, #tpu.memory_space<vmem>>, vector<8x128xf32>
    %c0_110 = arith.constant 0 : index
    %c0_111 = arith.constant 0 : index
    %175 = vector.load %arg10[%c0_110, %c0_111] : memref<8x128xf32, #tpu.memory_space<vmem>>, vector<8x128xf32>
    %176 = arith.truncf %175 : vector<8x128xf32> to vector<8x128xbf16>
    %c0_112 = arith.constant 0 : index
    %c0_113 = arith.constant 0 : index
    %c0_114 = arith.constant 0 : index
    %177 = vector.load %arg3[%c0_112, %c0_113, %c0_114] : memref<2x128x128xbf16, #tpu.memory_space<vmem>>, vector<1x128x128xbf16>
    %178 = vector.shape_cast %177 : vector<1x128x128xbf16> to vector<128x128xbf16>
    %cst_115 = arith.constant dense<0.000000e+00> : vector<8x128xf32>
    %179 = tpu.matmul %176, %178, %cst_115 {dimension_numbers = #tpu.dot_dimension_numbers<[1], [0], [0], [1], [0, 0, 1, 1], [], []>} : vector<8x128xbf16>, vector<128x128xbf16>, vector<8x128xf32> -> vector<8x128xf32>
    %180 = arith.addf %174, %179 : vector<8x128xf32>
    %181 = arith.mulf %180, %8 : vector<8x128xf32>
    %182 = math.tanh %181 : vector<8x128xf32>
    %183 = arith.mulf %182, %8 : vector<8x128xf32>
    %184 = arith.addf %183, %11 : vector<8x128xf32>
    %c96_i32_116 = arith.constant 96 : i32
    %185 = tpu.dynamic_rotate %184 by %c96_i32_116 dim 1 : vector<8x128xf32>, i32 -> vector<8x128xf32>
    %c64_i32_117 = arith.constant 64 : i32
    %186 = tpu.dynamic_rotate %184 by %c64_i32_117 dim 1 : vector<8x128xf32>, i32 -> vector<8x128xf32>
    %c32_i32_118 = arith.constant 32 : i32
    %187 = tpu.dynamic_rotate %184 by %c32_i32_118 dim 1 : vector<8x128xf32>, i32 -> vector<8x128xf32>
    %c0_119 = arith.constant 0 : index
    %c0_120 = arith.constant 0 : index
    %188 = vector.load %arg11[%c0_119, %c0_120] : memref<8x128xf32, #tpu.memory_space<vmem>>, vector<8x128xf32>
    %189 = arith.mulf %185, %188 : vector<8x128xf32>
    %190 = arith.mulf %184, %186 : vector<8x128xf32>
    %191 = arith.addf %189, %190 : vector<8x128xf32>
    %192 = arith.mulf %191, %16 : vector<8x128xf32>
    %193 = math.tanh %192 : vector<8x128xf32>
    %194 = arith.mulf %187, %193 : vector<8x128xf32>
    %c0_121 = arith.constant 0 : index
    %c0_122 = arith.constant 0 : index
    %195 = vector.load %arg11[%c0_121, %c0_122] : memref<8x128xf32, #tpu.memory_space<vmem>>, vector<8x128xf32>
    tpu.vector_store %arg11[%c0_121, %c0_122], %192 {strides = array<i32>} : memref<8x128xf32, #tpu.memory_space<vmem>>, vector<8x128xf32>,
    %c0_123 = arith.constant 0 : index
    %c0_124 = arith.constant 0 : index
    %196 = vector.load %arg10[%c0_123, %c0_124] : memref<8x128xf32, #tpu.memory_space<vmem>>, vector<8x128xf32>
    tpu.vector_store %arg10[%c0_123, %c0_124], %194 {strides = array<i32>} : memref<8x128xf32, #tpu.memory_space<vmem>>, vector<8x128xf32>,
    %197 = arith.index_cast %172 : i32 to index
    %c0_125 = arith.constant 0 : index
    %198 = vector.load %arg8[%197, %c0_125] : memref<64x128xf32, #tpu.memory_space<vmem>>, vector<8x128xf32>
    tpu.vector_store %arg8[%197, %c0_125], %194 {strides = array<i32>} : memref<64x128xf32, #tpu.memory_space<vmem>>, vector<8x128xf32>,
    %c6_i32 = arith.constant 6 : i32
    %c8_i32_126 = arith.constant 8 : i32
    %199 = arith.muli %c6_i32, %c8_i32_126 : i32
    %200 = tpu.assume_multiple %199, 8 : i32
    %201 = arith.index_cast %200 : i32 to index
    %c0_127 = arith.constant 0 : index
    %202 = vector.load %arg9[%201, %c0_127] : memref<64x128xf32, #tpu.memory_space<vmem>>, vector<8x128xf32>
    %c0_128 = arith.constant 0 : index
    %c0_129 = arith.constant 0 : index
    %203 = vector.load %arg10[%c0_128, %c0_129] : memref<8x128xf32, #tpu.memory_space<vmem>>, vector<8x128xf32>
    %204 = arith.truncf %203 : vector<8x128xf32> to vector<8x128xbf16>
    %c0_130 = arith.constant 0 : index
    %c0_131 = arith.constant 0 : index
    %c0_132 = arith.constant 0 : index
    %205 = vector.load %arg3[%c0_130, %c0_131, %c0_132] : memref<2x128x128xbf16, #tpu.memory_space<vmem>>, vector<1x128x128xbf16>
    %206 = vector.shape_cast %205 : vector<1x128x128xbf16> to vector<128x128xbf16>
    %cst_133 = arith.constant dense<0.000000e+00> : vector<8x128xf32>
    %207 = tpu.matmul %204, %206, %cst_133 {dimension_numbers = #tpu.dot_dimension_numbers<[1], [0], [0], [1], [0, 0, 1, 1], [], []>} : vector<8x128xbf16>, vector<128x128xbf16>, vector<8x128xf32> -> vector<8x128xf32>
    %208 = arith.addf %202, %207 : vector<8x128xf32>
    %209 = arith.mulf %208, %8 : vector<8x128xf32>
    %210 = math.tanh %209 : vector<8x128xf32>
    %211 = arith.mulf %210, %8 : vector<8x128xf32>
    %212 = arith.addf %211, %11 : vector<8x128xf32>
    %c96_i32_134 = arith.constant 96 : i32
    %213 = tpu.dynamic_rotate %212 by %c96_i32_134 dim 1 : vector<8x128xf32>, i32 -> vector<8x128xf32>
    %c64_i32_135 = arith.constant 64 : i32
    %214 = tpu.dynamic_rotate %212 by %c64_i32_135 dim 1 : vector<8x128xf32>, i32 -> vector<8x128xf32>
    %c32_i32_136 = arith.constant 32 : i32
    %215 = tpu.dynamic_rotate %212 by %c32_i32_136 dim 1 : vector<8x128xf32>, i32 -> vector<8x128xf32>
    %c0_137 = arith.constant 0 : index
    %c0_138 = arith.constant 0 : index
    %216 = vector.load %arg11[%c0_137, %c0_138] : memref<8x128xf32, #tpu.memory_space<vmem>>, vector<8x128xf32>
    %217 = arith.mulf %213, %216 : vector<8x128xf32>
    %218 = arith.mulf %212, %214 : vector<8x128xf32>
    %219 = arith.addf %217, %218 : vector<8x128xf32>
    %220 = arith.mulf %219, %16 : vector<8x128xf32>
    %221 = math.tanh %220 : vector<8x128xf32>
    %222 = arith.mulf %215, %221 : vector<8x128xf32>
    %c0_139 = arith.constant 0 : index
    %c0_140 = arith.constant 0 : index
    %223 = vector.load %arg11[%c0_139, %c0_140] : memref<8x128xf32, #tpu.memory_space<vmem>>, vector<8x128xf32>
    tpu.vector_store %arg11[%c0_139, %c0_140], %220 {strides = array<i32>} : memref<8x128xf32, #tpu.memory_space<vmem>>, vector<8x128xf32>,
    %c0_141 = arith.constant 0 : index
    %c0_142 = arith.constant 0 : index
    %224 = vector.load %arg10[%c0_141, %c0_142] : memref<8x128xf32, #tpu.memory_space<vmem>>, vector<8x128xf32>
    tpu.vector_store %arg10[%c0_141, %c0_142], %222 {strides = array<i32>} : memref<8x128xf32, #tpu.memory_space<vmem>>, vector<8x128xf32>,
    %225 = arith.index_cast %200 : i32 to index
    %c0_143 = arith.constant 0 : index
    %226 = vector.load %arg8[%225, %c0_143] : memref<64x128xf32, #tpu.memory_space<vmem>>, vector<8x128xf32>
    tpu.vector_store %arg8[%225, %c0_143], %222 {strides = array<i32>} : memref<64x128xf32, #tpu.memory_space<vmem>>, vector<8x128xf32>,
    %c7_i32 = arith.constant 7 : i32
    %c8_i32_144 = arith.constant 8 : i32
    %227 = arith.muli %c7_i32, %c8_i32_144 : i32
    %228 = tpu.assume_multiple %227, 8 : i32
    %229 = arith.index_cast %228 : i32 to index
    %c0_145 = arith.constant 0 : index
    %230 = vector.load %arg9[%229, %c0_145] : memref<64x128xf32, #tpu.memory_space<vmem>>, vector<8x128xf32>
    %c0_146 = arith.constant 0 : index
    %c0_147 = arith.constant 0 : index
    %231 = vector.load %arg10[%c0_146, %c0_147] : memref<8x128xf32, #tpu.memory_space<vmem>>, vector<8x128xf32>
    %232 = arith.truncf %231 : vector<8x128xf32> to vector<8x128xbf16>
    %c0_148 = arith.constant 0 : index
    %c0_149 = arith.constant 0 : index
    %c0_150 = arith.constant 0 : index
    %233 = vector.load %arg3[%c0_148, %c0_149, %c0_150] : memref<2x128x128xbf16, #tpu.memory_space<vmem>>, vector<1x128x128xbf16>
    %234 = vector.shape_cast %233 : vector<1x128x128xbf16> to vector<128x128xbf16>
    %cst_151 = arith.constant dense<0.000000e+00> : vector<8x128xf32>
    %235 = tpu.matmul %232, %234, %cst_151 {dimension_numbers = #tpu.dot_dimension_numbers<[1], [0], [0], [1], [0, 0, 1, 1], [], []>} : vector<8x128xbf16>, vector<128x128xbf16>, vector<8x128xf32> -> vector<8x128xf32>
    %236 = arith.addf %230, %235 : vector<8x128xf32>
    %237 = arith.mulf %236, %8 : vector<8x128xf32>
    %238 = math.tanh %237 : vector<8x128xf32>
    %239 = arith.mulf %238, %8 : vector<8x128xf32>
    %240 = arith.addf %239, %11 : vector<8x128xf32>
    %c96_i32_152 = arith.constant 96 : i32
    %241 = tpu.dynamic_rotate %240 by %c96_i32_152 dim 1 : vector<8x128xf32>, i32 -> vector<8x128xf32>
    %c64_i32_153 = arith.constant 64 : i32
    %242 = tpu.dynamic_rotate %240 by %c64_i32_153 dim 1 : vector<8x128xf32>, i32 -> vector<8x128xf32>
    %c32_i32_154 = arith.constant 32 : i32
    %243 = tpu.dynamic_rotate %240 by %c32_i32_154 dim 1 : vector<8x128xf32>, i32 -> vector<8x128xf32>
    %c0_155 = arith.constant 0 : index
    %c0_156 = arith.constant 0 : index
    %244 = vector.load %arg11[%c0_155, %c0_156] : memref<8x128xf32, #tpu.memory_space<vmem>>, vector<8x128xf32>
    %245 = arith.mulf %241, %244 : vector<8x128xf32>
    %246 = arith.mulf %240, %242 : vector<8x128xf32>
    %247 = arith.addf %245, %246 : vector<8x128xf32>
    %248 = arith.mulf %247, %16 : vector<8x128xf32>
    %249 = math.tanh %248 : vector<8x128xf32>
    %250 = arith.mulf %243, %249 : vector<8x128xf32>
    %c0_157 = arith.constant 0 : index
    %c0_158 = arith.constant 0 : index
    %251 = vector.load %arg11[%c0_157, %c0_158] : memref<8x128xf32, #tpu.memory_space<vmem>>, vector<8x128xf32>
    tpu.vector_store %arg11[%c0_157, %c0_158], %248 {strides = array<i32>} : memref<8x128xf32, #tpu.memory_space<vmem>>, vector<8x128xf32>,
    %c0_159 = arith.constant 0 : index
    %c0_160 = arith.constant 0 : index
    %252 = vector.load %arg10[%c0_159, %c0_160] : memref<8x128xf32, #tpu.memory_space<vmem>>, vector<8x128xf32>
    tpu.vector_store %arg10[%c0_159, %c0_160], %250 {strides = array<i32>} : memref<8x128xf32, #tpu.memory_space<vmem>>, vector<8x128xf32>,
    %253 = arith.index_cast %228 : i32 to index
    %c0_161 = arith.constant 0 : index
    %254 = vector.load %arg8[%253, %c0_161] : memref<64x128xf32, #tpu.memory_space<vmem>>, vector<8x128xf32>
    tpu.vector_store %arg8[%253, %c0_161], %250 {strides = array<i32>} : memref<64x128xf32, #tpu.memory_space<vmem>>, vector<8x128xf32>,
    %c8_i32_162 = arith.constant 8 : i32
    %c0_163 = arith.constant 0 : index
    %c0_164 = arith.constant 0 : index
    %255 = vector.load %arg8[%c0_163, %c0_164] : memref<64x128xf32, #tpu.memory_space<vmem>>, vector<64x128xf32>
    %c1 = arith.constant 1 : index
    %c0_165 = arith.constant 0 : index
    %c0_166 = arith.constant 0 : index
    %256 = vector.load %arg2[%c1, %c0_165, %c0_166] : memref<2x128x128xbf16, #tpu.memory_space<vmem>>, vector<1x128x128xbf16>
    %257 = vector.shape_cast %256 : vector<1x128x128xbf16> to vector<128x128xbf16>
    %258 = arith.truncf %255 : vector<64x128xf32> to vector<64x128xbf16>
    %cst_167 = arith.constant dense<0.000000e+00> : vector<64x128xf32>
    %259 = tpu.matmul %258, %257, %cst_167 {dimension_numbers = #tpu.dot_dimension_numbers<[1], [0], [0], [1], [0, 0, 1, 1], [], []>} : vector<64x128xbf16>, vector<128x128xbf16>, vector<64x128xf32> -> vector<64x128xf32>
    %c1_168 = arith.constant 1 : index
    %c0_169 = arith.constant 0 : index
    %c0_170 = arith.constant 0 : index
    %260 = vector.load %arg4[%c1_168, %c0_169, %c0_170] : memref<2x1x128xf32, #tpu.memory_space<vmem>>, vector<1x1x128xf32>
    %261 = vector.shape_cast %260 : vector<1x1x128xf32> to vector<1x128xf32>
    %262 = vector.broadcast %261 : vector<1x128xf32> to vector<64x128xf32>
    %263 = arith.addf %259, %262 : vector<64x128xf32>
    %c0_171 = arith.constant 0 : index
    %c0_172 = arith.constant 0 : index
    %264 = vector.load %arg9[%c0_171, %c0_172] : memref<64x128xf32, #tpu.memory_space<vmem>>, vector<64x128xf32>
    tpu.vector_store %arg9[%c0_171, %c0_172], %263 {strides = array<i32>} : memref<64x128xf32, #tpu.memory_space<vmem>>, vector<64x128xf32>,
    %cst_173 = arith.constant 0.000000e+00 : f32
    %265 = vector.broadcast %cst_173 : f32 to vector<8x128xf32>
    %c0_174 = arith.constant 0 : index
    %c0_175 = arith.constant 0 : index
    %266 = vector.load %arg10[%c0_174, %c0_175] : memref<8x128xf32, #tpu.memory_space<vmem>>, vector<8x128xf32>
    tpu.vector_store %arg10[%c0_174, %c0_175], %265 {strides = array<i32>} : memref<8x128xf32, #tpu.memory_space<vmem>>, vector<8x128xf32>,
    %cst_176 = arith.constant 0.000000e+00 : f32
    %267 = vector.broadcast %cst_176 : f32 to vector<8x128xf32>
    %c0_177 = arith.constant 0 : index
    %c0_178 = arith.constant 0 : index
    %268 = vector.load %arg11[%c0_177, %c0_178] : memref<8x128xf32, #tpu.memory_space<vmem>>, vector<8x128xf32>
    tpu.vector_store %arg11[%c0_177, %c0_178], %267 {strides = array<i32>} : memref<8x128xf32, #tpu.memory_space<vmem>>, vector<8x128xf32>,
    %c0_i32_179 = arith.constant 0 : i32
    %c8_i32_180 = arith.constant 8 : i32
    %269 = arith.muli %c0_i32_179, %c8_i32_180 : i32
    %270 = tpu.assume_multiple %269, 8 : i32
    %271 = arith.index_cast %270 : i32 to index
    %c0_181 = arith.constant 0 : index
    %272 = vector.load %arg9[%271, %c0_181] : memref<64x128xf32, #tpu.memory_space<vmem>>, vector<8x128xf32>
    %c0_182 = arith.constant 0 : index
    %c0_183 = arith.constant 0 : index
    %273 = vector.load %arg10[%c0_182, %c0_183] : memref<8x128xf32, #tpu.memory_space<vmem>>, vector<8x128xf32>
    %274 = arith.truncf %273 : vector<8x128xf32> to vector<8x128xbf16>
    %c1_184 = arith.constant 1 : index
    %c0_185 = arith.constant 0 : index
    %c0_186 = arith.constant 0 : index
    %275 = vector.load %arg3[%c1_184, %c0_185, %c0_186] : memref<2x128x128xbf16, #tpu.memory_space<vmem>>, vector<1x128x128xbf16>
    %276 = vector.shape_cast %275 : vector<1x128x128xbf16> to vector<128x128xbf16>
    %cst_187 = arith.constant dense<0.000000e+00> : vector<8x128xf32>
    %277 = tpu.matmul %274, %276, %cst_187 {dimension_numbers = #tpu.dot_dimension_numbers<[1], [0], [0], [1], [0, 0, 1, 1], [], []>} : vector<8x128xbf16>, vector<128x128xbf16>, vector<8x128xf32> -> vector<8x128xf32>
    %278 = arith.addf %272, %277 : vector<8x128xf32>
    %279 = arith.mulf %278, %8 : vector<8x128xf32>
    %280 = math.tanh %279 : vector<8x128xf32>
    %281 = arith.mulf %280, %8 : vector<8x128xf32>
    %282 = arith.addf %281, %11 : vector<8x128xf32>
    %c96_i32_188 = arith.constant 96 : i32
    %283 = tpu.dynamic_rotate %282 by %c96_i32_188 dim 1 : vector<8x128xf32>, i32 -> vector<8x128xf32>
    %c64_i32_189 = arith.constant 64 : i32
    %284 = tpu.dynamic_rotate %282 by %c64_i32_189 dim 1 : vector<8x128xf32>, i32 -> vector<8x128xf32>
    %c32_i32_190 = arith.constant 32 : i32
    %285 = tpu.dynamic_rotate %282 by %c32_i32_190 dim 1 : vector<8x128xf32>, i32 -> vector<8x128xf32>
    %c0_191 = arith.constant 0 : index
    %c0_192 = arith.constant 0 : index
    %286 = vector.load %arg11[%c0_191, %c0_192] : memref<8x128xf32, #tpu.memory_space<vmem>>, vector<8x128xf32>
    %287 = arith.mulf %283, %286 : vector<8x128xf32>
    %288 = arith.mulf %282, %284 : vector<8x128xf32>
    %289 = arith.addf %287, %288 : vector<8x128xf32>
    %290 = arith.mulf %289, %16 : vector<8x128xf32>
    %291 = math.tanh %290 : vector<8x128xf32>
    %292 = arith.mulf %285, %291 : vector<8x128xf32>
    %c0_193 = arith.constant 0 : index
    %c0_194 = arith.constant 0 : index
    %293 = vector.load %arg11[%c0_193, %c0_194] : memref<8x128xf32, #tpu.memory_space<vmem>>, vector<8x128xf32>
    tpu.vector_store %arg11[%c0_193, %c0_194], %290 {strides = array<i32>} : memref<8x128xf32, #tpu.memory_space<vmem>>, vector<8x128xf32>,
    %c0_195 = arith.constant 0 : index
    %c0_196 = arith.constant 0 : index
    %294 = vector.load %arg10[%c0_195, %c0_196] : memref<8x128xf32, #tpu.memory_space<vmem>>, vector<8x128xf32>
    tpu.vector_store %arg10[%c0_195, %c0_196], %292 {strides = array<i32>} : memref<8x128xf32, #tpu.memory_space<vmem>>, vector<8x128xf32>,
    %295 = arith.truncf %292 : vector<8x128xf32> to vector<8x128xbf16>
    %c0_197 = arith.constant 0 : index
    %c0_198 = arith.constant 0 : index
    %296 = vector.load %arg5[%c0_197, %c0_198] : memref<128x128xbf16, #tpu.memory_space<vmem>>, vector<128x128xbf16>
    %cst_199 = arith.constant dense<0.000000e+00> : vector<8x128xf32>
    %297 = tpu.matmul %295, %296, %cst_199 {dimension_numbers = #tpu.dot_dimension_numbers<[1], [0], [0], [1], [0, 0, 1, 1], [], []>} : vector<8x128xbf16>, vector<128x128xbf16>, vector<8x128xf32> -> vector<8x128xf32>
    %c0_200 = arith.constant 0 : index
    %c0_201 = arith.constant 0 : index
    %298 = vector.load %arg6[%c0_200, %c0_201] : memref<1x128xf32, #tpu.memory_space<vmem>>, vector<1x128xf32>
    %299 = vector.broadcast %298 : vector<1x128xf32> to vector<8x128xf32>
    %300 = arith.addf %297, %299 : vector<8x128xf32>
    %301 = arith.index_cast %270 : i32 to index
    %c0_202 = arith.constant 0 : index
    %302 = vector.load %arg7[%301, %c0_202] : memref<64x128xf32, #tpu.memory_space<vmem>>, vector<8x128xf32>
    tpu.vector_store %arg7[%301, %c0_202], %300 {strides = array<i32>} : memref<64x128xf32, #tpu.memory_space<vmem>>, vector<8x128xf32>,
    %c1_i32_203 = arith.constant 1 : i32
    %c8_i32_204 = arith.constant 8 : i32
    %303 = arith.muli %c1_i32_203, %c8_i32_204 : i32
    %304 = tpu.assume_multiple %303, 8 : i32
    %305 = arith.index_cast %304 : i32 to index
    %c0_205 = arith.constant 0 : index
    %306 = vector.load %arg9[%305, %c0_205] : memref<64x128xf32, #tpu.memory_space<vmem>>, vector<8x128xf32>
    %c0_206 = arith.constant 0 : index
    %c0_207 = arith.constant 0 : index
    %307 = vector.load %arg10[%c0_206, %c0_207] : memref<8x128xf32, #tpu.memory_space<vmem>>, vector<8x128xf32>
    %308 = arith.truncf %307 : vector<8x128xf32> to vector<8x128xbf16>
    %c1_208 = arith.constant 1 : index
    %c0_209 = arith.constant 0 : index
    %c0_210 = arith.constant 0 : index
    %309 = vector.load %arg3[%c1_208, %c0_209, %c0_210] : memref<2x128x128xbf16, #tpu.memory_space<vmem>>, vector<1x128x128xbf16>
    %310 = vector.shape_cast %309 : vector<1x128x128xbf16> to vector<128x128xbf16>
    %cst_211 = arith.constant dense<0.000000e+00> : vector<8x128xf32>
    %311 = tpu.matmul %308, %310, %cst_211 {dimension_numbers = #tpu.dot_dimension_numbers<[1], [0], [0], [1], [0, 0, 1, 1], [], []>} : vector<8x128xbf16>, vector<128x128xbf16>, vector<8x128xf32> -> vector<8x128xf32>
    %312 = arith.addf %306, %311 : vector<8x128xf32>
    %313 = arith.mulf %312, %8 : vector<8x128xf32>
    %314 = math.tanh %313 : vector<8x128xf32>
    %315 = arith.mulf %314, %8 : vector<8x128xf32>
    %316 = arith.addf %315, %11 : vector<8x128xf32>
    %c96_i32_212 = arith.constant 96 : i32
    %317 = tpu.dynamic_rotate %316 by %c96_i32_212 dim 1 : vector<8x128xf32>, i32 -> vector<8x128xf32>
    %c64_i32_213 = arith.constant 64 : i32
    %318 = tpu.dynamic_rotate %316 by %c64_i32_213 dim 1 : vector<8x128xf32>, i32 -> vector<8x128xf32>
    %c32_i32_214 = arith.constant 32 : i32
    %319 = tpu.dynamic_rotate %316 by %c32_i32_214 dim 1 : vector<8x128xf32>, i32 -> vector<8x128xf32>
    %c0_215 = arith.constant 0 : index
    %c0_216 = arith.constant 0 : index
    %320 = vector.load %arg11[%c0_215, %c0_216] : memref<8x128xf32, #tpu.memory_space<vmem>>, vector<8x128xf32>
    %321 = arith.mulf %317, %320 : vector<8x128xf32>
    %322 = arith.mulf %316, %318 : vector<8x128xf32>
    %323 = arith.addf %321, %322 : vector<8x128xf32>
    %324 = arith.mulf %323, %16 : vector<8x128xf32>
    %325 = math.tanh %324 : vector<8x128xf32>
    %326 = arith.mulf %319, %325 : vector<8x128xf32>
    %c0_217 = arith.constant 0 : index
    %c0_218 = arith.constant 0 : index
    %327 = vector.load %arg11[%c0_217, %c0_218] : memref<8x128xf32, #tpu.memory_space<vmem>>, vector<8x128xf32>
    tpu.vector_store %arg11[%c0_217, %c0_218], %324 {strides = array<i32>} : memref<8x128xf32, #tpu.memory_space<vmem>>, vector<8x128xf32>,
    %c0_219 = arith.constant 0 : index
    %c0_220 = arith.constant 0 : index
    %328 = vector.load %arg10[%c0_219, %c0_220] : memref<8x128xf32, #tpu.memory_space<vmem>>, vector<8x128xf32>
    tpu.vector_store %arg10[%c0_219, %c0_220], %326 {strides = array<i32>} : memref<8x128xf32, #tpu.memory_space<vmem>>, vector<8x128xf32>,
    %329 = arith.truncf %326 : vector<8x128xf32> to vector<8x128xbf16>
    %c0_221 = arith.constant 0 : index
    %c0_222 = arith.constant 0 : index
    %330 = vector.load %arg5[%c0_221, %c0_222] : memref<128x128xbf16, #tpu.memory_space<vmem>>, vector<128x128xbf16>
    %cst_223 = arith.constant dense<0.000000e+00> : vector<8x128xf32>
    %331 = tpu.matmul %329, %330, %cst_223 {dimension_numbers = #tpu.dot_dimension_numbers<[1], [0], [0], [1], [0, 0, 1, 1], [], []>} : vector<8x128xbf16>, vector<128x128xbf16>, vector<8x128xf32> -> vector<8x128xf32>
    %c0_224 = arith.constant 0 : index
    %c0_225 = arith.constant 0 : index
    %332 = vector.load %arg6[%c0_224, %c0_225] : memref<1x128xf32, #tpu.memory_space<vmem>>, vector<1x128xf32>
    %333 = vector.broadcast %332 : vector<1x128xf32> to vector<8x128xf32>
    %334 = arith.addf %331, %333 : vector<8x128xf32>
    %335 = arith.index_cast %304 : i32 to index
    %c0_226 = arith.constant 0 : index
    %336 = vector.load %arg7[%335, %c0_226] : memref<64x128xf32, #tpu.memory_space<vmem>>, vector<8x128xf32>
    tpu.vector_store %arg7[%335, %c0_226], %334 {strides = array<i32>} : memref<64x128xf32, #tpu.memory_space<vmem>>, vector<8x128xf32>,
    %c2_i32_227 = arith.constant 2 : i32
    %c8_i32_228 = arith.constant 8 : i32
    %337 = arith.muli %c2_i32_227, %c8_i32_228 : i32
    %338 = tpu.assume_multiple %337, 8 : i32
    %339 = arith.index_cast %338 : i32 to index
    %c0_229 = arith.constant 0 : index
    %340 = vector.load %arg9[%339, %c0_229] : memref<64x128xf32, #tpu.memory_space<vmem>>, vector<8x128xf32>
    %c0_230 = arith.constant 0 : index
    %c0_231 = arith.constant 0 : index
    %341 = vector.load %arg10[%c0_230, %c0_231] : memref<8x128xf32, #tpu.memory_space<vmem>>, vector<8x128xf32>
    %342 = arith.truncf %341 : vector<8x128xf32> to vector<8x128xbf16>
    %c1_232 = arith.constant 1 : index
    %c0_233 = arith.constant 0 : index
    %c0_234 = arith.constant 0 : index
    %343 = vector.load %arg3[%c1_232, %c0_233, %c0_234] : memref<2x128x128xbf16, #tpu.memory_space<vmem>>, vector<1x128x128xbf16>
    %344 = vector.shape_cast %343 : vector<1x128x128xbf16> to vector<128x128xbf16>
    %cst_235 = arith.constant dense<0.000000e+00> : vector<8x128xf32>
    %345 = tpu.matmul %342, %344, %cst_235 {dimension_numbers = #tpu.dot_dimension_numbers<[1], [0], [0], [1], [0, 0, 1, 1], [], []>} : vector<8x128xbf16>, vector<128x128xbf16>, vector<8x128xf32> -> vector<8x128xf32>
    %346 = arith.addf %340, %345 : vector<8x128xf32>
    %347 = arith.mulf %346, %8 : vector<8x128xf32>
    %348 = math.tanh %347 : vector<8x128xf32>
    %349 = arith.mulf %348, %8 : vector<8x128xf32>
    %350 = arith.addf %349, %11 : vector<8x128xf32>
    %c96_i32_236 = arith.constant 96 : i32
    %351 = tpu.dynamic_rotate %350 by %c96_i32_236 dim 1 : vector<8x128xf32>, i32 -> vector<8x128xf32>
    %c64_i32_237 = arith.constant 64 : i32
    %352 = tpu.dynamic_rotate %350 by %c64_i32_237 dim 1 : vector<8x128xf32>, i32 -> vector<8x128xf32>
    %c32_i32_238 = arith.constant 32 : i32
    %353 = tpu.dynamic_rotate %350 by %c32_i32_238 dim 1 : vector<8x128xf32>, i32 -> vector<8x128xf32>
    %c0_239 = arith.constant 0 : index
    %c0_240 = arith.constant 0 : index
    %354 = vector.load %arg11[%c0_239, %c0_240] : memref<8x128xf32, #tpu.memory_space<vmem>>, vector<8x128xf32>
    %355 = arith.mulf %351, %354 : vector<8x128xf32>
    %356 = arith.mulf %350, %352 : vector<8x128xf32>
    %357 = arith.addf %355, %356 : vector<8x128xf32>
    %358 = arith.mulf %357, %16 : vector<8x128xf32>
    %359 = math.tanh %358 : vector<8x128xf32>
    %360 = arith.mulf %353, %359 : vector<8x128xf32>
    %c0_241 = arith.constant 0 : index
    %c0_242 = arith.constant 0 : index
    %361 = vector.load %arg11[%c0_241, %c0_242] : memref<8x128xf32, #tpu.memory_space<vmem>>, vector<8x128xf32>
    tpu.vector_store %arg11[%c0_241, %c0_242], %358 {strides = array<i32>} : memref<8x128xf32, #tpu.memory_space<vmem>>, vector<8x128xf32>,
    %c0_243 = arith.constant 0 : index
    %c0_244 = arith.constant 0 : index
    %362 = vector.load %arg10[%c0_243, %c0_244] : memref<8x128xf32, #tpu.memory_space<vmem>>, vector<8x128xf32>
    tpu.vector_store %arg10[%c0_243, %c0_244], %360 {strides = array<i32>} : memref<8x128xf32, #tpu.memory_space<vmem>>, vector<8x128xf32>,
    %363 = arith.truncf %360 : vector<8x128xf32> to vector<8x128xbf16>
    %c0_245 = arith.constant 0 : index
    %c0_246 = arith.constant 0 : index
    %364 = vector.load %arg5[%c0_245, %c0_246] : memref<128x128xbf16, #tpu.memory_space<vmem>>, vector<128x128xbf16>
    %cst_247 = arith.constant dense<0.000000e+00> : vector<8x128xf32>
    %365 = tpu.matmul %363, %364, %cst_247 {dimension_numbers = #tpu.dot_dimension_numbers<[1], [0], [0], [1], [0, 0, 1, 1], [], []>} : vector<8x128xbf16>, vector<128x128xbf16>, vector<8x128xf32> -> vector<8x128xf32>
    %c0_248 = arith.constant 0 : index
    %c0_249 = arith.constant 0 : index
    %366 = vector.load %arg6[%c0_248, %c0_249] : memref<1x128xf32, #tpu.memory_space<vmem>>, vector<1x128xf32>
    %367 = vector.broadcast %366 : vector<1x128xf32> to vector<8x128xf32>
    %368 = arith.addf %365, %367 : vector<8x128xf32>
    %369 = arith.index_cast %338 : i32 to index
    %c0_250 = arith.constant 0 : index
    %370 = vector.load %arg7[%369, %c0_250] : memref<64x128xf32, #tpu.memory_space<vmem>>, vector<8x128xf32>
    tpu.vector_store %arg7[%369, %c0_250], %368 {strides = array<i32>} : memref<64x128xf32, #tpu.memory_space<vmem>>, vector<8x128xf32>,
    %c3_i32_251 = arith.constant 3 : i32
    %c8_i32_252 = arith.constant 8 : i32
    %371 = arith.muli %c3_i32_251, %c8_i32_252 : i32
    %372 = tpu.assume_multiple %371, 8 : i32
    %373 = arith.index_cast %372 : i32 to index
    %c0_253 = arith.constant 0 : index
    %374 = vector.load %arg9[%373, %c0_253] : memref<64x128xf32, #tpu.memory_space<vmem>>, vector<8x128xf32>
    %c0_254 = arith.constant 0 : index
    %c0_255 = arith.constant 0 : index
    %375 = vector.load %arg10[%c0_254, %c0_255] : memref<8x128xf32, #tpu.memory_space<vmem>>, vector<8x128xf32>
    %376 = arith.truncf %375 : vector<8x128xf32> to vector<8x128xbf16>
    %c1_256 = arith.constant 1 : index
    %c0_257 = arith.constant 0 : index
    %c0_258 = arith.constant 0 : index
    %377 = vector.load %arg3[%c1_256, %c0_257, %c0_258] : memref<2x128x128xbf16, #tpu.memory_space<vmem>>, vector<1x128x128xbf16>
    %378 = vector.shape_cast %377 : vector<1x128x128xbf16> to vector<128x128xbf16>
    %cst_259 = arith.constant dense<0.000000e+00> : vector<8x128xf32>
    %379 = tpu.matmul %376, %378, %cst_259 {dimension_numbers = #tpu.dot_dimension_numbers<[1], [0], [0], [1], [0, 0, 1, 1], [], []>} : vector<8x128xbf16>, vector<128x128xbf16>, vector<8x128xf32> -> vector<8x128xf32>
    %380 = arith.addf %374, %379 : vector<8x128xf32>
    %381 = arith.mulf %380, %8 : vector<8x128xf32>
    %382 = math.tanh %381 : vector<8x128xf32>
    %383 = arith.mulf %382, %8 : vector<8x128xf32>
    %384 = arith.addf %383, %11 : vector<8x128xf32>
    %c96_i32_260 = arith.constant 96 : i32
    %385 = tpu.dynamic_rotate %384 by %c96_i32_260 dim 1 : vector<8x128xf32>, i32 -> vector<8x128xf32>
    %c64_i32_261 = arith.constant 64 : i32
    %386 = tpu.dynamic_rotate %384 by %c64_i32_261 dim 1 : vector<8x128xf32>, i32 -> vector<8x128xf32>
    %c32_i32_262 = arith.constant 32 : i32
    %387 = tpu.dynamic_rotate %384 by %c32_i32_262 dim 1 : vector<8x128xf32>, i32 -> vector<8x128xf32>
    %c0_263 = arith.constant 0 : index
    %c0_264 = arith.constant 0 : index
    %388 = vector.load %arg11[%c0_263, %c0_264] : memref<8x128xf32, #tpu.memory_space<vmem>>, vector<8x128xf32>
    %389 = arith.mulf %385, %388 : vector<8x128xf32>
    %390 = arith.mulf %384, %386 : vector<8x128xf32>
    %391 = arith.addf %389, %390 : vector<8x128xf32>
    %392 = arith.mulf %391, %16 : vector<8x128xf32>
    %393 = math.tanh %392 : vector<8x128xf32>
    %394 = arith.mulf %387, %393 : vector<8x128xf32>
    %c0_265 = arith.constant 0 : index
    %c0_266 = arith.constant 0 : index
    %395 = vector.load %arg11[%c0_265, %c0_266] : memref<8x128xf32, #tpu.memory_space<vmem>>, vector<8x128xf32>
    tpu.vector_store %arg11[%c0_265, %c0_266], %392 {strides = array<i32>} : memref<8x128xf32, #tpu.memory_space<vmem>>, vector<8x128xf32>,
    %c0_267 = arith.constant 0 : index
    %c0_268 = arith.constant 0 : index
    %396 = vector.load %arg10[%c0_267, %c0_268] : memref<8x128xf32, #tpu.memory_space<vmem>>, vector<8x128xf32>
    tpu.vector_store %arg10[%c0_267, %c0_268], %394 {strides = array<i32>} : memref<8x128xf32, #tpu.memory_space<vmem>>, vector<8x128xf32>,
    %397 = arith.truncf %394 : vector<8x128xf32> to vector<8x128xbf16>
    %c0_269 = arith.constant 0 : index
    %c0_270 = arith.constant 0 : index
    %398 = vector.load %arg5[%c0_269, %c0_270] : memref<128x128xbf16, #tpu.memory_space<vmem>>, vector<128x128xbf16>
    %cst_271 = arith.constant dense<0.000000e+00> : vector<8x128xf32>
    %399 = tpu.matmul %397, %398, %cst_271 {dimension_numbers = #tpu.dot_dimension_numbers<[1], [0], [0], [1], [0, 0, 1, 1], [], []>} : vector<8x128xbf16>, vector<128x128xbf16>, vector<8x128xf32> -> vector<8x128xf32>
    %c0_272 = arith.constant 0 : index
    %c0_273 = arith.constant 0 : index
    %400 = vector.load %arg6[%c0_272, %c0_273] : memref<1x128xf32, #tpu.memory_space<vmem>>, vector<1x128xf32>
    %401 = vector.broadcast %400 : vector<1x128xf32> to vector<8x128xf32>
    %402 = arith.addf %399, %401 : vector<8x128xf32>
    %403 = arith.index_cast %372 : i32 to index
    %c0_274 = arith.constant 0 : index
    %404 = vector.load %arg7[%403, %c0_274] : memref<64x128xf32, #tpu.memory_space<vmem>>, vector<8x128xf32>
    tpu.vector_store %arg7[%403, %c0_274], %402 {strides = array<i32>} : memref<64x128xf32, #tpu.memory_space<vmem>>, vector<8x128xf32>,
    %c4_i32_275 = arith.constant 4 : i32
    %c8_i32_276 = arith.constant 8 : i32
    %405 = arith.muli %c4_i32_275, %c8_i32_276 : i32
    %406 = tpu.assume_multiple %405, 8 : i32
    %407 = arith.index_cast %406 : i32 to index
    %c0_277 = arith.constant 0 : index
    %408 = vector.load %arg9[%407, %c0_277] : memref<64x128xf32, #tpu.memory_space<vmem>>, vector<8x128xf32>
    %c0_278 = arith.constant 0 : index
    %c0_279 = arith.constant 0 : index
    %409 = vector.load %arg10[%c0_278, %c0_279] : memref<8x128xf32, #tpu.memory_space<vmem>>, vector<8x128xf32>
    %410 = arith.truncf %409 : vector<8x128xf32> to vector<8x128xbf16>
    %c1_280 = arith.constant 1 : index
    %c0_281 = arith.constant 0 : index
    %c0_282 = arith.constant 0 : index
    %411 = vector.load %arg3[%c1_280, %c0_281, %c0_282] : memref<2x128x128xbf16, #tpu.memory_space<vmem>>, vector<1x128x128xbf16>
    %412 = vector.shape_cast %411 : vector<1x128x128xbf16> to vector<128x128xbf16>
    %cst_283 = arith.constant dense<0.000000e+00> : vector<8x128xf32>
    %413 = tpu.matmul %410, %412, %cst_283 {dimension_numbers = #tpu.dot_dimension_numbers<[1], [0], [0], [1], [0, 0, 1, 1], [], []>} : vector<8x128xbf16>, vector<128x128xbf16>, vector<8x128xf32> -> vector<8x128xf32>
    %414 = arith.addf %408, %413 : vector<8x128xf32>
    %415 = arith.mulf %414, %8 : vector<8x128xf32>
    %416 = math.tanh %415 : vector<8x128xf32>
    %417 = arith.mulf %416, %8 : vector<8x128xf32>
    %418 = arith.addf %417, %11 : vector<8x128xf32>
    %c96_i32_284 = arith.constant 96 : i32
    %419 = tpu.dynamic_rotate %418 by %c96_i32_284 dim 1 : vector<8x128xf32>, i32 -> vector<8x128xf32>
    %c64_i32_285 = arith.constant 64 : i32
    %420 = tpu.dynamic_rotate %418 by %c64_i32_285 dim 1 : vector<8x128xf32>, i32 -> vector<8x128xf32>
    %c32_i32_286 = arith.constant 32 : i32
    %421 = tpu.dynamic_rotate %418 by %c32_i32_286 dim 1 : vector<8x128xf32>, i32 -> vector<8x128xf32>
    %c0_287 = arith.constant 0 : index
    %c0_288 = arith.constant 0 : index
    %422 = vector.load %arg11[%c0_287, %c0_288] : memref<8x128xf32, #tpu.memory_space<vmem>>, vector<8x128xf32>
    %423 = arith.mulf %419, %422 : vector<8x128xf32>
    %424 = arith.mulf %418, %420 : vector<8x128xf32>
    %425 = arith.addf %423, %424 : vector<8x128xf32>
    %426 = arith.mulf %425, %16 : vector<8x128xf32>
    %427 = math.tanh %426 : vector<8x128xf32>
    %428 = arith.mulf %421, %427 : vector<8x128xf32>
    %c0_289 = arith.constant 0 : index
    %c0_290 = arith.constant 0 : index
    %429 = vector.load %arg11[%c0_289, %c0_290] : memref<8x128xf32, #tpu.memory_space<vmem>>, vector<8x128xf32>
    tpu.vector_store %arg11[%c0_289, %c0_290], %426 {strides = array<i32>} : memref<8x128xf32, #tpu.memory_space<vmem>>, vector<8x128xf32>,
    %c0_291 = arith.constant 0 : index
    %c0_292 = arith.constant 0 : index
    %430 = vector.load %arg10[%c0_291, %c0_292] : memref<8x128xf32, #tpu.memory_space<vmem>>, vector<8x128xf32>
    tpu.vector_store %arg10[%c0_291, %c0_292], %428 {strides = array<i32>} : memref<8x128xf32, #tpu.memory_space<vmem>>, vector<8x128xf32>,
    %431 = arith.truncf %428 : vector<8x128xf32> to vector<8x128xbf16>
    %c0_293 = arith.constant 0 : index
    %c0_294 = arith.constant 0 : index
    %432 = vector.load %arg5[%c0_293, %c0_294] : memref<128x128xbf16, #tpu.memory_space<vmem>>, vector<128x128xbf16>
    %cst_295 = arith.constant dense<0.000000e+00> : vector<8x128xf32>
    %433 = tpu.matmul %431, %432, %cst_295 {dimension_numbers = #tpu.dot_dimension_numbers<[1], [0], [0], [1], [0, 0, 1, 1], [], []>} : vector<8x128xbf16>, vector<128x128xbf16>, vector<8x128xf32> -> vector<8x128xf32>
    %c0_296 = arith.constant 0 : index
    %c0_297 = arith.constant 0 : index
    %434 = vector.load %arg6[%c0_296, %c0_297] : memref<1x128xf32, #tpu.memory_space<vmem>>, vector<1x128xf32>
    %435 = vector.broadcast %434 : vector<1x128xf32> to vector<8x128xf32>
    %436 = arith.addf %433, %435 : vector<8x128xf32>
    %437 = arith.index_cast %406 : i32 to index
    %c0_298 = arith.constant 0 : index
    %438 = vector.load %arg7[%437, %c0_298] : memref<64x128xf32, #tpu.memory_space<vmem>>, vector<8x128xf32>
    tpu.vector_store %arg7[%437, %c0_298], %436 {strides = array<i32>} : memref<64x128xf32, #tpu.memory_space<vmem>>, vector<8x128xf32>,
    %c5_i32_299 = arith.constant 5 : i32
    %c8_i32_300 = arith.constant 8 : i32
    %439 = arith.muli %c5_i32_299, %c8_i32_300 : i32
    %440 = tpu.assume_multiple %439, 8 : i32
    %441 = arith.index_cast %440 : i32 to index
    %c0_301 = arith.constant 0 : index
    %442 = vector.load %arg9[%441, %c0_301] : memref<64x128xf32, #tpu.memory_space<vmem>>, vector<8x128xf32>
    %c0_302 = arith.constant 0 : index
    %c0_303 = arith.constant 0 : index
    %443 = vector.load %arg10[%c0_302, %c0_303] : memref<8x128xf32, #tpu.memory_space<vmem>>, vector<8x128xf32>
    %444 = arith.truncf %443 : vector<8x128xf32> to vector<8x128xbf16>
    %c1_304 = arith.constant 1 : index
    %c0_305 = arith.constant 0 : index
    %c0_306 = arith.constant 0 : index
    %445 = vector.load %arg3[%c1_304, %c0_305, %c0_306] : memref<2x128x128xbf16, #tpu.memory_space<vmem>>, vector<1x128x128xbf16>
    %446 = vector.shape_cast %445 : vector<1x128x128xbf16> to vector<128x128xbf16>
    %cst_307 = arith.constant dense<0.000000e+00> : vector<8x128xf32>
    %447 = tpu.matmul %444, %446, %cst_307 {dimension_numbers = #tpu.dot_dimension_numbers<[1], [0], [0], [1], [0, 0, 1, 1], [], []>} : vector<8x128xbf16>, vector<128x128xbf16>, vector<8x128xf32> -> vector<8x128xf32>
    %448 = arith.addf %442, %447 : vector<8x128xf32>
    %449 = arith.mulf %448, %8 : vector<8x128xf32>
    %450 = math.tanh %449 : vector<8x128xf32>
    %451 = arith.mulf %450, %8 : vector<8x128xf32>
    %452 = arith.addf %451, %11 : vector<8x128xf32>
    %c96_i32_308 = arith.constant 96 : i32
    %453 = tpu.dynamic_rotate %452 by %c96_i32_308 dim 1 : vector<8x128xf32>, i32 -> vector<8x128xf32>
    %c64_i32_309 = arith.constant 64 : i32
    %454 = tpu.dynamic_rotate %452 by %c64_i32_309 dim 1 : vector<8x128xf32>, i32 -> vector<8x128xf32>
    %c32_i32_310 = arith.constant 32 : i32
    %455 = tpu.dynamic_rotate %452 by %c32_i32_310 dim 1 : vector<8x128xf32>, i32 -> vector<8x128xf32>
    %c0_311 = arith.constant 0 : index
    %c0_312 = arith.constant 0 : index
    %456 = vector.load %arg11[%c0_311, %c0_312] : memref<8x128xf32, #tpu.memory_space<vmem>>, vector<8x128xf32>
    %457 = arith.mulf %453, %456 : vector<8x128xf32>
    %458 = arith.mulf %452, %454 : vector<8x128xf32>
    %459 = arith.addf %457, %458 : vector<8x128xf32>
    %460 = arith.mulf %459, %16 : vector<8x128xf32>
    %461 = math.tanh %460 : vector<8x128xf32>
    %462 = arith.mulf %455, %461 : vector<8x128xf32>
    %c0_313 = arith.constant 0 : index
    %c0_314 = arith.constant 0 : index
    %463 = vector.load %arg11[%c0_313, %c0_314] : memref<8x128xf32, #tpu.memory_space<vmem>>, vector<8x128xf32>
    tpu.vector_store %arg11[%c0_313, %c0_314], %460 {strides = array<i32>} : memref<8x128xf32, #tpu.memory_space<vmem>>, vector<8x128xf32>,
    %c0_315 = arith.constant 0 : index
    %c0_316 = arith.constant 0 : index
    %464 = vector.load %arg10[%c0_315, %c0_316] : memref<8x128xf32, #tpu.memory_space<vmem>>, vector<8x128xf32>
    tpu.vector_store %arg10[%c0_315, %c0_316], %462 {strides = array<i32>} : memref<8x128xf32, #tpu.memory_space<vmem>>, vector<8x128xf32>,
    %465 = arith.truncf %462 : vector<8x128xf32> to vector<8x128xbf16>
    %c0_317 = arith.constant 0 : index
    %c0_318 = arith.constant 0 : index
    %466 = vector.load %arg5[%c0_317, %c0_318] : memref<128x128xbf16, #tpu.memory_space<vmem>>, vector<128x128xbf16>
    %cst_319 = arith.constant dense<0.000000e+00> : vector<8x128xf32>
    %467 = tpu.matmul %465, %466, %cst_319 {dimension_numbers = #tpu.dot_dimension_numbers<[1], [0], [0], [1], [0, 0, 1, 1], [], []>} : vector<8x128xbf16>, vector<128x128xbf16>, vector<8x128xf32> -> vector<8x128xf32>
    %c0_320 = arith.constant 0 : index
    %c0_321 = arith.constant 0 : index
    %468 = vector.load %arg6[%c0_320, %c0_321] : memref<1x128xf32, #tpu.memory_space<vmem>>, vector<1x128xf32>
    %469 = vector.broadcast %468 : vector<1x128xf32> to vector<8x128xf32>
    %470 = arith.addf %467, %469 : vector<8x128xf32>
    %471 = arith.index_cast %440 : i32 to index
    %c0_322 = arith.constant 0 : index
    %472 = vector.load %arg7[%471, %c0_322] : memref<64x128xf32, #tpu.memory_space<vmem>>, vector<8x128xf32>
    tpu.vector_store %arg7[%471, %c0_322], %470 {strides = array<i32>} : memref<64x128xf32, #tpu.memory_space<vmem>>, vector<8x128xf32>,
    %c6_i32_323 = arith.constant 6 : i32
    %c8_i32_324 = arith.constant 8 : i32
    %473 = arith.muli %c6_i32_323, %c8_i32_324 : i32
    %474 = tpu.assume_multiple %473, 8 : i32
    %475 = arith.index_cast %474 : i32 to index
    %c0_325 = arith.constant 0 : index
    %476 = vector.load %arg9[%475, %c0_325] : memref<64x128xf32, #tpu.memory_space<vmem>>, vector<8x128xf32>
    %c0_326 = arith.constant 0 : index
    %c0_327 = arith.constant 0 : index
    %477 = vector.load %arg10[%c0_326, %c0_327] : memref<8x128xf32, #tpu.memory_space<vmem>>, vector<8x128xf32>
    %478 = arith.truncf %477 : vector<8x128xf32> to vector<8x128xbf16>
    %c1_328 = arith.constant 1 : index
    %c0_329 = arith.constant 0 : index
    %c0_330 = arith.constant 0 : index
    %479 = vector.load %arg3[%c1_328, %c0_329, %c0_330] : memref<2x128x128xbf16, #tpu.memory_space<vmem>>, vector<1x128x128xbf16>
    %480 = vector.shape_cast %479 : vector<1x128x128xbf16> to vector<128x128xbf16>
    %cst_331 = arith.constant dense<0.000000e+00> : vector<8x128xf32>
    %481 = tpu.matmul %478, %480, %cst_331 {dimension_numbers = #tpu.dot_dimension_numbers<[1], [0], [0], [1], [0, 0, 1, 1], [], []>} : vector<8x128xbf16>, vector<128x128xbf16>, vector<8x128xf32> -> vector<8x128xf32>
    %482 = arith.addf %476, %481 : vector<8x128xf32>
    %483 = arith.mulf %482, %8 : vector<8x128xf32>
    %484 = math.tanh %483 : vector<8x128xf32>
    %485 = arith.mulf %484, %8 : vector<8x128xf32>
    %486 = arith.addf %485, %11 : vector<8x128xf32>
    %c96_i32_332 = arith.constant 96 : i32
    %487 = tpu.dynamic_rotate %486 by %c96_i32_332 dim 1 : vector<8x128xf32>, i32 -> vector<8x128xf32>
    %c64_i32_333 = arith.constant 64 : i32
    %488 = tpu.dynamic_rotate %486 by %c64_i32_333 dim 1 : vector<8x128xf32>, i32 -> vector<8x128xf32>
    %c32_i32_334 = arith.constant 32 : i32
    %489 = tpu.dynamic_rotate %486 by %c32_i32_334 dim 1 : vector<8x128xf32>, i32 -> vector<8x128xf32>
    %c0_335 = arith.constant 0 : index
    %c0_336 = arith.constant 0 : index
    %490 = vector.load %arg11[%c0_335, %c0_336] : memref<8x128xf32, #tpu.memory_space<vmem>>, vector<8x128xf32>
    %491 = arith.mulf %487, %490 : vector<8x128xf32>
    %492 = arith.mulf %486, %488 : vector<8x128xf32>
    %493 = arith.addf %491, %492 : vector<8x128xf32>
    %494 = arith.mulf %493, %16 : vector<8x128xf32>
    %495 = math.tanh %494 : vector<8x128xf32>
    %496 = arith.mulf %489, %495 : vector<8x128xf32>
    %c0_337 = arith.constant 0 : index
    %c0_338 = arith.constant 0 : index
    %497 = vector.load %arg11[%c0_337, %c0_338] : memref<8x128xf32, #tpu.memory_space<vmem>>, vector<8x128xf32>
    tpu.vector_store %arg11[%c0_337, %c0_338], %494 {strides = array<i32>} : memref<8x128xf32, #tpu.memory_space<vmem>>, vector<8x128xf32>,
    %c0_339 = arith.constant 0 : index
    %c0_340 = arith.constant 0 : index
    %498 = vector.load %arg10[%c0_339, %c0_340] : memref<8x128xf32, #tpu.memory_space<vmem>>, vector<8x128xf32>
    tpu.vector_store %arg10[%c0_339, %c0_340], %496 {strides = array<i32>} : memref<8x128xf32, #tpu.memory_space<vmem>>, vector<8x128xf32>,
    %499 = arith.truncf %496 : vector<8x128xf32> to vector<8x128xbf16>
    %c0_341 = arith.constant 0 : index
    %c0_342 = arith.constant 0 : index
    %500 = vector.load %arg5[%c0_341, %c0_342] : memref<128x128xbf16, #tpu.memory_space<vmem>>, vector<128x128xbf16>
    %cst_343 = arith.constant dense<0.000000e+00> : vector<8x128xf32>
    %501 = tpu.matmul %499, %500, %cst_343 {dimension_numbers = #tpu.dot_dimension_numbers<[1], [0], [0], [1], [0, 0, 1, 1], [], []>} : vector<8x128xbf16>, vector<128x128xbf16>, vector<8x128xf32> -> vector<8x128xf32>
    %c0_344 = arith.constant 0 : index
    %c0_345 = arith.constant 0 : index
    %502 = vector.load %arg6[%c0_344, %c0_345] : memref<1x128xf32, #tpu.memory_space<vmem>>, vector<1x128xf32>
    %503 = vector.broadcast %502 : vector<1x128xf32> to vector<8x128xf32>
    %504 = arith.addf %501, %503 : vector<8x128xf32>
    %505 = arith.index_cast %474 : i32 to index
    %c0_346 = arith.constant 0 : index
    %506 = vector.load %arg7[%505, %c0_346] : memref<64x128xf32, #tpu.memory_space<vmem>>, vector<8x128xf32>
    tpu.vector_store %arg7[%505, %c0_346], %504 {strides = array<i32>} : memref<64x128xf32, #tpu.memory_space<vmem>>, vector<8x128xf32>,
    %c7_i32_347 = arith.constant 7 : i32
    %c8_i32_348 = arith.constant 8 : i32
    %507 = arith.muli %c7_i32_347, %c8_i32_348 : i32
    %508 = tpu.assume_multiple %507, 8 : i32
    %509 = arith.index_cast %508 : i32 to index
    %c0_349 = arith.constant 0 : index
    %510 = vector.load %arg9[%509, %c0_349] : memref<64x128xf32, #tpu.memory_space<vmem>>, vector<8x128xf32>
    %c0_350 = arith.constant 0 : index
    %c0_351 = arith.constant 0 : index
    %511 = vector.load %arg10[%c0_350, %c0_351] : memref<8x128xf32, #tpu.memory_space<vmem>>, vector<8x128xf32>
    %512 = arith.truncf %511 : vector<8x128xf32> to vector<8x128xbf16>
    %c1_352 = arith.constant 1 : index
    %c0_353 = arith.constant 0 : index
    %c0_354 = arith.constant 0 : index
    %513 = vector.load %arg3[%c1_352, %c0_353, %c0_354] : memref<2x128x128xbf16, #tpu.memory_space<vmem>>, vector<1x128x128xbf16>
    %514 = vector.shape_cast %513 : vector<1x128x128xbf16> to vector<128x128xbf16>
    %cst_355 = arith.constant dense<0.000000e+00> : vector<8x128xf32>
    %515 = tpu.matmul %512, %514, %cst_355 {dimension_numbers = #tpu.dot_dimension_numbers<[1], [0], [0], [1], [0, 0, 1, 1], [], []>} : vector<8x128xbf16>, vector<128x128xbf16>, vector<8x128xf32> -> vector<8x128xf32>
    %516 = arith.addf %510, %515 : vector<8x128xf32>
    %517 = arith.mulf %516, %8 : vector<8x128xf32>
    %518 = math.tanh %517 : vector<8x128xf32>
    %519 = arith.mulf %518, %8 : vector<8x128xf32>
    %520 = arith.addf %519, %11 : vector<8x128xf32>
    %c96_i32_356 = arith.constant 96 : i32
    %521 = tpu.dynamic_rotate %520 by %c96_i32_356 dim 1 : vector<8x128xf32>, i32 -> vector<8x128xf32>
    %c64_i32_357 = arith.constant 64 : i32
    %522 = tpu.dynamic_rotate %520 by %c64_i32_357 dim 1 : vector<8x128xf32>, i32 -> vector<8x128xf32>
    %c32_i32_358 = arith.constant 32 : i32
    %523 = tpu.dynamic_rotate %520 by %c32_i32_358 dim 1 : vector<8x128xf32>, i32 -> vector<8x128xf32>
    %c0_359 = arith.constant 0 : index
    %c0_360 = arith.constant 0 : index
    %524 = vector.load %arg11[%c0_359, %c0_360] : memref<8x128xf32, #tpu.memory_space<vmem>>, vector<8x128xf32>
    %525 = arith.mulf %521, %524 : vector<8x128xf32>
    %526 = arith.mulf %520, %522 : vector<8x128xf32>
    %527 = arith.addf %525, %526 : vector<8x128xf32>
    %528 = arith.mulf %527, %16 : vector<8x128xf32>
    %529 = math.tanh %528 : vector<8x128xf32>
    %530 = arith.mulf %523, %529 : vector<8x128xf32>
    %c0_361 = arith.constant 0 : index
    %c0_362 = arith.constant 0 : index
    %531 = vector.load %arg11[%c0_361, %c0_362] : memref<8x128xf32, #tpu.memory_space<vmem>>, vector<8x128xf32>
    tpu.vector_store %arg11[%c0_361, %c0_362], %528 {strides = array<i32>} : memref<8x128xf32, #tpu.memory_space<vmem>>, vector<8x128xf32>,
    %c0_363 = arith.constant 0 : index
    %c0_364 = arith.constant 0 : index
    %532 = vector.load %arg10[%c0_363, %c0_364] : memref<8x128xf32, #tpu.memory_space<vmem>>, vector<8x128xf32>
    tpu.vector_store %arg10[%c0_363, %c0_364], %530 {strides = array<i32>} : memref<8x128xf32, #tpu.memory_space<vmem>>, vector<8x128xf32>,
    %533 = arith.truncf %530 : vector<8x128xf32> to vector<8x128xbf16>
    %c0_365 = arith.constant 0 : index
    %c0_366 = arith.constant 0 : index
    %534 = vector.load %arg5[%c0_365, %c0_366] : memref<128x128xbf16, #tpu.memory_space<vmem>>, vector<128x128xbf16>
    %cst_367 = arith.constant dense<0.000000e+00> : vector<8x128xf32>
    %535 = tpu.matmul %533, %534, %cst_367 {dimension_numbers = #tpu.dot_dimension_numbers<[1], [0], [0], [1], [0, 0, 1, 1], [], []>} : vector<8x128xbf16>, vector<128x128xbf16>, vector<8x128xf32> -> vector<8x128xf32>
    %c0_368 = arith.constant 0 : index
    %c0_369 = arith.constant 0 : index
    %536 = vector.load %arg6[%c0_368, %c0_369] : memref<1x128xf32, #tpu.memory_space<vmem>>, vector<1x128xf32>
    %537 = vector.broadcast %536 : vector<1x128xf32> to vector<8x128xf32>
    %538 = arith.addf %535, %537 : vector<8x128xf32>
    %539 = arith.index_cast %508 : i32 to index
    %c0_370 = arith.constant 0 : index
    %540 = vector.load %arg7[%539, %c0_370] : memref<64x128xf32, #tpu.memory_space<vmem>>, vector<8x128xf32>
    tpu.vector_store %arg7[%539, %c0_370], %538 {strides = array<i32>} : memref<64x128xf32, #tpu.memory_space<vmem>>, vector<8x128xf32>,
    %c8_i32_371 = arith.constant 8 : i32
    return
  }
  func.func @transform_0(%arg0: i32) -> (i32, i32) {
    %c0_i32 = arith.constant 0 : i32
    %c0_i32_0 = arith.constant 0 : i32
    %c0_i32_1 = arith.constant 0 : i32
    return %c0_i32, %c0_i32_0 : i32, i32
  }
  func.func @transform_1(%arg0: i32) -> (i32, i32, i32) {
    %c0_i32 = arith.constant 0 : i32
    %c0_i32_0 = arith.constant 0 : i32
    %c0_i32_1 = arith.constant 0 : i32
    %c0_i32_2 = arith.constant 0 : i32
    return %c0_i32, %c0_i32_0, %c0_i32_1 : i32, i32, i32
  }
  func.func @transform_2(%arg0: i32) -> (i32, i32, i32) {
    %c0_i32 = arith.constant 0 : i32
    %c0_i32_0 = arith.constant 0 : i32
    %c0_i32_1 = arith.constant 0 : i32
    %c0_i32_2 = arith.constant 0 : i32
    return %c0_i32, %c0_i32_0, %c0_i32_1 : i32, i32, i32
  }
  func.func @transform_3(%arg0: i32) -> (i32, i32, i32) {
    %c0_i32 = arith.constant 0 : i32
    %c0_i32_0 = arith.constant 0 : i32
    %c0_i32_1 = arith.constant 0 : i32
    %c0_i32_2 = arith.constant 0 : i32
    return %c0_i32, %c0_i32_0, %c0_i32_1 : i32, i32, i32
  }
  func.func @transform_4(%arg0: i32) -> (i32, i32) {
    %c0_i32 = arith.constant 0 : i32
    %c0_i32_0 = arith.constant 0 : i32
    %c0_i32_1 = arith.constant 0 : i32
    return %c0_i32, %c0_i32_0 : i32, i32
  }
  func.func @transform_5(%arg0: i32) -> (i32, i32) {
    %c0_i32 = arith.constant 0 : i32
    %c0_i32_0 = arith.constant 0 : i32
    %c0_i32_1 = arith.constant 0 : i32
    return %c0_i32, %c0_i32_0 : i32, i32
  }
  func.func @transform_6(%arg0: i32) -> (i32, i32) {
    %c0_i32 = arith.constant 0 : i32
    %c0_i32_0 = arith.constant 0 : i32
    %c0_i32_1 = arith.constant 0 : i32
    return %c0_i32, %c0_i32_0 : i32, i32
  }
}

</mosaic_0001>

<bundles_post_ra>
// kernel: tpu_custom_call.1
= control target key start
LH: loop header
LB: loop body
LE: loop exit
PB: predicated region body
PF: predicated region fallthrough
CT: control target
= control target key end

     0   :  { %11 = vsyncpa [#allocation7], 0  ;;  %s5382_s0 = inlined_call_operand.hbm [shape: f32[64,128], index: 0, kind: input, shape index: {}]   ;;  %s5383_s1 = inlined_call_operand.hbm [shape: bf16[2,128,128], index: 1, kind: input, shape index: {}]   ;;  %s5384_s2 = inlined_call_operand.hbm [shape: bf16[2,128,128], index: 2, kind: input, shape index: {}]   ;;  %s5385_s3 = inlined_call_operand.vmem [shape: f32[2,1,128], index: 3, kind: input, shape index: {}]   ;;  %s5386_s4 = inlined_call_operand.hbm [shape: bf16[128,128], index: 4, kind: input, shape index: {}]   ;;  %s5387_s5 = inlined_call_operand.vmem [shape: f32[1,128], index: 5, kind: input, shape index: {}]   ;;  %s5388_s6 = inlined_call_operand.hbm [shape: f32[64,128], index: 6, kind: output, shape index: {}]  }
   0x1   :  { %12 = vsyncpa [#allocation10], 0 }
   0x2   :  { %13 = vsyncpa [#allocation13], 0 }
   0x3   :  { %14 = vsyncpa [#allocation8], 0  ;;  %s4777_s21 = smov [#allocation9]  }
   0x4   :  { %s32_s22 = sshll.u32 %s4777_s21, 4  ;;  %s33_s22 = int_to_ptr.vmem [resolvable:$true] %s32_s22 }
   0x5   :  { %s4677_s23 = scalar_lea.vmem %s33_s22, 2048  ;;  %p4682_p1 = scmp.lt.s32.totalorder %s33_s22, %s33_s22 }
   0x6   :  { %p4678_p0 = scmp.ne.s32.totalorder %s33_s22, %s4677_s23  ;;  %p4683_p2 = scmp.lt.s32.totalorder %s4677_s23, %s4677_s23 }
   0x8   :  { %p4684_p3 = por %p4683_p2, %p4682_p1 }
   0xa   :  { %p4685_p4 = pnand %p4684_p3, %p4678_p0 }
   0xc   :  { %4688 = shalt.err (!%p4685_p4)
}
   0xd   :  { %s4778_s24 = smov 64   ;;  %s4779_s25 = smov 4  }
   0xe   :  { %38 = dma.hbm_to_vmem [thread:$0]  %s5383_s1, 2048, %s33_s22, [#allocation10], %s4778_s24, %s4778_s24, %s4779_s25  }
   0xf   :  { %s4780_s28 = smov [#allocation6]  }
  0x10   :  { %s20_s29 = sshll.u32 %s4780_s28, 4  ;;  %s21_s29 = int_to_ptr.vmem [resolvable:$true] %s20_s29 }
  0x11   :  { %s4697_s30 = scalar_lea.vmem %s21_s29, 1024  ;;  %p4702_p6 = scmp.lt.s32.totalorder %s21_s29, %s21_s29 }
  0x12   :  { %p4698_p5 = scmp.ne.s32.totalorder %s21_s29, %s4697_s30  ;;  %p4703_p7 = scmp.lt.s32.totalorder %s4697_s30, %s4697_s30 }
  0x14   :  { %p4704_p8 = por %p4703_p7, %p4702_p6 }
  0x16   :  { %p4705_p9 = pnand %p4704_p8, %p4698_p5 }
  0x18   :  { %4708 = shalt.err (!%p4705_p9)
}
  0x19   :  { %s4781_s7 = smov 128   ;;  %s4782_s8 = smov 8  }
  0x1a   :  { %26 = dma.hbm_to_vmem [thread:$0]  %s5382_s0, 1024, %s21_s29, [#allocation7], %s4781_s7, %s4781_s7, %s4782_s8  }
  0x1b   :  { %s4783_s1 = smov [#allocation11]   ;;  %s4784_s12 = smov [#allocation12]  }
  0x1c   :  { %s44_s11 = sshll.u32 %s4783_s1, 4  ;;  %s58_s13 = sshll.u32 %s4784_s12, 4  ;;  %s45_s11 = int_to_ptr.vmem [resolvable:$true] %s44_s11  ;;  %s59_s13 = int_to_ptr.vmem [resolvable:$true] %s58_s13 }
  0x1d   :  { %s4717_s14 = scalar_lea.vmem %s45_s11, 2048  ;;  %p4722_p11 = scmp.lt.s32.totalorder %s45_s11, %s45_s11 }
  0x1e   :  { %p4718_p10 = scmp.ne.s32.totalorder %s45_s11, %s4717_s14  ;;  %p4723_p12 = scmp.lt.s32.totalorder %s4717_s14, %s4717_s14 }
  0x20   :  { %p4724_p13 = por %p4723_p12, %p4722_p11 }
  0x22   :  { %p4725_p0 = pnand %p4724_p13, %p4718_p10 }
  0x24   :  { %4728 = shalt.err (!%p4725_p0)
}
  0x25   :  { %50 = dma.hbm_to_vmem [thread:$0]  %s5384_s2, 2048, %s45_s11, [#allocation10], %s4778_s24, %s4778_s24, %s4779_s25  }
  0x26   :  { %s4737_s0 = scalar_lea.vmem %s59_s13, 1024  ;;  %p4742_p2 = scmp.lt.s32.totalorder %s59_s13, %s59_s13 }
  0x27   :  { %p4738_p1 = scmp.ne.s32.totalorder %s59_s13, %s4737_s0  ;;  %p4743_p3 = scmp.lt.s32.totalorder %s4737_s0, %s4737_s0 }
  0x29   :  { %p4744_p4 = por %p4743_p3, %p4742_p2 }
  0x2b   :  { %p4745_p5 = pnand %p4744_p4, %p4738_p1 }
  0x2d   :  { %4748 = shalt.err (!%p4745_p5)
}
  0x2e   :  { %64 = dma.hbm_to_vmem [thread:$0]  %s5386_s4, 1024, %s59_s13, [#allocation13], %s4778_s24, %s4778_s24, %s4779_s25  }
  0x2f   :  { %4769 = dma.done.wait [#allocation7], 1024  }
  0x30   :  { %4770 = vsyncadd [#allocation7], 4294966272 }
  0x31   :  { %4771 = dma.done.wait [#allocation10], 4096  }
  0x32   :  { %4772 = vsyncadd [#allocation10], 4294963200 }
  0x33   :  { %4773 = dma.done.wait [#allocation13], 1024  }
  0x34   :  { %4774 = vsyncadd [#allocation13], 4294966272  ;;  %v4785_v0 = vmov 0.0   ;;  %vm4786_vm0 = vmmov 0   ;;  %v4396_v1 = vld [vmem:[#allocation9 + $0x38] sm:$0xff]   ;;  %v4398_v3 = vld [vmem:[#allocation9 + $0x30] sm:$0xff]   ;;  %v80_v25 = vlaneseq }
  0x35   :  { %3877 = vmatprep.subr.bf16.mxu1 %v4785_v0  ;;  %3893 = vmatprep.mubr.msk.bf16.mxu1 %vm4786_vm0, %v4785_v0  ;;  %v4397_v2 = vld [vmem:[#allocation11 + $0x38] sm:$0xff]   ;;  %v4399_v4 = vld [vmem:[#allocation11 + $0x30] sm:$0xff]   ;;  %v4400_v5 = vld [vmem:[#allocation9 + $0x28] sm:$0xff]   ;;  %v4787_v23 = vmov 0.0|0.0   ;;  %v4788_v34 = vmov 0.5   ;;  %s4789_s19 = smov 32  }
  0x36   :  { %3853 = vmatprep.subr.bf16.mxu0 %v4396_v1  ;;  %3878 = vmatpush3.bf16.msra.mxu1 %v4397_v2  ;;  %v4401_v6 = vld [vmem:[#allocation11 + $0x28] sm:$0xff]   ;;  %v4402_v7 = vld [vmem:[#allocation9 + $0x20] sm:$0xff]   ;;  %v4404_v9 = vld [vmem:[#allocation9 + $0x18] sm:$0xff]   ;;  %v81_v26 = vand.u32 127, %v80_v25  ;;  %s4790_s20 = smov 96  }
  0x37   :  { %3854 = vmatpush3.bf16.msra.mxu0 %v4396_v1  ;;  %3879 = vmatprep.subr.bf16.mxu1 %v4785_v0  ;;  %v4403_v8 = vld [vmem:[#allocation11 + $0x20] sm:$0xff]   ;;  %v4405_v10 = vld [vmem:[#allocation11 + $0x18] sm:$0xff]   ;;  %v4406_v11 = vld [vmem:[#allocation9 + $0x10] sm:$0xff]  }
  0x38   :  { %3855 = vmatprep.subr.bf16.mxu0 %v4398_v3  ;;  %v90_v12 = vld [vmem:[#allocation6] sm:$0xff]  ;;  %v91_v13 = vld [vmem:[#allocation6 + $0x8] sm:$0xff]  ;;  %v4407_v14 = vld [vmem:[#allocation11 + $0x10] sm:$0xff]   ;;  %vm82_vm1 = vcmp.ge.s32.totalorder %v81_v26, 64  ;;  %vm83_vm2 = vcmp.lt.s32.totalorder %v81_v26, 96  ;;  %vm87_vm4 = vcmp.lt.s32.totalorder %v81_v26, 32 }
  0x39   :  { %v114_v15 = vpack.c.bf16 %v91_v13, %v90_v12  ;;  %v4408_v16 = vld [vmem:[#allocation9 + $0x8] sm:$0xff]   ;;  %v4410_v18 = vld [vmem:[#allocation9] sm:$0xff]   ;;  %v92_v20 = vld [vmem:[#allocation6 + $0x10] sm:$0xff]  ;;  %v4903_v61 = vsel %vm87_vm4, 1.0, %v4785_v0 }
  0x3a   :  { %3880 = vmatpush3.bf16.msra.mxu1 %v4399_v4  ;;  %v4409_v17 = vld [vmem:[#allocation11 + $0x8] sm:$0xff]   ;;  %v4411_v19 = vld [vmem:[#allocation11] sm:$0xff]   ;;  %v93_v21 = vld [vmem:[#allocation6 + $0x18] sm:$0xff] }
  0x3b   :  { %3856 = vmatpush3.bf16.msra.mxu0 %v4398_v3  ;;  %3881 = vmatprep.subr.bf16.mxu1 %v4785_v0  ;;  %v115_v22 = vpack.c.bf16 %v93_v21, %v92_v20  ;;  %v4412_v24 = vld [vmem:[#allocation11 + $0x38] sm:$0xff]   ;;  %vm4869_vm3 = vmand %vm82_vm1, %vm83_vm2  ;;  %v4876_v30 = vld [vmem:[%s5385_s3] ss:$0 sm:$0xff] }
  0x3c   :  { %3857 = vmatprep.subr.bf16.mxu0 %v4400_v5  ;;  %3869 = vmatprep.mubr.bf16.mxu0 %v114_v15  ;;  %v4881_v35 = vsel %vm4869_vm3, 1.0, %v4788_v34  ;;  %v4413_v40 = vld [vmem:[#allocation11 + $0x30] sm:$0xff]   ;;  %v4414_v41 = vld [vmem:[#allocation11 + $0x28] sm:$0xff]   ;;  %v4888_v43 = vsel %vm4869_vm3, 0.0, %v4788_v34  ;;  %v4415_v44 = vld [vmem:[#allocation11 + $0x20] sm:$0xff]  }
  0x3d   :  { %v94_v46 = vld [vmem:[#allocation6 + $0x20] sm:$0xff]  ;;  %v95_v47 = vld [vmem:[#allocation6 + $0x28] sm:$0xff]  ;;  %v4416_v48 = vld [vmem:[#allocation11 + $0x18] sm:$0xff]  }
  0x3e   :  { %3882 = vmatpush3.bf16.msra.mxu1 %v4401_v6  ;;  %v116_v50 = vpack.c.bf16 %v95_v47, %v94_v46  ;;  %v96_v51 = vld [vmem:[#allocation6 + $0x30] sm:$0xff]  ;;  %v97_v52 = vld [vmem:[#allocation6 + $0x38] sm:$0xff]  ;;  %v4418_v55 = vld [vmem:[#allocation11 + $0x8] sm:$0xff]  }
  0x3f   :  { %3858 = vmatpush3.bf16.msra.mxu0 %v4400_v5  ;;  %3883 = vmatprep.subr.bf16.mxu1 %v4785_v0  ;;  %v117_v53 = vpack.c.bf16 %v97_v52, %v96_v51  ;;  %v4417_v54 = vld [vmem:[#allocation11 + $0x10] sm:$0xff]   ;;  %v4419_v56 = vld [vmem:[#allocation11] sm:$0xff]   ;;  %v4420_v5 = vld [vmem:[#allocation11 + $0x38] sm:$0xff]  }
  0x40   :  { %3859 = vmatprep.subr.bf16.mxu0 %v4402_v7  ;;  %v4421_v6 = vld [vmem:[#allocation11 + $0x30] sm:$0xff]   ;;  %v4422_v20 = vld [vmem:[#allocation11 + $0x28] sm:$0xff]   ;;  %v4423_v21 = vld [vmem:[#allocation11 + $0x20] sm:$0xff]  }
  0x41   :  { %v4426_v29 = vld [vmem:[#allocation11 + $0x8] sm:$0xff]  }
  0x42   :  { %3884 = vmatpush3.bf16.msra.mxu1 %v4403_v8 }
  0x43   :  { %3860 = vmatpush3.bf16.msra.mxu0 %v4402_v7  ;;  %3885 = vmatprep.subr.bf16.mxu1 %v4785_v0 }
  0x44   :  { %3861 = vmatprep.subr.bf16.mxu0 %v4404_v9 }
  0x46   :  { %3886 = vmatpush3.bf16.msra.mxu1 %v4405_v10 }
  0x47   :  { %3862 = vmatpush3.bf16.msra.mxu0 %v4404_v9  ;;  %3887 = vmatprep.subr.bf16.mxu1 %v4785_v0 }
  0x48   :  { %3863 = vmatprep.subr.bf16.mxu0 %v4406_v11 }
  0x4a   :  { %3888 = vmatpush3.bf16.msra.mxu1 %v4407_v14 }
  0x4b   :  { %3864 = vmatpush3.bf16.msra.mxu0 %v4406_v11  ;;  %3889 = vmatprep.subr.bf16.mxu1 %v4785_v0 }
  0x4c   :  { %3865 = vmatprep.subr.bf16.mxu0 %v4408_v16 }
  0x4e   :  { %3890 = vmatpush3.bf16.msra.mxu1 %v4409_v17 }
  0x4f   :  { %3866 = vmatpush3.bf16.msra.mxu0 %v4408_v16  ;;  %3891 = vmatprep.subr.bf16.mxu1 %v4785_v0 }
  0x50   :  { %3867 = vmatprep.subr.bf16.mxu0 %v4410_v18 }
  0x52   :  { %3892 = vmatpush3.bf16.msra.mxu1 %v4411_v19 }
  0x53   :  { %3868 = vmatpush3.bf16.msra.mxu0 %v4410_v18  ;;  %3917 = vmatprep.subr.bf16.mxu1 %v4785_v0 }
  0x54   :  { %3897 = vmatprep.subr.bf16.mxu0 %v4785_v0 }
  0x55   :  { %3894 = vmatmul.mubr.bf16.vlgmr.msra.gmra.mxu1 %v4787_v23 }
  0x56   :  { %3870 = vmatmul.mubr.bf16.vlgmr.msra.gmra.mxu0 %v115_v22  ;;  %3933 = vmatprep.mubr.msk.bf16.mxu1 %vm4786_vm0, %v4785_v0 }
  0x57   :  { %3898 = vmatpush3.bf16.msra.mxu0 %v4412_v24  ;;  %3873 = vmatprep.mubr.bf16.mxu0 %v116_v50  ;;  %v4424_v24 = vld [vmem:[#allocation11 + $0x18] sm:$0xff]  }
  0x58   :  { %3899 = vmatprep.subr.bf16.mxu0 %v4785_v0  ;;  %3918 = vmatpush3.bf16.msra.mxu1 %v4420_v5 }
  0x59   :  { %3919 = vmatprep.subr.bf16.mxu1 %v4785_v0 }
  0x5b   :  { %3900 = vmatpush3.bf16.msra.mxu0 %v4413_v40 }
  0x5c   :  { %3901 = vmatprep.subr.bf16.mxu0 %v4785_v0  ;;  %3920 = vmatpush3.bf16.msra.mxu1 %v4421_v6 }
  0x5d   :  { %3921 = vmatprep.subr.bf16.mxu1 %v4785_v0 }
  0x5e   :  { %3874 = vmatmul.mubr.bf16.gmra.mxu0 %v117_v53  ;;  %v4430_v53 = vld [vmem:[#allocation11 + $0x28] sm:$0xff]  }
  0x5f   :  { %3902 = vmatpush3.bf16.msra.mxu0 %v4414_v41  ;;  %3913 = vmatprep.mubr.msk.bf16.mxu0 %vm4786_vm0, %v4785_v0 }
  0x60   :  { %3903 = vmatprep.subr.bf16.mxu0 %v4785_v0  ;;  %3922 = vmatpush3.bf16.msra.mxu1 %v4422_v20 }
  0x61   :  { %3923 = vmatprep.subr.bf16.mxu1 %v4785_v0 }
  0x63   :  { %3904 = vmatpush3.bf16.msra.mxu0 %v4415_v44  ;;  %v4428_v44 = vld [vmem:[#allocation11 + $0x38] sm:$0xff]  }
  0x64   :  { %3905 = vmatprep.subr.bf16.mxu0 %v4785_v0  ;;  %3924 = vmatpush3.bf16.msra.mxu1 %v4423_v21 }
  0x65   :  { %3925 = vmatprep.subr.bf16.mxu1 %v4785_v0 }
  0x67   :  { %3906 = vmatpush3.bf16.msra.mxu0 %v4416_v48 }
  0x68   :  { %3907 = vmatprep.subr.bf16.mxu0 %v4785_v0  ;;  %3926 = vmatpush3.bf16.msra.mxu1 %v4424_v24 }
  0x69   :  { %3927 = vmatprep.subr.bf16.mxu1 %v4785_v0 }
  0x6b   :  { %3908 = vmatpush3.bf16.msra.mxu0 %v4417_v54  ;;  %v4431_v54 = vld [vmem:[#allocation11 + $0x20] sm:$0xff]  }
  0x6c   :  { %3909 = vmatprep.subr.bf16.mxu0 %v4785_v0 }
  0x6f   :  { %3910 = vmatpush3.bf16.msra.mxu0 %v4418_v55 }
  0x70   :  { %3911 = vmatprep.subr.bf16.mxu0 %v4785_v0 }
  0x73   :  { %3912 = vmatpush3.bf16.msra.mxu0 %v4419_v56  ;;  %v4432_v56 = vld [vmem:[#allocation11 + $0x18] sm:$0xff]  }
  0x74   :  { %3937 = vmatprep.subr.bf16.mxu0 %v4785_v0 }
 0x115   :  { %v349_v27 = vpop.f32.mrf.mxu1 }
 0x116   :  { %v4867_v28 = vpop.f32.mrf.mxu0 }
 0x117   :  { %v3895_v31 = vpop.f32.mrf.mxu1  ;;  %v216_v46 = vadd.f32 %v4867_v28, %v4876_v30 }
 0x118   :  { %v207_v32 = vpop.f32.mrf.mxu0  ;;  %v4427_v31 = vld [vmem:[#allocation11] sm:$0xff]  }
 0x119   :  { %v208_v33 = vadd.f32 %v4876_v30, %v207_v32  ;;  %v352_v36 = vpop.f32.mrf.mxu1 }
 0x11a   :  { %v4914_v7 = vpop.f32.mrf.mxu0 }
 0x11b   :  { %v355_v37 = vadd.f32 %v349_v27, %v208_v33  ;;  %v3896_v38 = vpop.f32.mrf.mxu1  ;;  %v4425_v27 = vld [vmem:[#allocation11 + $0x10] sm:$0xff]  }
 0x11c   :  { %v210_v8 = vpop.f32.mrf.mxu0  ;;  %3928 = vmatpush3.bf16.msra.mxu1 %v4425_v27 }
 0x11d   :  { %v356_v39 = vmul.f32 %v355_v37, %v4881_v35  ;;  %v211_v13 = vadd.f32 %v4876_v30, %v210_v8  ;;  %3929 = vmatprep.subr.bf16.mxu1 %v4785_v0 }
 0x11e   :  { %v4916_v9 = vpop.f32.mrf.mxu0 }
 0x11f   :  { %4604 = vtanh.f32 %v356_v39 }
 0x120   :  { %v4918_v10 = vpop.f32.mrf.mxu0  ;;  %3930 = vmatpush3.bf16.msra.mxu1 %v4426_v29  ;;  %v4440_v29 = vld [vmem:[#allocation11 + $0x18] sm:$0xff]  }
 0x121   :  { %3931 = vmatprep.subr.bf16.mxu1 %v4785_v0 }
 0x122   :  { %v4920_v11 = vpop.f32.mrf.mxu0 }
 0x124   :  { %v4922_v12 = vpop.f32.mrf.mxu0  ;;  %3932 = vmatpush3.bf16.msra.mxu1 %v4427_v31 }
 0x125   :  { %3957 = vmatprep.subr.bf16.mxu1 %v4785_v0 }
 0x12c   :  { %v4605_v42 = vpop.eup %4604 }
 0x12d   :  { %v358_v45 = vmul.f32 %v4605_v42, %v4881_v35 }
 0x12f   :  { %v359_v49 = vadd.f32 %v358_v45, %v4888_v43  ;;  %v4429_v45 = vld [vmem:[#allocation11 + $0x30] sm:$0xff]  }
 0x131   :  { %364 = vrot.lane.b32.xlu1 %v359_v49, %s4789_s19  ;;  %360 = vrot.lane.b32.xlu0 %v359_v49, %s4790_s20 }
 0x135   :  { %362 = vrot.lane.b32.xlu0 %v359_v49, %s4778_s24 }
 0x1a3   :  { %v361_v57 = vpop.permute.xlu0 %360  ;;  %v365_v2 = vpop.permute.xlu1 %364 }
 0x1a4   :  { %v367_v59 = vmul.f32 0.0, %v361_v57 }
 0x1a7   :  { %v363_v58 = vpop.permute.xlu0 %362 }
 0x1a8   :  { %v368_v60 = vmul.f32 %v363_v58, %v359_v49  ;;  %v4433_v58 = vld [vmem:[#allocation11 + $0x10] sm:$0xff]  }
 0x1aa   :  { %v369_v62 = vadd.f32 %v368_v60, %v367_v59  ;;  %v4434_v59 = vld [vmem:[#allocation11 + $0x8] sm:$0xff]   ;;  %v4435_v60 = vld [vmem:[#allocation11] sm:$0xff]  }
 0x1ac   :  { %v370_v63 = vmul.f32 %v4903_v61, %v369_v62 }
 0x1ae   :  { %4606 = vtanh.f32 %v370_v63 }
 0x1bb   :  { %v4607_v1 = vpop.eup %4606 }
 0x1bc   :  { %v4906_v3 = vmul.f32 %v4607_v1, %v365_v2 }
 0x1be   :  { %v379_v4 = vpack.c.bf16 %v4906_v3, %v4906_v3 }
 0x1c0   :  { %3914 = vmatmul.mubr.bf16.vlgmr.msra.gmra.mxu0 %v379_v4 }
 0x1c1   :  { %3953 = vmatprep.mubr.msk.bf16.mxu0 %vm4786_vm0, %v4785_v0  ;;  %3938 = vmatpush3.bf16.msra.mxu0 %v4428_v44 }
 0x1c2   :  { %3939 = vmatprep.subr.bf16.mxu0 %v4785_v0 }
 0x1c5   :  { %3940 = vmatpush3.bf16.msra.mxu0 %v4429_v45 }
 0x1c6   :  { %3941 = vmatprep.subr.bf16.mxu0 %v4785_v0 }
 0x1c9   :  { %3942 = vmatpush3.bf16.msra.mxu0 %v4430_v53 }
 0x1ca   :  { %3943 = vmatprep.subr.bf16.mxu0 %v4785_v0 }
 0x1cd   :  { %3944 = vmatpush3.bf16.msra.mxu0 %v4431_v54 }
 0x1ce   :  { %3945 = vmatprep.subr.bf16.mxu0 %v4785_v0 }
 0x1d1   :  { %3946 = vmatpush3.bf16.msra.mxu0 %v4432_v56 }
 0x1d2   :  { %3947 = vmatprep.subr.bf16.mxu0 %v4785_v0 }
 0x1d5   :  { %3948 = vmatpush3.bf16.msra.mxu0 %v4433_v58 }
 0x1d6   :  { %3949 = vmatprep.subr.bf16.mxu0 %v4785_v0 }
 0x1d9   :  { %3950 = vmatpush3.bf16.msra.mxu0 %v4434_v59  ;;  %v4448_v59 = vld [vmem:[#allocation11 + $0x18] sm:$0xff]  }
 0x1da   :  { %3951 = vmatprep.subr.bf16.mxu0 %v4785_v0 }
 0x1dd   :  { %3952 = vmatpush3.bf16.msra.mxu0 %v4435_v60 }
 0x1de   :  { %3977 = vmatprep.subr.bf16.mxu0 %v4785_v0 }
 0x280   :  { %v478_v14 = vpop.f32.mrf.mxu0 }
 0x281   :  { %v484_v15 = vadd.f32 %v478_v14, %v211_v13 }
 0x282   :  { %v3915_v16 = vpop.f32.mrf.mxu0 }
 0x283   :  { %v485_v17 = vmul.f32 %v484_v15, %v4881_v35  ;;  %v4436_v15 = vld [vmem:[#allocation11 + $0x38] sm:$0xff]   ;;  %v4437_v16 = vld [vmem:[#allocation11 + $0x30] sm:$0xff]  }
 0x284   :  { %v481_v18 = vpop.f32.mrf.mxu0 }
 0x285   :  { %4608 = vtanh.f32 %v485_v17  ;;  %v219_v17 = vadd.f32 %v4914_v7, %v4876_v30 }
 0x286   :  { %v3916_v19 = vpop.f32.mrf.mxu0 }
 0x292   :  { %v4609_v22 = vpop.eup %4608 }
 0x293   :  { %v487_v25 = vmul.f32 %v4609_v22, %v4881_v35 }
 0x295   :  { %v488_v26 = vadd.f32 %v487_v25, %v4888_v43  ;;  %v4438_v25 = vld [vmem:[#allocation11 + $0x28] sm:$0xff]  }
 0x297   :  { %491 = vrot.lane.b32.xlu0 %v488_v26, %s4778_s24  ;;  %489 = vrot.lane.b32.xlu1 %v488_v26, %s4790_s20 }
 0x29b   :  { %493 = vrot.lane.b32.xlu1 %v488_v26, %s4789_s19 }
 0x309   :  { %v492_v32 = vpop.permute.xlu0 %491  ;;  %v490_v33 = vpop.permute.xlu1 %489 }
 0x30a   :  { %v497_v34 = vmul.f32 %v492_v32, %v488_v26  ;;  %v496_v36 = vmul.f32 %v490_v33, %v370_v63  ;;  %v4439_v26 = vld [vmem:[#allocation11 + $0x20] sm:$0xff]   ;;  %v4441_v32 = vld [vmem:[#allocation11 + $0x10] sm:$0xff]   ;;  %v4442_v33 = vld [vmem:[#allocation11 + $0x8] sm:$0xff]  }
 0x30c   :  { %v498_v37 = vadd.f32 %v497_v34, %v496_v36  ;;  %v4443_v34 = vld [vmem:[#allocation11] sm:$0xff]  }
 0x30d   :  { %v494_v40 = vpop.permute.xlu1 %493 }
 0x30e   :  { %v499_v38 = vmul.f32 %v4903_v61, %v498_v37 }
 0x310   :  { %4610 = vtanh.f32 %v499_v38 }
 0x31d   :  { %v4611_v39 = vpop.eup %4610 }
 0x31e   :  { %v4938_v41 = vmul.f32 %v4611_v39, %v494_v40 }
 0x320   :  { %v509_v42 = vpack.c.bf16 %v4938_v41, %v4938_v41 }
 0x322   :  { %3934 = vmatmul.mubr.bf16.vlgmr.msra.gmra.mxu1 %v509_v42 }
 0x323   :  { %3973 = vmatprep.mubr.msk.bf16.mxu1 %vm4786_vm0, %v4785_v0  ;;  %3958 = vmatpush3.bf16.msra.mxu1 %v4436_v15 }
 0x324   :  { %3959 = vmatprep.subr.bf16.mxu1 %v4785_v0 }
 0x327   :  { %3960 = vmatpush3.bf16.msra.mxu1 %v4437_v16 }
 0x328   :  { %3961 = vmatprep.subr.bf16.mxu1 %v4785_v0 }
 0x32b   :  { %3962 = vmatpush3.bf16.msra.mxu1 %v4438_v25 }
 0x32c   :  { %3963 = vmatprep.subr.bf16.mxu1 %v4785_v0 }
 0x32f   :  { %3964 = vmatpush3.bf16.msra.mxu1 %v4439_v26 }
 0x330   :  { %3965 = vmatprep.subr.bf16.mxu1 %v4785_v0 }
 0x333   :  { %3966 = vmatpush3.bf16.msra.mxu1 %v4440_v29 }
 0x334   :  { %3967 = vmatprep.subr.bf16.mxu1 %v4785_v0 }
 0x337   :  { %3968 = vmatpush3.bf16.msra.mxu1 %v4441_v32  ;;  %v4456_v32 = vld [vmem:[#allocation11 + $0x18] sm:$0xff]  }
 0x338   :  { %3969 = vmatprep.subr.bf16.mxu1 %v4785_v0 }
 0x33b   :  { %3970 = vmatpush3.bf16.msra.mxu1 %v4442_v33 }
 0x33c   :  { %3971 = vmatprep.subr.bf16.mxu1 %v4785_v0 }
 0x33f   :  { %3972 = vmatpush3.bf16.msra.mxu1 %v4443_v34 }
 0x340   :  { %3997 = vmatprep.subr.bf16.mxu1 %v4785_v0 }
 0x3e2   :  { %v608_v47 = vpop.f32.mrf.mxu1 }
 0x3e3   :  { %v614_v48 = vadd.f32 %v608_v47, %v216_v46 }
 0x3e4   :  { %v3935_v49 = vpop.f32.mrf.mxu1 }
 0x3e5   :  { %v615_v50 = vmul.f32 %v614_v48, %v4881_v35  ;;  %v4444_v48 = vld [vmem:[#allocation11 + $0x38] sm:$0xff]   ;;  %v4445_v49 = vld [vmem:[#allocation11 + $0x30] sm:$0xff]  }
 0x3e6   :  { %v611_v51 = vpop.f32.mrf.mxu1 }
 0x3e7   :  { %4612 = vtanh.f32 %v615_v50  ;;  %v224_v50 = vadd.f32 %v4876_v30, %v4918_v10 }
 0x3e8   :  { %v3936_v52 = vpop.f32.mrf.mxu1 }
 0x3f4   :  { %v4613_v55 = vpop.eup %4612 }
 0x3f5   :  { %v617_v28 = vmul.f32 %v4613_v55, %v4881_v35 }
 0x3f7   :  { %v618_v57 = vadd.f32 %v617_v28, %v4888_v43  ;;  %v4446_v28 = vld [vmem:[#allocation11 + $0x28] sm:$0xff]  }
 0x3f9   :  { %621 = vrot.lane.b32.xlu1 %v618_v57, %s4778_s24  ;;  %619 = vrot.lane.b32.xlu0 %v618_v57, %s4790_s20 }
 0x3fd   :  { %623 = vrot.lane.b32.xlu0 %v618_v57, %s4789_s19 }
 0x46b   :  { %v622_v62 = vpop.permute.xlu1 %621  ;;  %v620_v63 = vpop.permute.xlu0 %619 }
 0x46c   :  { %v627_v1 = vmul.f32 %v622_v62, %v618_v57  ;;  %v626_v2 = vmul.f32 %v620_v63, %v499_v38  ;;  %v4447_v57 = vld [vmem:[#allocation11 + $0x20] sm:$0xff]   ;;  %v4449_v62 = vld [vmem:[#allocation11 + $0x10] sm:$0xff]   ;;  %v4450_v63 = vld [vmem:[#allocation11 + $0x8] sm:$0xff]  }
 0x46e   :  { %v628_v4 = vadd.f32 %v627_v1, %v626_v2  ;;  %v4451_v1 = vld [vmem:[#allocation11] sm:$0xff]  }
 0x46f   :  { %v624_v8 = vpop.permute.xlu0 %623 }
 0x470   :  { %v629_v5 = vmul.f32 %v4903_v61, %v628_v4 }
 0x472   :  { %4614 = vtanh.f32 %v629_v5 }
 0x47f   :  { %v4615_v6 = vpop.eup %4614 }
 0x480   :  { %v4961_v13 = vmul.f32 %v4615_v6, %v624_v8 }
 0x482   :  { %v639_v14 = vpack.c.bf16 %v4961_v13, %v4961_v13 }
 0x484   :  { %3954 = vmatmul.mubr.bf16.vlgmr.msra.gmra.mxu0 %v639_v14 }
 0x485   :  { %3993 = vmatprep.mubr.msk.bf16.mxu0 %vm4786_vm0, %v4785_v0  ;;  %3978 = vmatpush3.bf16.msra.mxu0 %v4444_v48 }
 0x486   :  { %3979 = vmatprep.subr.bf16.mxu0 %v4785_v0 }
 0x489   :  { %3980 = vmatpush3.bf16.msra.mxu0 %v4445_v49 }
 0x48a   :  { %3981 = vmatprep.subr.bf16.mxu0 %v4785_v0 }
 0x48d   :  { %3982 = vmatpush3.bf16.msra.mxu0 %v4446_v28  ;;  %v4464_v28 = vld [vmem:[#allocation9 + $0x58] sm:$0xff]  }
 0x48e   :  { %3983 = vmatprep.subr.bf16.mxu0 %v4785_v0 }
 0x491   :  { %3984 = vmatpush3.bf16.msra.mxu0 %v4447_v57  ;;  %v4465_v57 = vld [vmem:[#allocation9 + $0x50] sm:$0xff]  }
 0x492   :  { %3985 = vmatprep.subr.bf16.mxu0 %v4785_v0 }
 0x495   :  { %3986 = vmatpush3.bf16.msra.mxu0 %v4448_v59 }
 0x496   :  { %3987 = vmatprep.subr.bf16.mxu0 %v4785_v0 }
 0x499   :  { %3988 = vmatpush3.bf16.msra.mxu0 %v4449_v62  ;;  %v232_v62 = vadd.f32 %v4916_v9, %v4876_v30 }
 0x49a   :  { %3989 = vmatprep.subr.bf16.mxu0 %v4785_v0 }
 0x49d   :  { %3990 = vmatpush3.bf16.msra.mxu0 %v4450_v63 }
 0x49e   :  { %3991 = vmatprep.subr.bf16.mxu0 %v4785_v0 }
 0x4a1   :  { %3992 = vmatpush3.bf16.msra.mxu0 %v4451_v1 }
 0x4a2   :  { %4017 = vmatprep.subr.bf16.mxu0 %v4785_v0 }
 0x544   :  { %v738_v18 = vpop.f32.mrf.mxu0 }
 0x545   :  { %v744_v19 = vadd.f32 %v738_v18, %v219_v17 }
 0x546   :  { %v3955_v20 = vpop.f32.mrf.mxu0 }
 0x547   :  { %v745_v21 = vmul.f32 %v744_v19, %v4881_v35  ;;  %v4452_v19 = vld [vmem:[#allocation11 + $0x38] sm:$0xff]   ;;  %v4453_v20 = vld [vmem:[#allocation11 + $0x30] sm:$0xff]  }
 0x548   :  { %v741_v22 = vpop.f32.mrf.mxu0 }
 0x549   :  { %4616 = vtanh.f32 %v745_v21  ;;  %v227_v21 = vadd.f32 %v4876_v30, %v4922_v12 }
 0x54a   :  { %v3956_v24 = vpop.f32.mrf.mxu0 }
 0x556   :  { %v4617_v27 = vpop.eup %4616 }
 0x557   :  { %v747_v7 = vmul.f32 %v4617_v27, %v4881_v35 }
 0x559   :  { %v748_v31 = vadd.f32 %v747_v7, %v4888_v43  ;;  %v4454_v7 = vld [vmem:[#allocation11 + $0x28] sm:$0xff]  }
 0x55b   :  { %751 = vrot.lane.b32.xlu0 %v748_v31, %s4778_s24  ;;  %749 = vrot.lane.b32.xlu1 %v748_v31, %s4790_s20 }
 0x55f   :  { %753 = vrot.lane.b32.xlu1 %v748_v31, %s4789_s19 }
 0x5cd   :  { %v752_v36 = vpop.permute.xlu0 %751  ;;  %v750_v37 = vpop.permute.xlu1 %749 }
 0x5ce   :  { %v757_v38 = vmul.f32 %v752_v36, %v748_v31  ;;  %v756_v39 = vmul.f32 %v750_v37, %v629_v5  ;;  %v4455_v31 = vld [vmem:[#allocation11 + $0x20] sm:$0xff]   ;;  %v4457_v36 = vld [vmem:[#allocation11 + $0x10] sm:$0xff]   ;;  %v4458_v37 = vld [vmem:[#allocation11 + $0x8] sm:$0xff]  }
 0x5d0   :  { %v758_v40 = vadd.f32 %v757_v38, %v756_v39  ;;  %v4459_v38 = vld [vmem:[#allocation11] sm:$0xff]   ;;  %v4460_v39 = vld [vmem:[#allocation9 + $0x78] sm:$0xff]  }
 0x5d1   :  { %v754_v45 = vpop.permute.xlu1 %753 }
 0x5d2   :  { %v759_v42 = vmul.f32 %v4903_v61, %v758_v40 }
 0x5d4   :  { %4618 = vtanh.f32 %v759_v42 }
 0x5e1   :  { %v4619_v44 = vpop.eup %4618 }
 0x5e2   :  { %v4984_v46 = vmul.f32 %v4619_v44, %v754_v45 }
 0x5e4   :  { %v769_v47 = vpack.c.bf16 %v4984_v46, %v4984_v46 }
 0x5e6   :  { %3974 = vmatmul.mubr.bf16.vlgmr.msra.gmra.mxu1 %v769_v47 }
 0x5e7   :  { %4013 = vmatprep.mubr.msk.bf16.mxu1 %vm4786_vm0, %v4785_v0  ;;  %3998 = vmatpush3.bf16.msra.mxu1 %v4452_v19 }
 0x5e8   :  { %3999 = vmatprep.subr.bf16.mxu1 %v4785_v0 }
 0x5eb   :  { %4000 = vmatpush3.bf16.msra.mxu1 %v4453_v20 }
 0x5ec   :  { %4001 = vmatprep.subr.bf16.mxu1 %v4785_v0 }
 0x5ef   :  { %4002 = vmatpush3.bf16.msra.mxu1 %v4454_v7  ;;  %v4476_v7 = vld [vmem:[#allocation11 + $0x78] sm:$0xff]  }
 0x5f0   :  { %4003 = vmatprep.subr.bf16.mxu1 %v4785_v0 }
 0x5f3   :  { %4004 = vmatpush3.bf16.msra.mxu1 %v4455_v31 }
 0x5f4   :  { %4005 = vmatprep.subr.bf16.mxu1 %v4785_v0 }
 0x5f7   :  { %4006 = vmatpush3.bf16.msra.mxu1 %v4456_v32  ;;  %v4477_v32 = vld [vmem:[#allocation11 + $0x70] sm:$0xff]  }
 0x5f8   :  { %4007 = vmatprep.subr.bf16.mxu1 %v4785_v0 }
 0x5fb   :  { %4008 = vmatpush3.bf16.msra.mxu1 %v4457_v36  ;;  %v4481_v36 = vld [vmem:[#allocation11 + $0x50] sm:$0xff]  }
 0x5fc   :  { %4009 = vmatprep.subr.bf16.mxu1 %v4785_v0 }
 0x5ff   :  { %4010 = vmatpush3.bf16.msra.mxu1 %v4458_v37  ;;  %v4482_v37 = vld [vmem:[#allocation11 + $0x48] sm:$0xff]  }
 0x600   :  { %4011 = vmatprep.subr.bf16.mxu1 %v4785_v0 }
 0x603   :  { %4012 = vmatpush3.bf16.msra.mxu1 %v4459_v38  ;;  %v4483_v38 = vld [vmem:[#allocation11 + $0x40] sm:$0xff]  }
 0x604   :  { %4037 = vmatprep.subr.bf16.mxu1 %v4460_v39 }
 0x6a6   :  { %v868_v51 = vpop.f32.mrf.mxu1 }
 0x6a7   :  { %v874_v52 = vadd.f32 %v868_v51, %v224_v50 }
 0x6a8   :  { %v3975_v53 = vpop.f32.mrf.mxu1 }
 0x6a9   :  { %v875_v54 = vmul.f32 %v874_v52, %v4881_v35  ;;  %v4461_v53 = vld [vmem:[#allocation9 + $0x70] sm:$0xff]  }
 0x6aa   :  { %v871_v55 = vpop.f32.mrf.mxu1 }
 0x6ab   :  { %4620 = vtanh.f32 %v875_v54  ;;  %v1311_v54 = vpack.c.bf16 %v4938_v41, %v4906_v3  ;;  %v4462_v55 = vld [vmem:[#allocation9 + $0x68] sm:$0xff]   ;;  %v4467_v3 = vld [vmem:[#allocation9 + $0x40] sm:$0xff]   ;;  %v1312_v41 = vpack.c.bf16 %v4984_v46, %v4961_v13 }
 0x6ac   :  { %v3976_v56 = vpop.f32.mrf.mxu1 }
 0x6ad   :  { %v4463_v56 = vld [vmem:[#allocation9 + $0x60] sm:$0xff]  }
 0x6b8   :  { %v4621_v58 = vpop.eup %4620 }
 0x6b9   :  { %v877_v10 = vmul.f32 %v4621_v58, %v4881_v35  ;;  %v4466_v58 = vld [vmem:[#allocation9 + $0x48] sm:$0xff]  }
 0x6bb   :  { %v878_v60 = vadd.f32 %v877_v10, %v4888_v43  ;;  %v4468_v10 = vld [vmem:[#allocation11 + $0x38] sm:$0xff]  }
 0x6bd   :  { %881 = vrot.lane.b32.xlu1 %v878_v60, %s4778_s24  ;;  %879 = vrot.lane.b32.xlu0 %v878_v60, %s4790_s20 }
 0x6c1   :  { %883 = vrot.lane.b32.xlu0 %v878_v60, %s4789_s19 }
 0x72f   :  { %v882_v2 = vpop.permute.xlu1 %881  ;;  %v880_v4 = vpop.permute.xlu0 %879 }
 0x730   :  { %v887_v5 = vmul.f32 %v882_v2, %v878_v60  ;;  %v886_v6 = vmul.f32 %v880_v4, %v759_v42  ;;  %v4469_v60 = vld [vmem:[#allocation11 + $0x30] sm:$0xff]  }
 0x732   :  { %v888_v8 = vadd.f32 %v887_v5, %v886_v6  ;;  %v4470_v5 = vld [vmem:[#allocation11 + $0x28] sm:$0xff]   ;;  %v4471_v6 = vld [vmem:[#allocation11 + $0x20] sm:$0xff]  }
 0x733   :  { %v884_v16 = vpop.permute.xlu0 %883 }
 0x734   :  { %v889_v14 = vmul.f32 %v4903_v61, %v888_v8  ;;  %v4472_v8 = vld [vmem:[#allocation11 + $0x18] sm:$0xff]  }
 0x736   :  { %4622 = vtanh.f32 %v889_v14 }
 0x743   :  { %v4623_v15 = vpop.eup %4622 }
 0x744   :  { %v5007_v17 = vmul.f32 %v4623_v15, %v884_v16  ;;  %v4473_v16 = vld [vmem:[#allocation11 + $0x10] sm:$0xff]  }
 0x746   :  { %v899_v18 = vpack.c.bf16 %v5007_v17, %v5007_v17 }
 0x748   :  { %3994 = vmatmul.mubr.bf16.vlgmr.msra.gmra.mxu0 %v899_v18  ;;  %v4475_v18 = vld [vmem:[#allocation11] sm:$0xff]  }
 0x749   :  { %4033 = vmatprep.mubr.msk.bf16.mxu0 %vm4786_vm0, %v4785_v0  ;;  %4018 = vmatpush3.bf16.msra.mxu0 %v4468_v10  ;;  %v4489_v10 = vld [vmem:[#allocation11 + $0x50] sm:$0xff]  }
 0x74a   :  { %4019 = vmatprep.subr.bf16.mxu0 %v4785_v0 }
 0x74d   :  { %4020 = vmatpush3.bf16.msra.mxu0 %v4469_v60  ;;  %v4490_v60 = vld [vmem:[#allocation11 + $0x48] sm:$0xff]  }
 0x74e   :  { %4021 = vmatprep.subr.bf16.mxu0 %v4785_v0 }
 0x751   :  { %4022 = vmatpush3.bf16.msra.mxu0 %v4470_v5 }
 0x752   :  { %4023 = vmatprep.subr.bf16.mxu0 %v4785_v0 }
 0x755   :  { %4024 = vmatpush3.bf16.msra.mxu0 %v4471_v6 }
 0x756   :  { %4025 = vmatprep.subr.bf16.mxu0 %v4785_v0 }
 0x759   :  { %4026 = vmatpush3.bf16.msra.mxu0 %v4472_v8 }
 0x75a   :  { %4027 = vmatprep.subr.bf16.mxu0 %v4785_v0 }
 0x75d   :  { %4028 = vmatpush3.bf16.msra.mxu0 %v4473_v16 }
 0x75e   :  { %4029 = vmatprep.subr.bf16.mxu0 %v4785_v0 }
 0x808   :  { %v998_v22 = vpop.f32.mrf.mxu0 }
 0x809   :  { %v1004_v24 = vadd.f32 %v998_v22, %v227_v21 }
 0x80a   :  { %v3995_v25 = vpop.f32.mrf.mxu0 }
 0x80b   :  { %v1005_v26 = vmul.f32 %v1004_v24, %v4881_v35 }
 0x80c   :  { %v1001_v27 = vpop.f32.mrf.mxu0 }
 0x80d   :  { %4624 = vtanh.f32 %v1005_v26 }
 0x80e   :  { %v3996_v29 = vpop.f32.mrf.mxu0 }
 0x81a   :  { %v4625_v33 = vpop.eup %4624 }
 0x81b   :  { %v1007_v12 = vmul.f32 %v4625_v33, %v4881_v35  ;;  %v4478_v33 = vld [vmem:[#allocation11 + $0x68] sm:$0xff]  }
 0x81d   :  { %v1008_v34 = vadd.f32 %v1007_v12, %v4888_v43  ;;  %v4479_v12 = vld [vmem:[#allocation11 + $0x60] sm:$0xff]  }
 0x81f   :  { %1011 = vrot.lane.b32.xlu0 %v1008_v34, %s4778_s24  ;;  %1009 = vrot.lane.b32.xlu1 %v1008_v34, %s4790_s20 }
 0x823   :  { %1013 = vrot.lane.b32.xlu1 %v1008_v34, %s4789_s19 }
 0x891   :  { %v1012_v40 = vpop.permute.xlu0 %1011  ;;  %v1010_v42 = vpop.permute.xlu1 %1009 }
 0x892   :  { %v1017_v44 = vmul.f32 %v1012_v40, %v1008_v34  ;;  %v1016_v45 = vmul.f32 %v1010_v42, %v889_v14  ;;  %v4480_v34 = vld [vmem:[#allocation11 + $0x58] sm:$0xff]   ;;  %v4485_v40 = vld [vmem:[#allocation11 + $0x70] sm:$0xff]   ;;  %v235_v42 = vadd.f32 %v4920_v11, %v4876_v30 }
 0x894   :  { %v1018_v47 = vadd.f32 %v1017_v44, %v1016_v45 }
 0x895   :  { %v1014_v50 = vpop.permute.xlu1 %1013 }
 0x896   :  { %v5029_v48 = vmul.f32 %v4903_v61, %v1018_v47 }
 0x898   :  { %4626 = vtanh.f32 %v5029_v48 }
 0x8a5   :  { %v4627_v49 = vpop.eup %4626 }
 0x8a6   :  { %v1021_v51 = vmul.f32 %v4627_v49, %v1014_v50 }
 0x8a8   :  { %v1029_v52 = vpack.c.bf16 %v1021_v51, %v1021_v51  ;;  %v1313_v59 = vpack.c.bf16 %v1021_v51, %v5007_v17  ;;  %v4474_v17 = vld [vmem:[#allocation11 + $0x8] sm:$0xff]   ;;  %v5087_v51 = vld [vmem:[%s5385_s3 + $0x1] ss:$0 sm:$0xff] }
 0x8a9   :  { %4030 = vmatpush3.bf16.msra.mxu0 %v4474_v17 }
 0x8aa   :  { %4014 = vmatmul.mubr.bf16.vlgmr.msra.gmra.mxu1 %v1029_v52  ;;  %4031 = vmatprep.subr.bf16.mxu0 %v4785_v0 }
 0x8ab   :  { %4038 = vmatpush3.bf16.msra.mxu1 %v4460_v39  ;;  %4053 = vmatprep.mubr.bf16.mxu1 %v1311_v54  ;;  %v4484_v39 = vld [vmem:[#allocation11 + $0x78] sm:$0xff]  }
 0x8ac   :  { %4039 = vmatprep.subr.bf16.mxu1 %v4461_v53 }
 0x8ad   :  { %4032 = vmatpush3.bf16.msra.mxu0 %v4475_v18 }
 0x8ae   :  { %4061 = vmatprep.subr.bf16.mxu0 %v4785_v0 }
 0x8af   :  { %4040 = vmatpush3.bf16.msra.mxu1 %v4461_v53 }
 0x8b0   :  { %4041 = vmatprep.subr.bf16.mxu1 %v4462_v55 }
 0x8b3   :  { %4042 = vmatpush3.bf16.msra.mxu1 %v4462_v55 }
 0x8b4   :  { %4043 = vmatprep.subr.bf16.mxu1 %v4463_v56 }
 0x8b7   :  { %4044 = vmatpush3.bf16.msra.mxu1 %v4463_v56 }
 0x8b8   :  { %4045 = vmatprep.subr.bf16.mxu1 %v4464_v28 }
 0x8bb   :  { %4046 = vmatpush3.bf16.msra.mxu1 %v4464_v28  ;;  %v4486_v28 = vld [vmem:[#allocation11 + $0x68] sm:$0xff]  }
 0x8bc   :  { %4047 = vmatprep.subr.bf16.mxu1 %v4465_v57 }
 0x8bf   :  { %4048 = vmatpush3.bf16.msra.mxu1 %v4465_v57  ;;  %v4487_v57 = vld [vmem:[#allocation11 + $0x60] sm:$0xff]  }
 0x8c0   :  { %4049 = vmatprep.subr.bf16.mxu1 %v4466_v58 }
 0x8c3   :  { %4050 = vmatpush3.bf16.msra.mxu1 %v4466_v58  ;;  %v4488_v58 = vld [vmem:[#allocation11 + $0x58] sm:$0xff]  }
 0x8c4   :  { %4051 = vmatprep.subr.bf16.mxu1 %v4467_v3 }
 0x8c7   :  { %4052 = vmatpush3.bf16.msra.mxu1 %v4467_v3 }
 0x8c8   :  { %4081 = vmatprep.subr.bf16.mxu1 %v4785_v0 }
 0x8ca   :  { %4054 = vmatmul.mubr.bf16.vlgmr.msra.gmra.mxu1 %v1312_v41 }
 0x8cb   :  { %4057 = vmatprep.mubr.bf16.mxu1 %v1313_v59 }
 0x96a   :  { %v1128_v63 = vpop.f32.mrf.mxu1 }
 0x96b   :  { %v1134_v1 = vadd.f32 %v1128_v63, %v232_v62  ;;  %v4491_v62 = vld [vmem:[#allocation11 + $0x40] sm:$0xff]  }
 0x96c   :  { %v4015_v13 = vpop.f32.mrf.mxu1 }
 0x96d   :  { %v1135_v46 = vmul.f32 %v1134_v1, %v4881_v35 }
 0x96e   :  { %v1131_v2 = vpop.f32.mrf.mxu1 }
 0x96f   :  { %4628 = vtanh.f32 %v1135_v46 }
 0x970   :  { %v4016_v4 = vpop.f32.mrf.mxu1 }
 0x97c   :  { %v4629_v14 = vpop.eup %4628 }
 0x97d   :  { %v1137_v9 = vmul.f32 %v4629_v14, %v4881_v35 }
 0x97f   :  { %v1138_v15 = vadd.f32 %v1137_v9, %v4888_v43  ;;  %v4492_v9 = vld [vmem:[#allocation11 + $0x78] sm:$0xff]  }
 0x981   :  { %1141 = vrot.lane.b32.xlu1 %v1138_v15, %s4778_s24  ;;  %1139 = vrot.lane.b32.xlu0 %v1138_v15, %s4790_s20 }
 0x985   :  { %1143 = vrot.lane.b32.xlu0 %v1138_v15, %s4789_s19 }
 0x98a   :  { %v5082_v49 = vpop.f32.mrf.mxu1 }
 0x98c   :  { %v1405_v50 = vpop.f32.mrf.mxu1 }
 0x98d   :  { %v1406_v52 = vadd.f32 %v5087_v51, %v1405_v50 }
 0x98e   :  { %v5110_v16 = vpop.f32.mrf.mxu1 }
 0x990   :  { %v1408_v17 = vpop.f32.mrf.mxu1 }
 0x991   :  { %v1409_v18 = vadd.f32 %v5087_v51, %v1408_v17 }
 0x9f3   :  { %v1142_v19 = vpop.permute.xlu1 %1141  ;;  %v1140_v20 = vpop.permute.xlu0 %1139 }
 0x9f4   :  { %v1147_v21 = vmul.f32 %v1142_v19, %v1138_v15  ;;  %v1146_v22 = vmul.f32 %v1140_v20, %v5029_v48  ;;  %v4493_v15 = vld [vmem:[#allocation11 + $0x70] sm:$0xff]  }
 0x9f6   :  { %v1148_v24 = vadd.f32 %v1147_v21, %v1146_v22 }
 0x9f7   :  { %v1144_v27 = vpop.permute.xlu0 %1143 }
 0x9f8   :  { %v5056_v25 = vmul.f32 %v4903_v61, %v1148_v24 }
 0x9fa   :  { %4630 = vtanh.f32 %v5056_v25 }
 0xa07   :  { %v4631_v26 = vpop.eup %4630 }
 0xa08   :  { %v5059_v29 = vmul.f32 %v4631_v26, %v1144_v27  ;;  %v4494_v27 = vld [vmem:[#allocation11 + $0x68] sm:$0xff]  }
 0xa0a   :  { %v1159_v31 = vpack.c.bf16 %v5059_v29, %v5059_v29 }
 0xa0c   :  { %4034 = vmatmul.mubr.bf16.vlgmr.msra.gmra.mxu0 %v1159_v31  ;;  %v4496_v31 = vld [vmem:[#allocation11 + $0x58] sm:$0xff]  }
 0xa0d   :  { %4062 = vmatpush3.bf16.msra.mxu0 %v4476_v7  ;;  %4077 = vmatprep.mubr.msk.bf16.mxu0 %vm4786_vm0, %v4785_v0  ;;  %v4495_v7 = vld [vmem:[#allocation11 + $0x60] sm:$0xff]  }
 0xa0e   :  { %4063 = vmatprep.subr.bf16.mxu0 %v4785_v0 }
 0xa11   :  { %4064 = vmatpush3.bf16.msra.mxu0 %v4477_v32 }
 0xa12   :  { %4065 = vmatprep.subr.bf16.mxu0 %v4785_v0 }
 0xa15   :  { %4066 = vmatpush3.bf16.msra.mxu0 %v4478_v33 }
 0xa16   :  { %4067 = vmatprep.subr.bf16.mxu0 %v4785_v0 }
 0xa19   :  { %4068 = vmatpush3.bf16.msra.mxu0 %v4479_v12 }
 0xa1a   :  { %4069 = vmatprep.subr.bf16.mxu0 %v4785_v0 }
 0xa1d   :  { %4070 = vmatpush3.bf16.msra.mxu0 %v4480_v34  ;;  %v4497_v34 = vld [vmem:[#allocation11 + $0x50] sm:$0xff]  }
 0xa1e   :  { %4071 = vmatprep.subr.bf16.mxu0 %v4785_v0 }
 0xa21   :  { %4072 = vmatpush3.bf16.msra.mxu0 %v4481_v36  ;;  %v4498_v36 = vld [vmem:[#allocation11 + $0x48] sm:$0xff]  }
 0xa22   :  { %4073 = vmatprep.subr.bf16.mxu0 %v4785_v0 }
 0xa25   :  { %4074 = vmatpush3.bf16.msra.mxu0 %v4482_v37  ;;  %v4499_v37 = vld [vmem:[#allocation11 + $0x40] sm:$0xff]  }
 0xa26   :  { %4075 = vmatprep.subr.bf16.mxu0 %v4785_v0 }
 0xa29   :  { %4076 = vmatpush3.bf16.msra.mxu0 %v4483_v38 }
 0xa2a   :  { %4101 = vmatprep.subr.bf16.mxu0 %v4785_v0 }
 0xa2c   :  { %4078 = vmatmul.mubr.bf16.vlgmr.msra.gmra.mxu0 %v4787_v23 }
 0xa2d   :  { %4117 = vmatprep.mubr.msk.bf16.mxu0 %vm4786_vm0, %v4785_v0  ;;  %4102 = vmatpush3.bf16.msra.mxu0 %v4484_v39 }
 0xa2e   :  { %4103 = vmatprep.subr.bf16.mxu0 %v4785_v0 }
 0xa31   :  { %4104 = vmatpush3.bf16.msra.mxu0 %v4485_v40 }
 0xa32   :  { %4105 = vmatprep.subr.bf16.mxu0 %v4785_v0 }
 0xa35   :  { %4106 = vmatpush3.bf16.msra.mxu0 %v4486_v28 }
 0xa36   :  { %4107 = vmatprep.subr.bf16.mxu0 %v4785_v0 }
 0xa39   :  { %4108 = vmatpush3.bf16.msra.mxu0 %v4487_v57 }
 0xa3a   :  { %4109 = vmatprep.subr.bf16.mxu0 %v4785_v0 }
 0xa3d   :  { %4110 = vmatpush3.bf16.msra.mxu0 %v4488_v58 }
 0xa3e   :  { %4111 = vmatprep.subr.bf16.mxu0 %v4785_v0 }
 0xa41   :  { %4112 = vmatpush3.bf16.msra.mxu0 %v4489_v10  ;;  %v4504_v10 = vld [vmem:[#allocation11 + $0x58] sm:$0xff]  }
 0xa42   :  { %4113 = vmatprep.subr.bf16.mxu0 %v4785_v0 }
 0xa45   :  { %4114 = vmatpush3.bf16.msra.mxu0 %v4490_v60 }
 0xa46   :  { %4115 = vmatprep.subr.bf16.mxu0 %v4785_v0 }
 0xa49   :  { %4116 = vmatpush3.bf16.msra.mxu0 %v4491_v62 }
 0xa4a   :  { %4141 = vmatprep.subr.bf16.mxu0 %v4785_v0 }
 0xacc   :  { %v1258_v44 = vpop.f32.mrf.mxu0 }
 0xacd   :  { %v5080_v45 = vadd.f32 %v1258_v44, %v235_v42 }
 0xace   :  { %v4035_v47 = vpop.f32.mrf.mxu0 }
 0xad0   :  { %v1261_v48 = vpop.f32.mrf.mxu0 }
 0xad2   :  { %v4036_v23 = vpop.f32.mrf.mxu0 }
 0xaec   :  { %v1548_v53 = vpop.f32.mrf.mxu0 }
 0xaed   :  { %v1554_v54 = vadd.f32 %v1548_v53, %v1406_v52  ;;  %v4500_v53 = vld [vmem:[#allocation11 + $0x78] sm:$0xff]  }
 0xaee   :  { %v4079_v55 = vpop.f32.mrf.mxu0 }
 0xaef   :  { %v1555_v30 = vmul.f32 %v1554_v54, %v4881_v35  ;;  %v4501_v54 = vld [vmem:[#allocation11 + $0x70] sm:$0xff]   ;;  %v1414_v55 = vadd.f32 %v5082_v49, %v5087_v51 }
 0xaf0   :  { %v1551_v11 = vpop.f32.mrf.mxu0 }
 0xaf1   :  { %4632 = vtanh.f32 %v1555_v30  ;;  %v1265_v30 = vmul.f32 %v5080_v45, %v4881_v35 }
 0xaf2   :  { %v4080_v56 = vpop.f32.mrf.mxu0 }
 0xafe   :  { %v4633_v3 = vpop.eup %4632 }
 0xaff   :  { %v1557_v41 = vmul.f32 %v4633_v3, %v4881_v35 }
 0xb01   :  { %v1558_v59 = vadd.f32 %v1557_v41, %v4888_v43  ;;  %v4502_v41 = vld [vmem:[#allocation11 + $0x68] sm:$0xff]  }
 0xb03   :  { %1561 = vrot.lane.b32.xlu0 %v1558_v59, %s4778_s24  ;;  %1559 = vrot.lane.b32.xlu1 %v1558_v59, %s4790_s20 }
 0xb07   :  { %1563 = vrot.lane.b32.xlu1 %v1558_v59, %s4789_s19 }
 0xb75   :  { %v1562_v63 = vpop.permute.xlu0 %1561  ;;  %v1560_v1 = vpop.permute.xlu1 %1559 }
 0xb76   :  { %v1567_v13 = vmul.f32 %v1562_v63, %v1558_v59  ;;  %v1566_v46 = vmul.f32 0.0, %v1560_v1  ;;  %v4503_v59 = vld [vmem:[#allocation11 + $0x60] sm:$0xff]   ;;  %v4505_v1 = vld [vmem:[#allocation11 + $0x50] sm:$0xff]  }
 0xb78   :  { %v1568_v2 = vadd.f32 %v1567_v13, %v1566_v46  ;;  %v4506_v46 = vld [vmem:[#allocation11 + $0x48] sm:$0xff]  }
 0xb79   :  { %v1564_v6 = vpop.permute.xlu1 %1563 }
 0xb7a   :  { %v1569_v4 = vmul.f32 %v4903_v61, %v1568_v2  ;;  %v4507_v2 = vld [vmem:[#allocation11 + $0x40] sm:$0xff]  }
 0xb7c   :  { %4634 = vtanh.f32 %v1569_v4 }
 0xb89   :  { %v4635_v5 = vpop.eup %4634 }
 0xb8a   :  { %v1571_v8 = vmul.f32 %v4635_v5, %v1564_v6 }
 0xb8c   :  { %v5103_v14 = vpack.c.bf16 %v1571_v8, %v1571_v8 }
 0xb8e   :  { %4118 = vmatmul.mubr.bf16.vlgmr.msra.gmra.mxu0 %v5103_v14 }
 0xb8f   :  { %4157 = vmatprep.mubr.msk.bf16.mxu0 %vm4786_vm0, %v4785_v0  ;;  %4142 = vmatpush3.bf16.msra.mxu0 %v4492_v9 }
 0xb90   :  { %4143 = vmatprep.subr.bf16.mxu0 %v4785_v0 }
 0xb93   :  { %4144 = vmatpush3.bf16.msra.mxu0 %v4493_v15 }
 0xb94   :  { %4145 = vmatprep.subr.bf16.mxu0 %v4785_v0 }
 0xb97   :  { %4146 = vmatpush3.bf16.msra.mxu0 %v4494_v27  ;;  %v4510_v27 = vld [vmem:[#allocation12 + $0x28] sm:$0xff]  }
 0xb98   :  { %4147 = vmatprep.subr.bf16.mxu0 %v4785_v0 }
 0xb9b   :  { %4148 = vmatpush3.bf16.msra.mxu0 %v4495_v7  ;;  %v4512_v7 = vld [vmem:[#allocation12 + $0x20] sm:$0xff]  }
 0xb9c   :  { %4149 = vmatprep.subr.bf16.mxu0 %v4785_v0 }
 0xb9f   :  { %4150 = vmatpush3.bf16.msra.mxu0 %v4496_v31  ;;  %v1417_v31 = vadd.f32 %v5110_v16, %v5087_v51  ;;  %v4518_v16 = vld [vmem:[#allocation12 + $0x8] sm:$0xff]  }
 0xba0   :  { %4151 = vmatprep.subr.bf16.mxu0 %v4785_v0 }
 0xba3   :  { %4152 = vmatpush3.bf16.msra.mxu0 %v4497_v34 }
 0xba4   :  { %4153 = vmatprep.subr.bf16.mxu0 %v4785_v0 }
 0xba7   :  { %4154 = vmatpush3.bf16.msra.mxu0 %v4498_v36 }
 0xba8   :  { %4155 = vmatprep.subr.bf16.mxu0 %v4785_v0 }
 0xbab   :  { %4156 = vmatpush3.bf16.msra.mxu0 %v4499_v37 }
 0xbac   :  { %4181 = vmatprep.subr.bf16.mxu0 %v4785_v0 }
 0xc4e   :  { %v1788_v19 = vpop.f32.mrf.mxu0 }
 0xc4f   :  { %v1794_v20 = vadd.f32 %v1788_v19, %v1409_v18 }
 0xc50   :  { %v4119_v21 = vpop.f32.mrf.mxu0 }
 0xc51   :  { %v1795_v22 = vmul.f32 %v1794_v20, %v4881_v35  ;;  %v4508_v21 = vld [vmem:[#allocation12 + $0x38] sm:$0xff]  }
 0xc52   :  { %v1791_v24 = vpop.f32.mrf.mxu0  ;;  %4082 = vmatpush3.bf16.msra.mxu1 %v4508_v21  ;;  %v4535_v21 = vld [vmem:[#allocation12 + $0x20] sm:$0xff]  }
 0xc53   :  { %4636 = vtanh.f32 %v1795_v22  ;;  %v4511_v22 = vld [vmem:[#allocation11 + $0x78] sm:$0xff]   ;;  %v4509_v24 = vld [vmem:[#allocation12 + $0x30] sm:$0xff]   ;;  %4083 = vmatprep.subr.bf16.mxu1 %v4785_v0 }
 0xc54   :  { %v4120_v26 = vpop.f32.mrf.mxu0 }
 0xc55   :  { %v4513_v26 = vld [vmem:[#allocation11 + $0x70] sm:$0xff]  }
 0xc56   :  { %4084 = vmatpush3.bf16.msra.mxu1 %v4509_v24  ;;  %v4538_v24 = vld [vmem:[#allocation12 + $0x8] sm:$0xff]  }
 0xc57   :  { %4085 = vmatprep.subr.bf16.mxu1 %v4785_v0 }
 0xc5a   :  { %4086 = vmatpush3.bf16.msra.mxu1 %v4510_v27  ;;  %v4540_v27 = vld [vmem:[#allocation12 + $0x38] sm:$0xff]  }
 0xc5b   :  { %4087 = vmatprep.subr.bf16.mxu1 %v4785_v0 }
 0xc5e   :  { %4088 = vmatpush3.bf16.msra.mxu1 %v4512_v7  ;;  %v4541_v7 = vld [vmem:[#allocation12 + $0x30] sm:$0xff]  }
 0xc5f   :  { %4089 = vmatprep.subr.bf16.mxu1 %v4785_v0 }
 0xc60   :  { %v4637_v32 = vpop.eup %4636 }
 0xc61   :  { %v1797_v33 = vmul.f32 %v4637_v32, %v4881_v35 }
 0xc63   :  { %v1798_v12 = vadd.f32 %v1797_v33, %v4888_v43 }
 0xc65   :  { %1801 = vrot.lane.b32.xlu1 %v1798_v12, %s4778_s24  ;;  %1799 = vrot.lane.b32.xlu0 %v1798_v12, %s4790_s20 }
 0xc69   :  { %1803 = vrot.lane.b32.xlu0 %v1798_v12, %s4789_s19 }
 0xcd7   :  { %v1802_v38 = vpop.permute.xlu1 %1801  ;;  %v1800_v39 = vpop.permute.xlu0 %1799 }
 0xcd8   :  { %v1807_v40 = vmul.f32 %v1802_v38, %v1798_v12  ;;  %v1806_v42 = vmul.f32 %v1800_v39, %v1569_v4  ;;  %v4514_v38 = vld [vmem:[#allocation12 + $0x18] sm:$0xff]   ;;  %v4515_v39 = vld [vmem:[#allocation11 + $0x68] sm:$0xff]  }
 0xcd9   :  { %4090 = vmatpush3.bf16.msra.mxu1 %v4514_v38  ;;  %v4550_v38 = vld [vmem:[#allocation12 + $0x30] sm:$0xff]  }
 0xcda   :  { %v1808_v44 = vadd.f32 %v1807_v40, %v1806_v42  ;;  %4091 = vmatprep.subr.bf16.mxu1 %v4785_v0  ;;  %v4516_v40 = vld [vmem:[#allocation12 + $0x10] sm:$0xff]   ;;  %v4517_v42 = vld [vmem:[#allocation11 + $0x60] sm:$0xff]  }
 0xcdb   :  { %v1804_v23 = vpop.permute.xlu0 %1803 }
 0xcdc   :  { %v1809_v47 = vmul.f32 %v4903_v61, %v1808_v44  ;;  %v4519_v44 = vld [vmem:[#allocation11 + $0x58] sm:$0xff]  }
 0xcdd   :  { %4092 = vmatpush3.bf16.msra.mxu1 %v4516_v40 }
 0xcde   :  { %4638 = vtanh.f32 %v1809_v47  ;;  %4093 = vmatprep.subr.bf16.mxu1 %v4785_v0 }
 0xcdf   :  { %4640 = vtanh.f32 %v1265_v30 }
 0xce1   :  { %4094 = vmatpush3.bf16.msra.mxu1 %v4518_v16 }
 0xce2   :  { %4095 = vmatprep.subr.bf16.mxu1 %v4785_v0 }
 0xceb   :  { %v4639_v48 = vpop.eup %4638 }
 0xcec   :  { %v1811_v50 = vmul.f32 %v4639_v48, %v1804_v23  ;;  %v4641_v49 = vpop.eup %4640  ;;  %v4520_v23 = vld [vmem:[#allocation12] sm:$0xff]  }
 0xced   :  { %v1267_v63 = vmul.f32 %v4641_v49, %v4881_v35  ;;  %4096 = vmatpush3.bf16.msra.mxu1 %v4520_v23 }
 0xcee   :  { %v5126_v52 = vpack.c.bf16 %v1811_v50, %v1811_v50  ;;  %4121 = vmatprep.subr.bf16.mxu1 %v4785_v0 }
 0xcef   :  { %v5147_v13 = vadd.f32 %v1267_v63, %v4888_v43 }
 0xcf0   :  { %4158 = vmatmul.mubr.bf16.vlgmr.msra.gmra.mxu0 %v5126_v52 }
 0xcf1   :  { %4197 = vmatprep.mubr.msk.bf16.mxu0 %vm4786_vm0, %v4785_v0  ;;  %4182 = vmatpush3.bf16.msra.mxu0 %v4500_v53  ;;  %v4521_v53 = vld [vmem:[#allocation11 + $0x50] sm:$0xff]  }
 0xcf2   :  { %4183 = vmatprep.subr.bf16.mxu0 %v4785_v0 }
 0xcf5   :  { %4184 = vmatpush3.bf16.msra.mxu0 %v4501_v54  ;;  %v4523_v54 = vld [vmem:[#allocation11 + $0x48] sm:$0xff]  }
 0xcf6   :  { %4185 = vmatprep.subr.bf16.mxu0 %v4785_v0 }
 0xcf9   :  { %4186 = vmatpush3.bf16.msra.mxu0 %v4502_v41 }
 0xcfa   :  { %4187 = vmatprep.subr.bf16.mxu0 %v4785_v0 }
 0xcfd   :  { %4188 = vmatpush3.bf16.msra.mxu0 %v4503_v59 }
 0xcfe   :  { %4189 = vmatprep.subr.bf16.mxu0 %v4785_v0 }
 0xd01   :  { %4190 = vmatpush3.bf16.msra.mxu0 %v4504_v10 }
 0xd02   :  { %4191 = vmatprep.subr.bf16.mxu0 %v4785_v0 }
 0xd05   :  { %4192 = vmatpush3.bf16.msra.mxu0 %v4505_v1  ;;  %v4522_v1 = vld [vmem:[#allocation12 + $0x38] sm:$0xff]  }
 0xd06   :  { %4193 = vmatprep.subr.bf16.mxu0 %v4785_v0 }
 0xd09   :  { %4194 = vmatpush3.bf16.msra.mxu0 %v4506_v46 }
 0xd0a   :  { %4195 = vmatprep.subr.bf16.mxu0 %v4785_v0 }
 0xd0d   :  { %4196 = vmatpush3.bf16.msra.mxu0 %v4507_v2 }
 0xd0e   :  { %4221 = vmatprep.subr.bf16.mxu0 %v4785_v0 }
 0xdb0   :  { %v2029_v11 = vpop.f32.mrf.mxu0 }
 0xdb1   :  { %v2035_v56 = vadd.f32 %v2029_v11, %v1414_v55  ;;  %v4525_v55 = vld [vmem:[#allocation11 + $0x40] sm:$0xff]  }
 0xdb2   :  { %v4159_v28 = vpop.f32.mrf.mxu0 }
 0xdb3   :  { %v2036_v57 = vmul.f32 %v2035_v56, %v4881_v35 }
 0xdb4   :  { %v2032_v58 = vpop.f32.mrf.mxu0 }
 0xdb5   :  { %4642 = vtanh.f32 %v2036_v57 }
 0xdb6   :  { %v4160_v3 = vpop.f32.mrf.mxu0 }
 0xdc2   :  { %v4643_v45 = vpop.eup %4642 }
 0xdc3   :  { %v2038_v60 = vmul.f32 %v4643_v45, %v4881_v35 }
 0xdc5   :  { %v2039_v62 = vadd.f32 %v2038_v60, %v4888_v43 }
 0xdc7   :  { %2042 = vrot.lane.b32.xlu0 %v2039_v62, %s4778_s24  ;;  %2040 = vrot.lane.b32.xlu1 %v2039_v62, %s4790_s20 }
 0xdcb   :  { %1269 = vrot.lane.b32.xlu0 %v5147_v13, %s4790_s20  ;;  %2044 = vrot.lane.b32.xlu1 %v2039_v62, %s4789_s19 }
 0xdcf   :  { %1271 = vrot.lane.b32.xlu1 %v5147_v13, %s4778_s24 }
 0xe39   :  { %v2043_v4 = vpop.permute.xlu0 %2042  ;;  %v2041_v5 = vpop.permute.xlu1 %2040 }
 0xe3a   :  { %v2048_v6 = vmul.f32 %v2043_v4, %v2039_v62  ;;  %v2047_v8 = vmul.f32 %v2041_v5, %v1809_v47  ;;  %v4526_v5 = vld [vmem:[#allocation12 + $0x28] sm:$0xff]  }
 0xe3c   :  { %v2049_v9 = vadd.f32 %v2048_v6, %v2047_v8  ;;  %v4528_v6 = vld [vmem:[#allocation12 + $0x18] sm:$0xff]   ;;  %v4529_v8 = vld [vmem:[#allocation12 + $0x10] sm:$0xff]  }
 0xe3d   :  { %v2045_v18 = vpop.permute.xlu1 %2044  ;;  %v1270_v11 = vpop.permute.xlu0 %1269 }
 0xe3e   :  { %v5158_v15 = vmul.f32 %v4903_v61, %v2049_v9  ;;  %v1276_v28 = vmul.f32 %v1270_v11, %v5056_v25  ;;  %v4530_v9 = vld [vmem:[#allocation12 + $0x8] sm:$0xff]  }
 0xe40   :  { %4644 = vtanh.f32 %v5158_v15 }
 0xe41   :  { %v1272_v30 = vpop.permute.xlu1 %1271 }
 0xe42   :  { %v1277_v56 = vmul.f32 %v1272_v30, %v5147_v13 }
 0xe44   :  { %v1278_v57 = vadd.f32 %v1277_v56, %v1276_v28 }
 0xe46   :  { %v1279_v58 = vmul.f32 %v4903_v61, %v1278_v57 }
 0xe4d   :  { %v4645_v17 = vpop.eup %4644 }
 0xe4e   :  { %v2052_v19 = vmul.f32 %v4645_v17, %v2045_v18  ;;  %v4532_v17 = vld [vmem:[#allocation12 + $0x38] sm:$0xff]   ;;  %v4533_v18 = vld [vmem:[#allocation12 + $0x30] sm:$0xff]  }
 0xe50   :  { %v5161_v20 = vpack.c.bf16 %v2052_v19, %v2052_v19  ;;  %v4534_v19 = vld [vmem:[#allocation12 + $0x28] sm:$0xff]  }
 0xe52   :  { %4198 = vmatmul.mubr.bf16.vlgmr.msra.gmra.mxu0 %v5161_v20 }
 0xe53   :  { %4237 = vmatprep.mubr.msk.bf16.mxu0 %vm4786_vm0, %v4785_v0  ;;  %4222 = vmatpush3.bf16.msra.mxu0 %v4511_v22  ;;  %v4536_v22 = vld [vmem:[#allocation12 + $0x18] sm:$0xff]  }
 0xe54   :  { %4223 = vmatprep.subr.bf16.mxu0 %v4785_v0 }
 0xe57   :  { %4224 = vmatpush3.bf16.msra.mxu0 %v4513_v26  ;;  %v4539_v26 = vld [vmem:[#allocation12] sm:$0xff]  }
 0xe58   :  { %4225 = vmatprep.subr.bf16.mxu0 %v4785_v0 }
 0xe5b   :  { %4226 = vmatpush3.bf16.msra.mxu0 %v4515_v39  ;;  %v4551_v39 = vld [vmem:[#allocation11 + $0x70] sm:$0xff]  }
 0xe5c   :  { %4227 = vmatprep.subr.bf16.mxu0 %v4785_v0 }
 0xe5f   :  { %4228 = vmatpush3.bf16.msra.mxu0 %v4517_v42 }
 0xe60   :  { %4229 = vmatprep.subr.bf16.mxu0 %v4785_v0 }
 0xe63   :  { %4230 = vmatpush3.bf16.msra.mxu0 %v4519_v44 }
 0xe64   :  { %4231 = vmatprep.subr.bf16.mxu0 %v4785_v0 }
 0xe67   :  { %4232 = vmatpush3.bf16.msra.mxu0 %v4521_v53 }
 0xe68   :  { %4233 = vmatprep.subr.bf16.mxu0 %v4785_v0 }
 0xe6b   :  { %4234 = vmatpush3.bf16.msra.mxu0 %v4523_v54 }
 0xe6c   :  { %4235 = vmatprep.subr.bf16.mxu0 %v4785_v0 }
 0xe6f   :  { %4236 = vmatpush3.bf16.msra.mxu0 %v4525_v55 }
 0xe70   :  { %4261 = vmatprep.subr.bf16.mxu0 %v4785_v0 }
 0xf12   :  { %v2270_v32 = vpop.f32.mrf.mxu0 }
 0xf13   :  { %v2276_v33 = vadd.f32 %v2270_v32, %v1417_v31  ;;  %v4542_v31 = vld [vmem:[#allocation12 + $0x28] sm:$0xff]   ;;  %v4543_v32 = vld [vmem:[#allocation12 + $0x20] sm:$0xff]  }
 0xf14   :  { %v4199_v12 = vpop.f32.mrf.mxu0 }
 0xf15   :  { %v2277_v34 = vmul.f32 %v2276_v33, %v4881_v35  ;;  %v4544_v33 = vld [vmem:[#allocation12 + $0x18] sm:$0xff]   ;;  %v4546_v12 = vld [vmem:[#allocation12 + $0x8] sm:$0xff]  }
 0xf16   :  { %v2273_v36 = vpop.f32.mrf.mxu0 }
 0xf17   :  { %4646 = vtanh.f32 %v2277_v34  ;;  %v4547_v34 = vld [vmem:[#allocation12] sm:$0xff]   ;;  %v4548_v36 = vld [vmem:[#allocation12 + $0x38] sm:$0xff]  }
 0xf18   :  { %v4200_v37 = vpop.f32.mrf.mxu0  ;;  %4648 = vtanh.f32 %v1279_v58 }
 0xf19   :  { %v4549_v37 = vld [vmem:[#allocation11 + $0x78] sm:$0xff]  }
 0xf24   :  { %v4647_v47 = vpop.eup %4646 }
 0xf25   :  { %v2279_v48 = vmul.f32 %v4647_v47, %v4881_v35  ;;  %v4649_v45 = vpop.eup %4648  ;;  %v5257_v47 = vld [vmem:[%s5387_s5] ss:$0 sm:$0xff] }
 0xf27   :  { %v2280_v50 = vadd.f32 %v2279_v48, %v4888_v43 }
 0xf29   :  { %2283 = vrot.lane.b32.xlu1 %v2280_v50, %s4778_s24  ;;  %2281 = vrot.lane.b32.xlu0 %v2280_v50, %s4790_s20 }
 0xf2d   :  { %2285 = vrot.lane.b32.xlu1 %v2280_v50, %s4789_s19  ;;  %1273 = vrot.lane.b32.xlu0 %v5147_v13, %s4789_s19  ;;  %v4524_v13 = vld [vmem:[#allocation12 + $0x30] sm:$0xff]  }
 0xf9b   :  { %v2284_v3 = vpop.permute.xlu1 %2283  ;;  %v2282_v41 = vpop.permute.xlu0 %2281 }
 0xf9c   :  { %v2289_v59 = vmul.f32 %v2284_v3, %v2280_v50  ;;  %v2288_v49 = vmul.f32 %v2282_v41, %v5158_v15  ;;  %v4531_v15 = vld [vmem:[#allocation12] sm:$0xff]   ;;  %v4552_v3 = vld [vmem:[#allocation12 + $0x28] sm:$0xff]  }
 0xf9d   :  { %v4553_v41 = vld [vmem:[#allocation11 + $0x68] sm:$0xff]  }
 0xf9e   :  { %v2290_v10 = vadd.f32 %v2289_v59, %v2288_v49  ;;  %v4554_v59 = vld [vmem:[#allocation12 + $0x20] sm:$0xff]  }
 0xf9f   :  { %v1274_v60 = vpop.permute.xlu0 %1273  ;;  %v2286_v2 = vpop.permute.xlu1 %2285  ;;  %v4555_v49 = vld [vmem:[#allocation11 + $0x60] sm:$0xff]  }
 0xfa0   :  { %v5197_v62 = vmul.f32 %v4903_v61, %v2290_v10  ;;  %v1281_v63 = vmul.f32 %v4649_v45, %v1274_v60  ;;  %v4556_v45 = vld [vmem:[#allocation12 + $0x18] sm:$0xff]  }
 0xfa1   :  { %v4557_v60 = vld [vmem:[#allocation11 + $0x58] sm:$0xff]  }
 0xfa2   :  { %4650 = vtanh.f32 %v5197_v62  ;;  %v1314_v25 = vpack.c.bf16 %v1281_v63, %v5059_v29 }
 0xfa4   :  { %4058 = vmatmul.mubr.bf16.gmra.mxu1 %v1314_v25 }
 0xfa5   :  { %4097 = vmatprep.mubr.msk.bf16.mxu1 %vm4786_vm0, %v4785_v0 }
 0xfac   :  { %4098 = vmatmul.mubr.bf16.vlgmr.msra.gmra.mxu1 %v5103_v14  ;;  %v4527_v14 = vld [vmem:[#allocation12 + $0x20] sm:$0xff]  }
 0xfad   :  { %4122 = vmatpush3.bf16.msra.mxu1 %v4522_v1  ;;  %4137 = vmatprep.mubr.msk.bf16.mxu1 %vm4786_vm0, %v4785_v0  ;;  %v4558_v1 = vld [vmem:[#allocation12 + $0x10] sm:$0xff]  }
 0xfae   :  { %4123 = vmatprep.subr.bf16.mxu1 %v4785_v0 }
 0xfaf   :  { %v4651_v46 = vpop.eup %4650 }
 0xfb0   :  { %v2293_v4 = vmul.f32 %v4651_v46, %v2286_v2 }
 0xfb1   :  { %4124 = vmatpush3.bf16.msra.mxu1 %v4524_v13  ;;  %v4559_v13 = vld [vmem:[#allocation11 + $0x50] sm:$0xff]  }
 0xfb2   :  { %v5207_v29 = vpack.c.bf16 %v2293_v4, %v2293_v4  ;;  %4125 = vmatprep.subr.bf16.mxu1 %v4785_v0 }
 0xfb4   :  { %4238 = vmatmul.mubr.bf16.vlgmr.msra.gmra.mxu0 %v5207_v29 }
 0xfb5   :  { %4126 = vmatpush3.bf16.msra.mxu1 %v4526_v5  ;;  %4277 = vmatprep.mubr.msk.bf16.mxu0 %vm4786_vm0, %v4785_v0  ;;  %v4560_v5 = vld [vmem:[#allocation12 + $0x8] sm:$0xff]  }
 0xfb6   :  { %4127 = vmatprep.subr.bf16.mxu1 %v4785_v0  ;;  %4262 = vmatpush3.bf16.msra.mxu0 %v4549_v37 }
 0xfb7   :  { %4263 = vmatprep.subr.bf16.mxu0 %v4785_v0 }
 0xfb9   :  { %4128 = vmatpush3.bf16.msra.mxu1 %v4527_v14 }
 0xfba   :  { %4129 = vmatprep.subr.bf16.mxu1 %v4785_v0  ;;  %4264 = vmatpush3.bf16.msra.mxu0 %v4551_v39  ;;  %v4564_v39 = vld [vmem:[#allocation12 + $0x38] sm:$0xff]  }
 0xfbb   :  { %4265 = vmatprep.subr.bf16.mxu0 %v4785_v0 }
 0xfbd   :  { %4130 = vmatpush3.bf16.msra.mxu1 %v4528_v6 }
 0xfbe   :  { %4131 = vmatprep.subr.bf16.mxu1 %v4785_v0  ;;  %4266 = vmatpush3.bf16.msra.mxu0 %v4553_v41  ;;  %v4568_v41 = vld [vmem:[#allocation12 + $0x28] sm:$0xff]  }
 0xfbf   :  { %4267 = vmatprep.subr.bf16.mxu0 %v4785_v0 }
 0xfc1   :  { %4132 = vmatpush3.bf16.msra.mxu1 %v4529_v8  ;;  %v4562_v8 = vld [vmem:[#allocation12] sm:$0xff]  }
 0xfc2   :  { %4133 = vmatprep.subr.bf16.mxu1 %v4785_v0  ;;  %4268 = vmatpush3.bf16.msra.mxu0 %v4555_v49 }
 0xfc3   :  { %4269 = vmatprep.subr.bf16.mxu0 %v4785_v0 }
 0xfc5   :  { %4134 = vmatpush3.bf16.msra.mxu1 %v4530_v9  ;;  %v4563_v9 = vld [vmem:[#allocation11 + $0x40] sm:$0xff]  }
 0xfc6   :  { %4135 = vmatprep.subr.bf16.mxu1 %v4785_v0  ;;  %4270 = vmatpush3.bf16.msra.mxu0 %v4557_v60 }
 0xfc7   :  { %4271 = vmatprep.subr.bf16.mxu0 %v4785_v0 }
 0xfc9   :  { %4136 = vmatpush3.bf16.msra.mxu1 %v4531_v15 }
 0xfca   :  { %4161 = vmatprep.subr.bf16.mxu1 %v4785_v0  ;;  %4272 = vmatpush3.bf16.msra.mxu0 %v4559_v13  ;;  %v4576_v13 = vld [vmem:[#allocation12 + $0x8] sm:$0xff]  }
 0xfcb   :  { %4273 = vmatprep.subr.bf16.mxu0 %v4785_v0 }
 0xfcc   :  { %4138 = vmatmul.mubr.bf16.vlgmr.msra.gmra.mxu1 %v5126_v52  ;;  %v4537_v52 = vld [vmem:[#allocation12 + $0x10] sm:$0xff]  }
 0xfcd   :  { %4162 = vmatpush3.bf16.msra.mxu1 %v4532_v17  ;;  %4177 = vmatprep.mubr.msk.bf16.mxu1 %vm4786_vm0, %v4785_v0 }
 0xfce   :  { %4163 = vmatprep.subr.bf16.mxu1 %v4785_v0 }
 0xfd1   :  { %4164 = vmatpush3.bf16.msra.mxu1 %v4533_v18 }
 0xfd2   :  { %4165 = vmatprep.subr.bf16.mxu1 %v4785_v0 }
 0xfd5   :  { %4166 = vmatpush3.bf16.msra.mxu1 %v4534_v19 }
 0xfd6   :  { %4167 = vmatprep.subr.bf16.mxu1 %v4785_v0 }
 0xfd9   :  { %4168 = vmatpush3.bf16.msra.mxu1 %v4535_v21 }
 0xfda   :  { %4169 = vmatprep.subr.bf16.mxu1 %v4785_v0 }
 0xfdd   :  { %4170 = vmatpush3.bf16.msra.mxu1 %v4536_v22 }
 0xfde   :  { %4171 = vmatprep.subr.bf16.mxu1 %v4785_v0 }
 0xfe1   :  { %4172 = vmatpush3.bf16.msra.mxu1 %v4537_v52 }
 0xfe2   :  { %4173 = vmatprep.subr.bf16.mxu1 %v4785_v0 }
 0xfe5   :  { %4174 = vmatpush3.bf16.msra.mxu1 %v4538_v24 }
 0xfe6   :  { %4175 = vmatprep.subr.bf16.mxu1 %v4785_v0 }
 0xfe9   :  { %4176 = vmatpush3.bf16.msra.mxu1 %v4539_v26 }
 0xfea   :  { %4201 = vmatprep.subr.bf16.mxu1 %v4785_v0 }
 0xfec   :  { %4178 = vmatmul.mubr.bf16.vlgmr.msra.gmra.mxu1 %v5161_v20  ;;  %v4545_v20 = vld [vmem:[#allocation12 + $0x10] sm:$0xff]  }
 0xfed   :  { %4202 = vmatpush3.bf16.msra.mxu1 %v4540_v27  ;;  %4217 = vmatprep.mubr.msk.bf16.mxu1 %vm4786_vm0, %v4785_v0 }
 0xfee   :  { %4203 = vmatprep.subr.bf16.mxu1 %v4785_v0 }
 0xff1   :  { %4204 = vmatpush3.bf16.msra.mxu1 %v4541_v7 }
 0xff2   :  { %4205 = vmatprep.subr.bf16.mxu1 %v4785_v0 }
 0xff5   :  { %4206 = vmatpush3.bf16.msra.mxu1 %v4542_v31 }
 0xff6   :  { %4207 = vmatprep.subr.bf16.mxu1 %v4785_v0 }
 0xff9   :  { %4208 = vmatpush3.bf16.msra.mxu1 %v4543_v32 }
 0xffa   :  { %4209 = vmatprep.subr.bf16.mxu1 %v4785_v0 }
 0xffd   :  { %4210 = vmatpush3.bf16.msra.mxu1 %v4544_v33 }
 0xffe   :  { %4211 = vmatprep.subr.bf16.mxu1 %v4785_v0 }
0x1001   :  { %4212 = vmatpush3.bf16.msra.mxu1 %v4545_v20 }
0x1002   :  { %4213 = vmatprep.subr.bf16.mxu1 %v4785_v0 }
0x1005   :  { %4214 = vmatpush3.bf16.msra.mxu1 %v4546_v12 }
0x1006   :  { %4215 = vmatprep.subr.bf16.mxu1 %v4785_v0 }
0x1009   :  { %4216 = vmatpush3.bf16.msra.mxu1 %v4547_v34 }
0x100a   :  { %4241 = vmatprep.subr.bf16.mxu1 %v4785_v0 }
0x100c   :  { %4218 = vmatmul.mubr.bf16.vlgmr.msra.gmra.mxu1 %v5207_v29  ;;  %v4561_v29 = vld [vmem:[#allocation11 + $0x48] sm:$0xff]  }
0x100d   :  { %4257 = vmatprep.mubr.msk.bf16.mxu1 %vm4786_vm0, %v4785_v0  ;;  %4242 = vmatpush3.bf16.msra.mxu1 %v4548_v36 }
0x100e   :  { %4243 = vmatprep.subr.bf16.mxu1 %v4785_v0  ;;  %4274 = vmatpush3.bf16.msra.mxu0 %v4561_v29 }
0x100f   :  { %4275 = vmatprep.subr.bf16.mxu0 %v4785_v0 }
0x1011   :  { %4244 = vmatpush3.bf16.msra.mxu1 %v4550_v38 }
0x1012   :  { %4245 = vmatprep.subr.bf16.mxu1 %v4785_v0  ;;  %4276 = vmatpush3.bf16.msra.mxu0 %v4563_v9 }
0x1013   :  { %4301 = vmatprep.subr.bf16.mxu0 %v4785_v0 }
0x1015   :  { %4246 = vmatpush3.bf16.msra.mxu1 %v4552_v3 }
0x1016   :  { %4247 = vmatprep.subr.bf16.mxu1 %v4785_v0 }
0x1019   :  { %4248 = vmatpush3.bf16.msra.mxu1 %v4554_v59  ;;  %v4569_v59 = vld [vmem:[#allocation11 + $0x68] sm:$0xff]  }
0x101a   :  { %4249 = vmatprep.subr.bf16.mxu1 %v4785_v0 }
0x101d   :  { %4250 = vmatpush3.bf16.msra.mxu1 %v4556_v45  ;;  %v4573_v45 = vld [vmem:[#allocation11 + $0x58] sm:$0xff]  }
0x101e   :  { %4251 = vmatprep.subr.bf16.mxu1 %v4785_v0 }
0x1021   :  { %4252 = vmatpush3.bf16.msra.mxu1 %v4558_v1  ;;  %v4575_v1 = vld [vmem:[#allocation11 + $0x50] sm:$0xff]  }
0x1022   :  { %4253 = vmatprep.subr.bf16.mxu1 %v4785_v0 }
0x1025   :  { %4254 = vmatpush3.bf16.msra.mxu1 %v4560_v5 }
0x1026   :  { %4255 = vmatprep.subr.bf16.mxu1 %v4785_v0 }
0x1029   :  { %4256 = vmatpush3.bf16.msra.mxu1 %v4562_v8 }
0x102a   :  { %4281 = vmatprep.subr.bf16.mxu1 %v4785_v0 }
0x1064   :  { %v5248_v40 = vpop.f32.mrf.mxu1 }
0x1066   :  { %v1421_v42 = vpop.f32.mrf.mxu1 }
0x1067   :  { %v1422_v55 = vadd.f32 %v5087_v51, %v1421_v42  ;;  %v4566_v42 = vld [vmem:[#allocation12 + $0x30] sm:$0xff]  }
0x1068   :  { %v5250_v16 = vpop.f32.mrf.mxu1 }
0x106a   :  { %v5252_v44 = vpop.f32.mrf.mxu1 }
0x106c   :  { %v1680_v48 = vpop.f32.mrf.mxu1 }
0x106d   :  { %v1681_v23 = vadd.f32 %v5257_v47, %v1680_v48  ;;  %v4567_v48 = vld [vmem:[#allocation11 + $0x70] sm:$0xff]  }
0x106e   :  { %v4099_v50 = vpop.f32.mrf.mxu1 }
0x106f   :  { %1686 = vst [vmem:[#allocation14] sm:$0xff] %v1681_v23  ;;  %v1425_v23 = vadd.f32 %v5087_v51, %v5252_v44  ;;  %v4570_v51 = vld [vmem:[#allocation12 + $0x20] sm:$0xff]  }
0x1070   :  { %v1683_v53 = vpop.f32.mrf.mxu1  ;;  %v4571_v44 = vld [vmem:[#allocation11 + $0x60] sm:$0xff]  }
0x1072   :  { %v4100_v54 = vpop.f32.mrf.mxu1 }
0x1074   :  { %v2511_v30 = vpop.f32.mrf.mxu0 }
0x1075   :  { %v2517_v11 = vadd.f32 %v2511_v30, %v1422_v55 }
0x1076   :  { %v4239_v56 = vpop.f32.mrf.mxu0 }
0x1077   :  { %v2518_v28 = vmul.f32 %v2517_v11, %v4881_v35 }
0x1078   :  { %v2514_v57 = vpop.f32.mrf.mxu0 }
0x1079   :  { %4652 = vtanh.f32 %v2518_v28 }
0x107a   :  { %v4240_v58 = vpop.f32.mrf.mxu0 }
0x1086   :  { %v4653_v10 = vpop.eup %4652 }
0x1087   :  { %v2520_v63 = vmul.f32 %v4653_v10, %v4881_v35  ;;  %v4572_v10 = vld [vmem:[#allocation12 + $0x18] sm:$0xff]  }
0x1089   :  { %v2521_v25 = vadd.f32 %v2520_v63, %v4888_v43 }
0x108b   :  { %2524 = vrot.lane.b32.xlu1 %v2521_v25, %s4778_s24  ;;  %2522 = vrot.lane.b32.xlu0 %v2521_v25, %s4790_s20 }
0x108c   :  { %v1920_v46 = vpop.f32.mrf.mxu1 }
0x108d   :  { %v1921_v2 = vadd.f32 %v5257_v47, %v1920_v46  ;;  %v4577_v46 = vld [vmem:[#allocation11 + $0x48] sm:$0xff]  }
0x108e   :  { %v4139_v4 = vpop.f32.mrf.mxu1 }
0x108f   :  { %1927 = vst [vmem:[#allocation14 + $0x8] sm:$0xff] %v1921_v2  ;;  %2526 = vrot.lane.b32.xlu0 %v2521_v25, %s4789_s19  ;;  %v4578_v2 = vld [vmem:[#allocation12] sm:$0xff]  }
0x1090   :  { %v1923_v14 = vpop.f32.mrf.mxu1  ;;  %v4579_v4 = vld [vmem:[#allocation11 + $0x40] sm:$0xff]  }
0x1092   :  { %v4140_v6 = vpop.f32.mrf.mxu1 }
0x10ac   :  { %v2161_v15 = vpop.f32.mrf.mxu1 }
0x10ad   :  { %v2162_v17 = vadd.f32 %v5257_v47, %v2161_v15 }
0x10ae   :  { %v4179_v18 = vpop.f32.mrf.mxu1 }
0x10af   :  { %2168 = vst [vmem:[#allocation14 + $0x10] sm:$0xff] %v2162_v17 }
0x10b0   :  { %v2164_v19 = vpop.f32.mrf.mxu1 }
0x10b2   :  { %v4180_v21 = vpop.f32.mrf.mxu1 }
0x10b3   :  { %v4580_v21 = vld [vmem:[#allocation12 + $0x38] sm:$0xff]  }
0x10cc   :  { %v2402_v22 = vpop.f32.mrf.mxu1 }
0x10cd   :  { %v2403_v52 = vadd.f32 %v5257_v47, %v2402_v22  ;;  %v4581_v22 = vld [vmem:[#allocation11 + $0x78] sm:$0xff]  }
0x10ce   :  { %v4219_v24 = vpop.f32.mrf.mxu1 }
0x10cf   :  { %2409 = vst [vmem:[#allocation14 + $0x18] sm:$0xff] %v2403_v52  ;;  %v4582_v52 = vld [vmem:[#allocation12 + $0x30] sm:$0xff]  }
0x10d0   :  { %v2405_v26 = vpop.f32.mrf.mxu1  ;;  %v4583_v24 = vld [vmem:[#allocation11 + $0x70] sm:$0xff]  }
0x10d1   :  { %v5332_v26 = vld [vmem:[%s5385_s3 + $0x1] ss:$0 sm:$0xff]  ;;  %s4791_s3 = smov [#allocation14]  }
0x10d2   :  { %v4220_v27 = vpop.f32.mrf.mxu1 }
0x10d3   :  { %v1430_v27 = vadd.f32 %v5332_v26, %v5248_v40  ;;  %v4586_v40 = vld [vmem:[#allocation12 + $0x20] sm:$0xff]  }
0x10fd   :  { %v2525_v7 = vpop.permute.xlu1 %2524  ;;  %v2523_v31 = vpop.permute.xlu0 %2522 }
0x10fe   :  { %v2530_v32 = vmul.f32 %v2525_v7, %v2521_v25  ;;  %v2529_v33 = vmul.f32 %v2523_v31, %v5197_v62  ;;  %v4565_v62 = vld [vmem:[#allocation11 + $0x78] sm:$0xff]   ;;  %v4574_v25 = vld [vmem:[#allocation12 + $0x10] sm:$0xff]  }
0x1100   :  { %v2531_v20 = vadd.f32 %v2530_v32, %v2529_v33 }
0x1101   :  { %v2527_v36 = vpop.permute.xlu0 %2526 }
0x1102   :  { %v5284_v12 = vmul.f32 %v4903_v61, %v2531_v20 }
0x1104   :  { %4654 = vtanh.f32 %v5284_v12 }
0x1111   :  { %v4655_v34 = vpop.eup %4654 }
0x1112   :  { %v2534_v37 = vmul.f32 %v4655_v34, %v2527_v36 }
0x1114   :  { %v2537_v38 = vpack.c.bf16 %v2534_v37, %v2534_v37 }
0x1116   :  { %4258 = vmatmul.mubr.bf16.vlgmr.msra.gmra.mxu1 %v2537_v38  ;;  %4278 = vmatmul.mubr.bf16.vlgmr.msra.gmra.mxu0 %v2537_v38 }
0x1117   :  { %4297 = vmatprep.mubr.msk.bf16.mxu1 %vm4786_vm0, %v4785_v0  ;;  %4317 = vmatprep.mubr.msk.bf16.mxu0 %vm4786_vm0, %v4785_v0 }
0x1118   :  { %4282 = vmatpush3.bf16.msra.mxu1 %v4564_v39  ;;  %4302 = vmatpush3.bf16.msra.mxu0 %v4565_v62  ;;  %v4584_v62 = vld [vmem:[#allocation12 + $0x28] sm:$0xff]  }
0x1119   :  { %4283 = vmatprep.subr.bf16.mxu1 %v4785_v0  ;;  %4303 = vmatprep.subr.bf16.mxu0 %v4785_v0 }
0x111c   :  { %4284 = vmatpush3.bf16.msra.mxu1 %v4566_v42  ;;  %4304 = vmatpush3.bf16.msra.mxu0 %v4567_v48  ;;  %v4585_v42 = vld [vmem:[#allocation11 + $0x68] sm:$0xff]   ;;  %v4587_v48 = vld [vmem:[#allocation11 + $0x60] sm:$0xff]  }
0x111d   :  { %4285 = vmatprep.subr.bf16.mxu1 %v4785_v0  ;;  %4305 = vmatprep.subr.bf16.mxu0 %v4785_v0 }
0x1120   :  { %4286 = vmatpush3.bf16.msra.mxu1 %v4568_v41  ;;  %4306 = vmatpush3.bf16.msra.mxu0 %v4569_v59 }
0x1121   :  { %4287 = vmatprep.subr.bf16.mxu1 %v4785_v0  ;;  %4307 = vmatprep.subr.bf16.mxu0 %v4785_v0 }
0x1124   :  { %4288 = vmatpush3.bf16.msra.mxu1 %v4570_v51  ;;  %4308 = vmatpush3.bf16.msra.mxu0 %v4571_v44 }
0x1125   :  { %4289 = vmatprep.subr.bf16.mxu1 %v4785_v0  ;;  %4309 = vmatprep.subr.bf16.mxu0 %v4785_v0 }
0x1128   :  { %4290 = vmatpush3.bf16.msra.mxu1 %v4572_v10  ;;  %4310 = vmatpush3.bf16.msra.mxu0 %v4573_v45 }
0x1129   :  { %4291 = vmatprep.subr.bf16.mxu1 %v4785_v0  ;;  %4311 = vmatprep.subr.bf16.mxu0 %v4785_v0 }
0x112c   :  { %4292 = vmatpush3.bf16.msra.mxu1 %v4574_v25  ;;  %4312 = vmatpush3.bf16.msra.mxu0 %v4575_v1  ;;  %v4596_v25 = vld [vmem:[#allocation12 + $0x38] sm:$0xff]   ;;  %v4597_v1 = vld [vmem:[#allocation12 + $0x30] sm:$0xff]  }
0x112d   :  { %4293 = vmatprep.subr.bf16.mxu1 %v4785_v0  ;;  %4313 = vmatprep.subr.bf16.mxu0 %v4785_v0 }
0x1130   :  { %4294 = vmatpush3.bf16.msra.mxu1 %v4576_v13  ;;  %4314 = vmatpush3.bf16.msra.mxu0 %v4577_v46  ;;  %v1433_v13 = vadd.f32 %v5332_v26, %v5250_v16  ;;  %v4599_v16 = vld [vmem:[#allocation12 + $0x20] sm:$0xff]   ;;  %v4602_v26 = vld [vmem:[#allocation12 + $0x8] sm:$0xff]  }
0x1131   :  { %4295 = vmatprep.subr.bf16.mxu1 %v4785_v0  ;;  %4315 = vmatprep.subr.bf16.mxu0 %v4785_v0 }
0x1134   :  { %4296 = vmatpush3.bf16.msra.mxu1 %v4578_v2  ;;  %4316 = vmatpush3.bf16.msra.mxu0 %v4579_v4 }
0x1135   :  { %4321 = vmatprep.subr.bf16.mxu1 %v4785_v0  ;;  %4341 = vmatprep.subr.bf16.mxu0 %v4785_v0 }
0x11d6   :  { %v2643_v50 = vpop.f32.mrf.mxu1  ;;  %v2752_v53 = vpop.f32.mrf.mxu0 }
0x11d7   :  { %v2644_v54 = vadd.f32 %v5257_v47, %v2643_v50  ;;  %v2758_v55 = vadd.f32 %v2752_v53, %v1425_v23  ;;  %v4588_v50 = vld [vmem:[#allocation12 + $0x18] sm:$0xff]  }
0x11d8   :  { %v4259_v30 = vpop.f32.mrf.mxu1  ;;  %v4279_v11 = vpop.f32.mrf.mxu0  ;;  %v4589_v53 = vld [vmem:[#allocation11 + $0x58] sm:$0xff]  }
0x11d9   :  { %2650 = vst [vmem:[#allocation14 + $0x20] sm:$0xff] %v2644_v54  ;;  %v2759_v56 = vmul.f32 %v2758_v55, %v4881_v35  ;;  %v4590_v30 = vld [vmem:[#allocation12 + $0x10] sm:$0xff]  }
0x11da   :  { %v2646_v28 = vpop.f32.mrf.mxu1  ;;  %v2755_v57 = vpop.f32.mrf.mxu0  ;;  %v4591_v11 = vld [vmem:[#allocation11 + $0x50] sm:$0xff]  }
0x11db   :  { %4656 = vtanh.f32 %v2759_v56  ;;  %v4592_v56 = vld [vmem:[#allocation12 + $0x8] sm:$0xff]   ;;  %v4594_v57 = vld [vmem:[#allocation12] sm:$0xff]  }
0x11dc   :  { %v4260_v58 = vpop.f32.mrf.mxu1  ;;  %v4280_v3 = vpop.f32.mrf.mxu0  ;;  %v4593_v28 = vld [vmem:[#allocation11 + $0x48] sm:$0xff]  }
0x11dd   :  { %v4595_v58 = vld [vmem:[#allocation11 + $0x40] sm:$0xff]  }
0x11e8   :  { %v4657_v49 = vpop.eup %4656 }
0x11e9   :  { %v2761_v60 = vmul.f32 %v4657_v49, %v4881_v35 }
0x11eb   :  { %v2762_v63 = vadd.f32 %v2761_v60, %v4888_v43 }
0x11ed   :  { %2765 = vrot.lane.b32.xlu0 %v2762_v63, %s4778_s24  ;;  %2763 = vrot.lane.b32.xlu1 %v2762_v63, %s4790_s20 }
0x11f1   :  { %2767 = vrot.lane.b32.xlu1 %v2762_v63, %s4789_s19 }
0x125f   :  { %v2766_v5 = vpop.permute.xlu0 %2765  ;;  %v2764_v29 = vpop.permute.xlu1 %2763 }
0x1260   :  { %v2771_v14 = vmul.f32 %v2766_v5, %v2762_v63  ;;  %v2770_v6 = vmul.f32 %v2764_v29, %v5284_v12 }
0x1262   :  { %v2772_v8 = vadd.f32 %v2771_v14, %v2770_v6 }
0x1263   :  { %v2768_v17 = vpop.permute.xlu1 %2767 }
0x1264   :  { %v5318_v9 = vmul.f32 %v4903_v61, %v2772_v8 }
0x1266   :  { %4658 = vtanh.f32 %v5318_v9 }
0x1273   :  { %v4659_v15 = vpop.eup %4658 }
0x1274   :  { %v2775_v18 = vmul.f32 %v4659_v15, %v2768_v17 }
0x1276   :  { %v2778_v19 = vpack.c.bf16 %v2775_v18, %v2775_v18  ;;  %v4598_v18 = vld [vmem:[#allocation12 + $0x28] sm:$0xff]  }
0x1278   :  { %4298 = vmatmul.mubr.bf16.vlgmr.msra.gmra.mxu1 %v2778_v19  ;;  %4318 = vmatmul.mubr.bf16.vlgmr.msra.gmra.mxu0 %v2778_v19 }
0x1279   :  { %4337 = vmatprep.mubr.msk.bf16.mxu1 %vm4786_vm0, %v4785_v0  ;;  %4357 = vmatprep.mubr.msk.bf16.mxu0 %vm4786_vm0, %v4785_v0 }
0x127a   :  { %4322 = vmatpush3.bf16.msra.mxu1 %v4580_v21  ;;  %4342 = vmatpush3.bf16.msra.mxu0 %v4581_v22  ;;  %v4600_v21 = vld [vmem:[#allocation12 + $0x18] sm:$0xff]  }
0x127b   :  { %4323 = vmatprep.subr.bf16.mxu1 %v4785_v0  ;;  %4343 = vmatprep.subr.bf16.mxu0 %v4785_v0 }
0x127e   :  { %4324 = vmatpush3.bf16.msra.mxu1 %v4582_v52  ;;  %4344 = vmatpush3.bf16.msra.mxu0 %v4583_v24  ;;  %v4601_v24 = vld [vmem:[#allocation12 + $0x10] sm:$0xff]  }
0x127f   :  { %4325 = vmatprep.subr.bf16.mxu1 %v4785_v0  ;;  %4345 = vmatprep.subr.bf16.mxu0 %v4785_v0 }
0x1282   :  { %4326 = vmatpush3.bf16.msra.mxu1 %v4584_v62  ;;  %4346 = vmatpush3.bf16.msra.mxu0 %v4585_v42 }
0x1283   :  { %4327 = vmatprep.subr.bf16.mxu1 %v4785_v0  ;;  %4347 = vmatprep.subr.bf16.mxu0 %v4785_v0 }
0x1286   :  { %4328 = vmatpush3.bf16.msra.mxu1 %v4586_v40  ;;  %4348 = vmatpush3.bf16.msra.mxu0 %v4587_v48 }
0x1287   :  { %4329 = vmatprep.subr.bf16.mxu1 %v4785_v0  ;;  %4349 = vmatprep.subr.bf16.mxu0 %v4785_v0 }
0x128a   :  { %4330 = vmatpush3.bf16.msra.mxu1 %v4588_v50  ;;  %4350 = vmatpush3.bf16.msra.mxu0 %v4589_v53 }
0x128b   :  { %4331 = vmatprep.subr.bf16.mxu1 %v4785_v0  ;;  %4351 = vmatprep.subr.bf16.mxu0 %v4785_v0 }
0x128e   :  { %4332 = vmatpush3.bf16.msra.mxu1 %v4590_v30  ;;  %4352 = vmatpush3.bf16.msra.mxu0 %v4591_v11 }
0x128f   :  { %4333 = vmatprep.subr.bf16.mxu1 %v4785_v0  ;;  %4353 = vmatprep.subr.bf16.mxu0 %v4785_v0 }
0x1292   :  { %4334 = vmatpush3.bf16.msra.mxu1 %v4592_v56  ;;  %4354 = vmatpush3.bf16.msra.mxu0 %v4593_v28 }
0x1293   :  { %4335 = vmatprep.subr.bf16.mxu1 %v4785_v0  ;;  %4355 = vmatprep.subr.bf16.mxu0 %v4785_v0 }
0x1296   :  { %4336 = vmatpush3.bf16.msra.mxu1 %v4594_v57  ;;  %4356 = vmatpush3.bf16.msra.mxu0 %v4595_v58 }
0x1297   :  { %4361 = vmatprep.subr.bf16.mxu1 %v4785_v0 }
0x1338   :  { %v2884_v7 = vpop.f32.mrf.mxu1  ;;  %v2993_v31 = vpop.f32.mrf.mxu0 }
0x1339   :  { %v2885_v32 = vadd.f32 %v5257_v47, %v2884_v7  ;;  %v2999_v33 = vadd.f32 %v2993_v31, %v1430_v27 }
0x133a   :  { %v4299_v20 = vpop.f32.mrf.mxu1  ;;  %v4319_v12 = vpop.f32.mrf.mxu0 }
0x133b   :  { %2891 = vst [vmem:[#allocation14 + $0x28] sm:$0xff] %v2885_v32  ;;  %v3000_v34 = vmul.f32 %v2999_v33, %v4881_v35 }
0x133c   :  { %v2887_v36 = vpop.f32.mrf.mxu1  ;;  %v2996_v37 = vpop.f32.mrf.mxu0 }
0x133d   :  { %4660 = vtanh.f32 %v3000_v34 }
0x133e   :  { %v4300_v38 = vpop.f32.mrf.mxu1  ;;  %v4320_v39 = vpop.f32.mrf.mxu0 }
0x134a   :  { %v4661_v23 = vpop.eup %4660 }
0x134b   :  { %v3002_v54 = vmul.f32 %v4661_v23, %v4881_v35 }
0x134d   :  { %v3003_v55 = vadd.f32 %v3002_v54, %v4888_v43 }
0x134f   :  { %3006 = vrot.lane.b32.xlu1 %v3003_v55, %s4778_s24  ;;  %3004 = vrot.lane.b32.xlu0 %v3003_v55, %s4790_s20 }
0x1353   :  { %3008 = vrot.lane.b32.xlu0 %v3003_v55, %s4789_s19 }
0x13c1   :  { %v3007_v3 = vpop.permute.xlu1 %3006  ;;  %v3005_v41 = vpop.permute.xlu0 %3004 }
0x13c2   :  { %v3012_v59 = vmul.f32 %v3007_v3, %v3003_v55  ;;  %v3011_v51 = vmul.f32 %v3005_v41, %v5318_v9 }
0x13c4   :  { %v3013_v44 = vadd.f32 %v3012_v59, %v3011_v51 }
0x13c5   :  { %v3009_v45 = vpop.permute.xlu0 %3008 }
0x13c6   :  { %v3014_v49 = vmul.f32 %v4903_v61, %v3013_v44 }
0x13c8   :  { %4662 = vtanh.f32 %v3014_v49 }
0x13d5   :  { %v4663_v10 = vpop.eup %4662 }
0x13d6   :  { %v3016_v60 = vmul.f32 %v4663_v10, %v3009_v45 }
0x13d8   :  { %v3019_v63 = vpack.c.bf16 %v3016_v60, %v3016_v60 }
0x13da   :  { %4338 = vmatmul.mubr.bf16.vlgmr.msra.gmra.mxu1 %v3019_v63  ;;  %4358 = vmatmul.mubr.bf16.vlgmr.msra.gmra.mxu0 %v3019_v63 }
0x13db   :  { %4377 = vmatprep.mubr.msk.bf16.mxu1 %vm4786_vm0, %v4785_v0  ;;  %4362 = vmatpush3.bf16.msra.mxu1 %v4596_v25 }
0x13dc   :  { %4363 = vmatprep.subr.bf16.mxu1 %v4785_v0 }
0x13df   :  { %4364 = vmatpush3.bf16.msra.mxu1 %v4597_v1 }
0x13e0   :  { %4365 = vmatprep.subr.bf16.mxu1 %v4785_v0 }
0x13e3   :  { %4366 = vmatpush3.bf16.msra.mxu1 %v4598_v18 }
0x13e4   :  { %4367 = vmatprep.subr.bf16.mxu1 %v4785_v0 }
0x13e7   :  { %4368 = vmatpush3.bf16.msra.mxu1 %v4599_v16 }
0x13e8   :  { %4369 = vmatprep.subr.bf16.mxu1 %v4785_v0 }
0x13eb   :  { %4370 = vmatpush3.bf16.msra.mxu1 %v4600_v21 }
0x13ec   :  { %4371 = vmatprep.subr.bf16.mxu1 %v4785_v0 }
0x13ef   :  { %4372 = vmatpush3.bf16.msra.mxu1 %v4601_v24 }
0x13f0   :  { %4373 = vmatprep.subr.bf16.mxu1 %v4785_v0 }
0x13f3   :  { %4374 = vmatpush3.bf16.msra.mxu1 %v4602_v26 }
0x13f4   :  { %4375 = vmatprep.subr.bf16.mxu1 %v4785_v0 }
0x149a   :  { %v3125_v46 = vpop.f32.mrf.mxu1  ;;  %v3234_v2 = vpop.f32.mrf.mxu0 }
0x149b   :  { %v3126_v4 = vadd.f32 %v5257_v47, %v3125_v46  ;;  %v3240_v5 = vadd.f32 %v3234_v2, %v1433_v13 }
0x149c   :  { %v4339_v29 = vpop.f32.mrf.mxu1  ;;  %v4359_v14 = vpop.f32.mrf.mxu0 }
0x149d   :  { %3132 = vst [vmem:[#allocation14 + $0x30] sm:$0xff] %v3126_v4  ;;  %v3241_v6 = vmul.f32 %v3240_v5, %v4881_v35 }
0x149e   :  { %v3128_v8 = vpop.f32.mrf.mxu1  ;;  %v3237_v9 = vpop.f32.mrf.mxu0 }
0x149f   :  { %4664 = vtanh.f32 %v3241_v6 }
0x14a0   :  { %v4340_v15 = vpop.f32.mrf.mxu1  ;;  %v4360_v17 = vpop.f32.mrf.mxu0 }
0x14ac   :  { %v4665_v19 = vpop.eup %4664 }
0x14ad   :  { %v3243_v22 = vmul.f32 %v4665_v19, %v4881_v35  ;;  %v4603_v35 = vld [vmem:[#allocation12] sm:$0xff]  }
0x14ae   :  { %4376 = vmatpush3.bf16.msra.mxu1 %v4603_v35 }
0x14af   :  { %v3244_v52 = vadd.f32 %v3243_v22, %v4888_v43 }
0x14b1   :  { %3247 = vrot.lane.b32.xlu0 %v3244_v52, %s4778_s24  ;;  %3245 = vrot.lane.b32.xlu1 %v3244_v52, %s4790_s20  ;;  %s3379_s24 = sshll.u32 %s4791_s3, 4  ;;  %s3380_s24 = int_to_ptr.vmem [resolvable:$true] %s3379_s24 }
0x14b2   :  { %s4749_s27 = scalar_lea.vmem %s3380_s24, 1024  ;;  %p4754_p7 = scmp.lt.s32.totalorder %s3380_s24, %s3380_s24 }
0x14b3   :  { %p4750_p6 = scmp.ne.s32.totalorder %s3380_s24, %s4749_s27  ;;  %p4755_p8 = scmp.lt.s32.totalorder %s4749_s27, %s4749_s27 }
0x14b5   :  { %3249 = vrot.lane.b32.xlu1 %v3244_v52, %s4789_s19  ;;  %p4756_p9 = por %p4755_p8, %p4754_p7 }
0x14b7   :  { %p4757_p10 = pnand %p4756_p9, %p4750_p6 }
0x1523   :  { %v3248_v27 = vpop.permute.xlu0 %3247  ;;  %v3246_v43 = vpop.permute.xlu1 %3245 }
0x1524   :  { %v3253_v7 = vmul.f32 %v3248_v27, %v3244_v52  ;;  %v3252_v31 = vmul.f32 %v3246_v43, %v3014_v49 }
0x1526   :  { %v3254_v32 = vadd.f32 %v3253_v7, %v3252_v31 }
0x1527   :  { %v3250_v12 = vpop.permute.xlu1 %3249 }
0x1528   :  { %v3255_v33 = vmul.f32 %v4903_v61, %v3254_v32 }
0x152a   :  { %4666 = vtanh.f32 %v3255_v33 }
0x1537   :  { %v4667_v20 = vpop.eup %4666 }
0x1538   :  { %v3257_v34 = vmul.f32 %v4667_v20, %v3250_v12 }
0x153a   :  { %v3260_v36 = vpack.c.bf16 %v3257_v34, %v3257_v34 }
0x153c   :  { %4378 = vmatmul.mubr.bf16.vlgmr.msra.gmra.mxu1 %v3260_v36 }
0x15fc   :  { %v3366_v37 = vpop.f32.mrf.mxu1 }
0x15fd   :  { %v3367_v0 = vadd.f32 %v5257_v47, %v3366_v37 }
0x15fe   :  { %v4379_v38 = vpop.f32.mrf.mxu1 }
0x15ff   :  { %3373 = vst [vmem:[#allocation14 + $0x38] sm:$0xff] %v3367_v0 }
0x1600   :  { %v3369_v39 = vpop.f32.mrf.mxu1 }
0x1601   :  { %4760 = shalt.err (!%p4757_p10)
}
0x1602   :  { %3385 = dma.vmem_to_hbm [thread:$0]  %s3380_s24, 1024, %s5388_s6, [#allocation8], %s4781_s7, %s4781_s7, %s4782_s8   ;;  %v4380_v61 = vpop.f32.mrf.mxu1 }
0x1603   :  { %4775 = dma.done.wait [#allocation8], 1024  }
0x1604   :  { %4776 = vsyncadd [#allocation8], 4294966272 }
0x1605   :  { %3389 = vsyncpa [#allocation7], 1 }
0x1606   :  { %3390 = vsyncpa [#allocation10], 1 }
0x1607   :  { %3391 = vsyncpa [#allocation13], 1 }
0x1608   :  { %3392 = vsyncpa [#allocation8], 1 }

</bundles_post_ra>
